<compile_context>
chip_gen: v7x
topology: tpu7x:2x2x1
jax: 0.10.0
libtpu: 0.0.40
codegen_flags: <defaults>
</compile_context>

<pallas_src>
import functools

import jax
import jax.numpy as jnp
import numpy as np
from jax.experimental import pallas as pl
from jax.experimental.pallas import tpu as pltpu


# ----------------------------- host-side helpers -----------------------------

def _edge_masks(h, w, n_frames):
    """(9, 1, n_frames*h*w) f32 validity mask per 3x3 tap (1 = in-bounds).

    Row k = (dh+1)*3 + (dw+1).  The same mask also kills the lanes that a
    circular pltpu.roll wraps across frame / slab boundaries, because every
    wrapped lane is an h/w border lane of some frame.
    """
    q = np.arange(h * w)
    hh, ww = q // w, q % w
    rows = []
    for dh in (-1, 0, 1):
        for dw in (-1, 0, 1):
            ok = ((hh + dh >= 0) & (hh + dh < h) &
                  (ww + dw >= 0) & (ww + dw < w))
            rows.append(ok)
    m = np.stack(rows).astype(np.float32)            # (9, h*w)
    m = np.tile(m, (1, n_frames))                    # (9, n_frames*h*w)
    return jnp.asarray(m.reshape(9, 1, n_frames * h * w))


def _pick_tile_frames(t, hw, per_frame_bytes, budget_bytes, override):
    """Largest divisor of t whose per-step VMEM footprint fits the budget."""
    if override is not None:
        tt = int(override)
        assert t % tt == 0, "tile_frames must divide t"
        assert tt == t or (tt * hw) % 128 == 0, \
            "tile_frames*h*w must be a multiple of 128 (or tile_frames == t)"
        return tt
    cap = max(1, int(budget_bytes // max(per_frame_bytes, 1)))
    valid = [d for d in range(1, t + 1)
             if t % d == 0 and (d == t or (d * hw) % 128 == 0)]
    under = [d for d in valid if d <= cap]
    return max(under) if under else min(valid)


# ------------------------------ kernel bodies --------------------------------

def _spatial_taps(xs, m_ref, ws_ref, w):
    """3x3 'same' conv of the (Cin, N) slab xs -> f32 (Cout, N), no bias.

    Taps are circular rolls (XLU, otherwise idle here) of the in-register
    slab; host-precomputed edge masks zero both the picture borders and the
    roll wrap-around, so no padded staging copy or im2col scratch is needed.
    Each tap is one accumulating MXU dot over Cin.
    """
    n = xs.shape[-1]
    acc = None
    k = 0
    for dh in (-1, 0, 1):
        for dw in (-1, 0, 1):
            off = dh * w + dw
            if dh == 0 and dw == 0:
                tap = xs
            else:
                tap = pltpu.roll(xs, (-off) % n, axis=1)
                tap = jnp.where(m_ref[k] > 0.5, tap, 0.0)
            d = jnp.dot(ws_ref[k], tap, preferred_element_type=jnp.float32)
            acc = d if acc is None else acc + d
            k += 1
    return acc


def _fused_kernel(xp_ref, xm_ref, xn_ref, m_ref, ws_ref, bs_ref, wt_ref, bt_ref,
                  o_ref, y_ref, *, w, hw, tt):
    """Spatial 3x3 conv + temporal k=3 conv for one (batch, t-tile) block."""
    cout = o_ref.shape[1]

    # Contiguous (Cin, (tt+2)*hw) slab: [prev frame | tt main frames | next].
    xs = jnp.concatenate([xp_ref[0], xm_ref[0], xn_ref[0]], axis=-1)

    # Spatial conv of every slab frame, written once into the VMEM scratch.
    y_ref[...] = (_spatial_taps(xs, m_ref, ws_ref, w)
                  + bs_ref[...]).astype(y_ref.dtype)

    # Temporal zero padding: outside the clip the spatial activation is 0.
    jt = pl.program_id(1)

    @pl.when(jt == 0)
    def _():
        y_ref[:, :hw] = jnp.zeros((cout, hw), y_ref.dtype)

    @pl.when(jt == pl.num_programs(1) - 1)
    def _():
        y_ref[:, (tt + 1) * hw:] = jnp.zeros((cout, hw), y_ref.dtype)

    # k=3 'same' Conv1d along t: three lane-aligned slices of the y slab.
    out = None
    for k in range(3):
        yk = y_ref[:, k * hw:(k + tt) * hw]
        d = jnp.dot(wt_ref[k], yk, preferred_element_type=jnp.float32)
        out = d if out is None else out + d
    o_ref[0] = (out + bt_ref[...]).astype(o_ref.dtype)


def _spatial_kernel(xm_ref, m_ref, ws_ref, bs_ref, o_ref, *, w):
    """Spatial-only path (image input or enable_time=False)."""
    acc = _spatial_taps(xm_ref[0], m_ref, ws_ref, w)
    o_ref[0] = (acc + bs_ref[...]).astype(o_ref.dtype)


# -------------------------------- wrapper -------------------------------------

def pseudo_conv3d(x, w_spatial, b_spatial, w_temporal=None, b_temporal=None,
                  enable_time=True, tile_frames=None,
                  vmem_budget_bytes=8 * 1024 * 1024):
    """PseudoConv3d.forward.  x: (b, c, h, w) or (b, c, t, h, w) (PyTorch layout)."""
    is_video = x.ndim == 5
    enable_time = bool(enable_time) and is_video and (w_temporal is not None)

    if is_video:
        b, cin, t, h, w = x.shape
    else:
        b, cin, h, w = x.shape
        t = 1
    hw = h * w
    cout = w_spatial.shape[0]
    assert w_spatial.shape[1:] == (cin, 3, 3), "only kernel_size=3 supported"

    xf = x.reshape(b, cin, t * hw)                                   # free reshape
    ws2 = jnp.transpose(w_spatial, (2, 3, 0, 1)).reshape(9, cout, cin)
    bs2 = b_spatial.reshape(cout, 1).astype(jnp.float32)

    # Budget-driven frames-per-tile (keeps per-step VMEM bounded and gives
    # the pipeline many steps for realistic channel/clip sizes).
    xbytes = x.dtype.itemsize
    per_frame = hw * ((2 * cin + 3 * cout) * xbytes      # dbuf in + dbuf out + y
                      + 9 * 4                            # masks
                      + (2 * cin + 2 * cout) * 4)        # live f32 temporaries
    tt = _pick_tile_frames(t, hw, per_frame, vmem_budget_bytes, tile_frames)
    nt = t // tt

    cparams = pltpu.CompilerParams(
        dimension_semantics=("parallel", "parallel"),
        vmem_limit_bytes=32 * 1024 * 1024)

    if enable_time:
        assert w_temporal.shape == (cout, cout, 3), "temporal kernel_size must be 3"
        if t > 1:
            assert hw % 128 == 0, \
                "h*w must be a multiple of 128 for the tiled video path"
        wt2 = jnp.transpose(w_temporal, (2, 0, 1))                   # (3, cout, cout)
        bt2 = b_temporal.reshape(cout, 1).astype(jnp.float32)
        slab = (tt + 2) * hw
        masks = _edge_masks(h, w, tt + 2)

        in_specs = [
            # previous frame (clamped; its spatial output is zeroed on tile 0)
            pl.BlockSpec((1, cin, hw),
                         lambda ib, jt: (ib, 0, jnp.maximum(jt * tt - 1, 0))),
            # main tile of tt frames
            pl.BlockSpec((1, cin, tt * hw), lambda ib, jt: (ib, 0, jt)),
            # next frame (clamped; zeroed on the last tile)
            pl.BlockSpec((1, cin, hw),
                         lambda ib, jt: (ib, 0, jnp.minimum((jt + 1) * tt, t - 1))),
            pl.BlockSpec((9, 1, slab), lambda ib, jt: (0, 0, 0)),
            pl.BlockSpec((9, cout, cin), lambda ib, jt: (0, 0, 0)),
            pl.BlockSpec((cout, 1), lambda ib, jt: (0, 0)),
            pl.BlockSpec((3, cout, cout), lambda ib, jt: (0, 0, 0)),
            pl.BlockSpec((cout, 1), lambda ib, jt: (0, 0)),
        ]
        scratch_shapes = [pltpu.VMEM((cout, slab), x.dtype)]
        kernel = functools.partial(_fused_kernel, w=w, hw=hw, tt=tt)
        args = (xf, xf, xf, masks, ws2, bs2, wt2, bt2)
    else:
        masks = _edge_masks(h, w, tt)
        in_specs = [
            pl.BlockSpec((1, cin, tt * hw), lambda ib, jt: (ib, 0, jt)),
            pl.BlockSpec((9, 1, tt * hw), lambda ib, jt: (0, 0, 0)),
            pl.BlockSpec((9, cout, cin), lambda ib, jt: (0, 0, 0)),
            pl.BlockSpec((cout, 1), lambda ib, jt: (0, 0)),
        ]
        scratch_shapes = []
        kernel = functools.partial(_spatial_kernel, w=w)
        args = (xf, masks, ws2, bs2)

    out = pl.pallas_call(
        kernel,
        out_shape=jax.ShapeDtypeStruct((b, cout, t * hw), x.dtype),
        grid=(b, nt),
        in_specs=in_specs,
        out_specs=pl.BlockSpec((1, cout, tt * hw), lambda ib, jt: (ib, 0, jt)),
        scratch_shapes=scratch_shapes,
        compiler_params=cparams,
    )(*args)

    if is_video:
        return out.reshape(b, cout, t, h, w)
    return out.reshape(b, cout, h, w)


# ------------------------------ reference ------------------------------------

def reference_video(x, ws, bs, wt, bt_):
    b, c, t, h, w = x.shape
    cout = ws.shape[0]
    xf = jnp.transpose(x, (0, 2, 1, 3, 4)).reshape(b * t, c, h, w)
    y = jax.lax.conv_general_dilated(
        xf, ws, (1, 1), ((1, 1), (1, 1)),
        dimension_numbers=('NCHW', 'OIHW', 'NCHW')) + bs[None, :, None, None]
    y = jnp.transpose(y.reshape(b, t, cout, h, w), (0, 2, 1, 3, 4))   # b c t h w
    if wt is None:
        return y
    xt = jnp.transpose(y, (0, 3, 4, 1, 2)).reshape(b * h * w, cout, t)
    z = jax.lax.conv_general_dilated(
        xt, wt, (1,), ((1, 1),),
        dimension_numbers=('NCH', 'OIH', 'NCH')) + bt_[None, :, None]
    z = jnp.transpose(z.reshape(b, h, w, cout, t), (0, 3, 4, 1, 2))   # b c t h w
    return z


# --------------------------------- main ---------------------------------------

if __name__ == "__main__":
    key = jax.random.PRNGKey(0)
    b, c, t, h, w = 2, 4, 8, 16, 16
    dim, dim_out, K = c, 4, 3
    k1, k2, k3, k4, k5 = jax.random.split(key, 5)

    x = jax.random.normal(k1, (b, c, t, h, w), jnp.float32)

    # spatial Conv2d params (kaiming-uniform-like bound, deterministic)
    fan_in = dim * K * K
    bound = 1.0 / np.sqrt(fan_in)
    w_spatial = jax.random.uniform(k2, (dim_out, dim, K, K), jnp.float32,
                                   -bound, bound)
    b_spatial = jax.random.uniform(k3, (dim_out,), jnp.float32, -bound, bound)

    # temporal Conv1d params exactly as in __init__: dirac weight + zero bias
    w_temporal = jnp.zeros((dim_out, dim_out, K), jnp.float32)
    w_temporal = w_temporal.at[:, :, K // 2].set(
        jnp.eye(dim_out, dtype=jnp.float32))
    b_temporal = jnp.zeros((dim_out,), jnp.float32)

    # 1) module-default (dirac) temporal weights, budget-driven tiling
    out = jax.block_until_ready(
        pseudo_conv3d(x, w_spatial, b_spatial, w_temporal, b_temporal,
                      enable_time=True))
    ref = reference_video(x, w_spatial, b_spatial, w_temporal, b_temporal)
    np.testing.assert_allclose(np.asarray(out), np.asarray(ref),
                               rtol=1e-4, atol=1e-4)

    # 2) general temporal weights + forced small t-tiles (exercises the
    #    clamped halo fetch and the multi-step pipeline)
    w_t2 = jax.random.uniform(k4, (dim_out, dim_out, K), jnp.float32,
                              -bound, bound)
    b_t2 = jax.random.uniform(k5, (dim_out,), jnp.float32, -bound, bound)
    out2 = jax.block_until_ready(
        pseudo_conv3d(x, w_spatial, b_spatial, w_t2, b_t2,
                      enable_time=True, tile_frames=2))
    ref2 = reference_video(x, w_spatial, b_spatial, w_t2, b_t2)
    np.testing.assert_allclose(np.asarray(out2), np.asarray(ref2),
                               rtol=1e-4, atol=1e-4)

    # 3) video with enable_time=False: spatial conv only, tiled over t
    out3 = jax.block_until_ready(
        pseudo_conv3d(x, w_spatial, b_spatial, w_temporal, b_temporal,
                      enable_time=False, tile_frames=4))
    ref3 = reference_video(x, w_spatial, b_spatial, None, None)
    np.testing.assert_allclose(np.asarray(out3), np.asarray(ref3),
                               rtol=1e-4, atol=1e-4)

    # 4) image (4-D) input path: spatial conv only
    x_img = jax.random.normal(k1, (b, c, h, w), jnp.float32)
    out4 = jax.block_until_ready(
        pseudo_conv3d(x_img, w_spatial, b_spatial, w_temporal, b_temporal))
    ref4 = jax.lax.conv_general_dilated(
        x_img, w_spatial, (1, 1), ((1, 1), (1, 1)),
        dimension_numbers=('NCHW', 'OIHW', 'NCHW')
    ) + b_spatial[None, :, None, None]
    np.testing.assert_allclose(np.asarray(out4), np.asarray(ref4),
                               rtol=1e-4, atol=1e-4)

    print("KERNEL_OK")
</pallas_src>

<mosaic_0001>
module attributes {stable_mosaic.version = 11 : i64} {
  func.func @_fused_kernel(%arg0: i32, %arg1: i32, %arg2: memref<1x4x256xf32, #tpu.memory_space<vmem>>, %arg3: memref<1x4x2048xf32, #tpu.memory_space<vmem>>, %arg4: memref<1x4x256xf32, #tpu.memory_space<vmem>>, %arg5: memref<9x1x2560xf32, #tpu.memory_space<vmem>>, %arg6: memref<9x4x4xf32, #tpu.memory_space<vmem>>, %arg7: memref<4x1xf32, #tpu.memory_space<vmem>>, %arg8: memref<3x4x4xf32, #tpu.memory_space<vmem>>, %arg9: memref<4x1xf32, #tpu.memory_space<vmem>>, %arg10: memref<1x4x2048xf32, #tpu.memory_space<vmem>>, %arg11: memref<4x2560xf32, #tpu.memory_space<vmem>>) attributes {dimension_semantics = [#tpu.dimension_semantics<parallel>, #tpu.dimension_semantics<parallel>], iteration_bounds = array<i64: 2, 1>, scalar_prefetch = 0 : i64, scratch_operands = 1 : i64, tpu.core_type = #tpu.core_type<tc>, window_params = [{transform_indices = @transform_0, window_bounds = array<i64: 1, 4, 256>}, {transform_indices = @transform_1, window_bounds = array<i64: 1, 4, 2048>}, {transform_indices = @transform_2, window_bounds = array<i64: 1, 4, 256>}, {pipeline_mode = #tpu.pipeline_mode<synchronous>, transform_indices = @transform_3, window_bounds = array<i64: 9, 1, 2560>}, {pipeline_mode = #tpu.pipeline_mode<synchronous>, transform_indices = @transform_4, window_bounds = array<i64: 9, 4, 4>}, {pipeline_mode = #tpu.pipeline_mode<synchronous>, transform_indices = @transform_5, window_bounds = array<i64: 4, 1>}, {pipeline_mode = #tpu.pipeline_mode<synchronous>, transform_indices = @transform_6, window_bounds = array<i64: 3, 4, 4>}, {pipeline_mode = #tpu.pipeline_mode<synchronous>, transform_indices = @transform_7, window_bounds = array<i64: 4, 1>}, {transform_indices = @transform_8, window_bounds = array<i64: 1, 4, 2048>}]} {
    %c0 = arith.constant 0 : index
    %c0_0 = arith.constant 0 : index
    %c0_1 = arith.constant 0 : index
    %0 = vector.load %arg2[%c0, %c0_0, %c0_1] : memref<1x4x256xf32, #tpu.memory_space<vmem>>, vector<1x4x256xf32>
    %1 = vector.shape_cast %0 : vector<1x4x256xf32> to vector<4x256xf32>
    %c0_2 = arith.constant 0 : index
    %c0_3 = arith.constant 0 : index
    %c0_4 = arith.constant 0 : index
    %2 = vector.load %arg3[%c0_2, %c0_3, %c0_4] : memref<1x4x2048xf32, #tpu.memory_space<vmem>>, vector<1x4x2048xf32>
    %3 = vector.shape_cast %2 : vector<1x4x2048xf32> to vector<4x2048xf32>
    %c0_5 = arith.constant 0 : index
    %c0_6 = arith.constant 0 : index
    %c0_7 = arith.constant 0 : index
    %4 = vector.load %arg4[%c0_5, %c0_6, %c0_7] : memref<1x4x256xf32, #tpu.memory_space<vmem>>, vector<1x4x256xf32>
    %5 = vector.shape_cast %4 : vector<1x4x256xf32> to vector<4x256xf32>
    %6 = tpu.concatenate %1, %3, %5 in 1 : vector<4x256xf32>, vector<4x2048xf32>, vector<4x256xf32> -> vector<4x2560xf32>
    %c17_i32 = arith.constant 17 : i32
    %7 = tpu.dynamic_rotate %6 by %c17_i32 dim 1 : vector<4x2560xf32>, i32 -> vector<4x2560xf32>
    %c0_8 = arith.constant 0 : index
    %c0_9 = arith.constant 0 : index
    %c0_10 = arith.constant 0 : index
    %8 = vector.load %arg5[%c0_8, %c0_9, %c0_10] : memref<9x1x2560xf32, #tpu.memory_space<vmem>>, vector<1x1x2560xf32>
    %9 = vector.shape_cast %8 : vector<1x1x2560xf32> to vector<1x2560xf32>
    %cst = arith.constant 5.000000e-01 : f32
    %10 = vector.broadcast %cst : f32 to vector<1x2560xf32>
    %11 = arith.cmpf ogt, %9, %10 : vector<1x2560xf32>
    %cst_11 = arith.constant 0.000000e+00 : f32
    %12 = vector.shape_cast %11 : vector<1x2560xi1> to vector<1x2560xi1>
    %13 = vector.broadcast %12 : vector<1x2560xi1> to vector<4x2560xi1>
    %14 = vector.broadcast %cst_11 : f32 to vector<4x2560xf32>
    %15 = arith.select %13, %7, %14 : vector<4x2560xi1>, vector<4x2560xf32>
    %c0_12 = arith.constant 0 : index
    %c0_13 = arith.constant 0 : index
    %c0_14 = arith.constant 0 : index
    %16 = vector.load %arg6[%c0_12, %c0_13, %c0_14] : memref<9x4x4xf32, #tpu.memory_space<vmem>>, vector<1x4x4xf32>
    %17 = vector.shape_cast %16 : vector<1x4x4xf32> to vector<4x4xf32>
    %cst_15 = arith.constant dense<0.000000e+00> : vector<4x2560xf32>
    %18 = tpu.matmul %17, %15, %cst_15 {dimension_numbers = #tpu.dot_dimension_numbers<[1], [0], [0], [1], [0, 0, 1, 1], [], []>} : vector<4x4xf32>, vector<4x2560xf32>, vector<4x2560xf32> -> vector<4x2560xf32>
    %c16_i32 = arith.constant 16 : i32
    %19 = tpu.dynamic_rotate %6 by %c16_i32 dim 1 : vector<4x2560xf32>, i32 -> vector<4x2560xf32>
    %c1 = arith.constant 1 : index
    %c0_16 = arith.constant 0 : index
    %c0_17 = arith.constant 0 : index
    %20 = vector.load %arg5[%c1, %c0_16, %c0_17] : memref<9x1x2560xf32, #tpu.memory_space<vmem>>, vector<1x1x2560xf32>
    %21 = vector.shape_cast %20 : vector<1x1x2560xf32> to vector<1x2560xf32>
    %cst_18 = arith.constant 5.000000e-01 : f32
    %22 = vector.broadcast %cst_18 : f32 to vector<1x2560xf32>
    %23 = arith.cmpf ogt, %21, %22 : vector<1x2560xf32>
    %cst_19 = arith.constant 0.000000e+00 : f32
    %24 = vector.shape_cast %23 : vector<1x2560xi1> to vector<1x2560xi1>
    %25 = vector.broadcast %24 : vector<1x2560xi1> to vector<4x2560xi1>
    %26 = vector.broadcast %cst_19 : f32 to vector<4x2560xf32>
    %27 = arith.select %25, %19, %26 : vector<4x2560xi1>, vector<4x2560xf32>
    %c1_20 = arith.constant 1 : index
    %c0_21 = arith.constant 0 : index
    %c0_22 = arith.constant 0 : index
    %28 = vector.load %arg6[%c1_20, %c0_21, %c0_22] : memref<9x4x4xf32, #tpu.memory_space<vmem>>, vector<1x4x4xf32>
    %29 = vector.shape_cast %28 : vector<1x4x4xf32> to vector<4x4xf32>
    %cst_23 = arith.constant dense<0.000000e+00> : vector<4x2560xf32>
    %30 = tpu.matmul %29, %27, %cst_23 {dimension_numbers = #tpu.dot_dimension_numbers<[1], [0], [0], [1], [0, 0, 1, 1], [], []>} : vector<4x4xf32>, vector<4x2560xf32>, vector<4x2560xf32> -> vector<4x2560xf32>
    %31 = arith.addf %18, %30 : vector<4x2560xf32>
    %c15_i32 = arith.constant 15 : i32
    %32 = tpu.dynamic_rotate %6 by %c15_i32 dim 1 : vector<4x2560xf32>, i32 -> vector<4x2560xf32>
    %c2 = arith.constant 2 : index
    %c0_24 = arith.constant 0 : index
    %c0_25 = arith.constant 0 : index
    %33 = vector.load %arg5[%c2, %c0_24, %c0_25] : memref<9x1x2560xf32, #tpu.memory_space<vmem>>, vector<1x1x2560xf32>
    %34 = vector.shape_cast %33 : vector<1x1x2560xf32> to vector<1x2560xf32>
    %cst_26 = arith.constant 5.000000e-01 : f32
    %35 = vector.broadcast %cst_26 : f32 to vector<1x2560xf32>
    %36 = arith.cmpf ogt, %34, %35 : vector<1x2560xf32>
    %cst_27 = arith.constant 0.000000e+00 : f32
    %37 = vector.shape_cast %36 : vector<1x2560xi1> to vector<1x2560xi1>
    %38 = vector.broadcast %37 : vector<1x2560xi1> to vector<4x2560xi1>
    %39 = vector.broadcast %cst_27 : f32 to vector<4x2560xf32>
    %40 = arith.select %38, %32, %39 : vector<4x2560xi1>, vector<4x2560xf32>
    %c2_28 = arith.constant 2 : index
    %c0_29 = arith.constant 0 : index
    %c0_30 = arith.constant 0 : index
    %41 = vector.load %arg6[%c2_28, %c0_29, %c0_30] : memref<9x4x4xf32, #tpu.memory_space<vmem>>, vector<1x4x4xf32>
    %42 = vector.shape_cast %41 : vector<1x4x4xf32> to vector<4x4xf32>
    %cst_31 = arith.constant dense<0.000000e+00> : vector<4x2560xf32>
    %43 = tpu.matmul %42, %40, %cst_31 {dimension_numbers = #tpu.dot_dimension_numbers<[1], [0], [0], [1], [0, 0, 1, 1], [], []>} : vector<4x4xf32>, vector<4x2560xf32>, vector<4x2560xf32> -> vector<4x2560xf32>
    %44 = arith.addf %31, %43 : vector<4x2560xf32>
    %c1_i32 = arith.constant 1 : i32
    %45 = tpu.dynamic_rotate %6 by %c1_i32 dim 1 : vector<4x2560xf32>, i32 -> vector<4x2560xf32>
    %c3 = arith.constant 3 : index
    %c0_32 = arith.constant 0 : index
    %c0_33 = arith.constant 0 : index
    %46 = vector.load %arg5[%c3, %c0_32, %c0_33] : memref<9x1x2560xf32, #tpu.memory_space<vmem>>, vector<1x1x2560xf32>
    %47 = vector.shape_cast %46 : vector<1x1x2560xf32> to vector<1x2560xf32>
    %cst_34 = arith.constant 5.000000e-01 : f32
    %48 = vector.broadcast %cst_34 : f32 to vector<1x2560xf32>
    %49 = arith.cmpf ogt, %47, %48 : vector<1x2560xf32>
    %cst_35 = arith.constant 0.000000e+00 : f32
    %50 = vector.shape_cast %49 : vector<1x2560xi1> to vector<1x2560xi1>
    %51 = vector.broadcast %50 : vector<1x2560xi1> to vector<4x2560xi1>
    %52 = vector.broadcast %cst_35 : f32 to vector<4x2560xf32>
    %53 = arith.select %51, %45, %52 : vector<4x2560xi1>, vector<4x2560xf32>
    %c3_36 = arith.constant 3 : index
    %c0_37 = arith.constant 0 : index
    %c0_38 = arith.constant 0 : index
    %54 = vector.load %arg6[%c3_36, %c0_37, %c0_38] : memref<9x4x4xf32, #tpu.memory_space<vmem>>, vector<1x4x4xf32>
    %55 = vector.shape_cast %54 : vector<1x4x4xf32> to vector<4x4xf32>
    %cst_39 = arith.constant dense<0.000000e+00> : vector<4x2560xf32>
    %56 = tpu.matmul %55, %53, %cst_39 {dimension_numbers = #tpu.dot_dimension_numbers<[1], [0], [0], [1], [0, 0, 1, 1], [], []>} : vector<4x4xf32>, vector<4x2560xf32>, vector<4x2560xf32> -> vector<4x2560xf32>
    %57 = arith.addf %44, %56 : vector<4x2560xf32>
    %c4 = arith.constant 4 : index
    %c0_40 = arith.constant 0 : index
    %c0_41 = arith.constant 0 : index
    %58 = vector.load %arg6[%c4, %c0_40, %c0_41] : memref<9x4x4xf32, #tpu.memory_space<vmem>>, vector<1x4x4xf32>
    %59 = vector.shape_cast %58 : vector<1x4x4xf32> to vector<4x4xf32>
    %cst_42 = arith.constant dense<0.000000e+00> : vector<4x2560xf32>
    %60 = tpu.matmul %59, %6, %cst_42 {dimension_numbers = #tpu.dot_dimension_numbers<[1], [0], [0], [1], [0, 0, 1, 1], [], []>} : vector<4x4xf32>, vector<4x2560xf32>, vector<4x2560xf32> -> vector<4x2560xf32>
    %61 = arith.addf %57, %60 : vector<4x2560xf32>
    %c2559_i32 = arith.constant 2559 : i32
    %62 = tpu.dynamic_rotate %6 by %c2559_i32 dim 1 : vector<4x2560xf32>, i32 -> vector<4x2560xf32>
    %c5 = arith.constant 5 : index
    %c0_43 = arith.constant 0 : index
    %c0_44 = arith.constant 0 : index
    %63 = vector.load %arg5[%c5, %c0_43, %c0_44] : memref<9x1x2560xf32, #tpu.memory_space<vmem>>, vector<1x1x2560xf32>
    %64 = vector.shape_cast %63 : vector<1x1x2560xf32> to vector<1x2560xf32>
    %cst_45 = arith.constant 5.000000e-01 : f32
    %65 = vector.broadcast %cst_45 : f32 to vector<1x2560xf32>
    %66 = arith.cmpf ogt, %64, %65 : vector<1x2560xf32>
    %cst_46 = arith.constant 0.000000e+00 : f32
    %67 = vector.shape_cast %66 : vector<1x2560xi1> to vector<1x2560xi1>
    %68 = vector.broadcast %67 : vector<1x2560xi1> to vector<4x2560xi1>
    %69 = vector.broadcast %cst_46 : f32 to vector<4x2560xf32>
    %70 = arith.select %68, %62, %69 : vector<4x2560xi1>, vector<4x2560xf32>
    %c5_47 = arith.constant 5 : index
    %c0_48 = arith.constant 0 : index
    %c0_49 = arith.constant 0 : index
    %71 = vector.load %arg6[%c5_47, %c0_48, %c0_49] : memref<9x4x4xf32, #tpu.memory_space<vmem>>, vector<1x4x4xf32>
    %72 = vector.shape_cast %71 : vector<1x4x4xf32> to vector<4x4xf32>
    %cst_50 = arith.constant dense<0.000000e+00> : vector<4x2560xf32>
    %73 = tpu.matmul %72, %70, %cst_50 {dimension_numbers = #tpu.dot_dimension_numbers<[1], [0], [0], [1], [0, 0, 1, 1], [], []>} : vector<4x4xf32>, vector<4x2560xf32>, vector<4x2560xf32> -> vector<4x2560xf32>
    %74 = arith.addf %61, %73 : vector<4x2560xf32>
    %c2545_i32 = arith.constant 2545 : i32
    %75 = tpu.dynamic_rotate %6 by %c2545_i32 dim 1 : vector<4x2560xf32>, i32 -> vector<4x2560xf32>
    %c6 = arith.constant 6 : index
    %c0_51 = arith.constant 0 : index
    %c0_52 = arith.constant 0 : index
    %76 = vector.load %arg5[%c6, %c0_51, %c0_52] : memref<9x1x2560xf32, #tpu.memory_space<vmem>>, vector<1x1x2560xf32>
    %77 = vector.shape_cast %76 : vector<1x1x2560xf32> to vector<1x2560xf32>
    %cst_53 = arith.constant 5.000000e-01 : f32
    %78 = vector.broadcast %cst_53 : f32 to vector<1x2560xf32>
    %79 = arith.cmpf ogt, %77, %78 : vector<1x2560xf32>
    %cst_54 = arith.constant 0.000000e+00 : f32
    %80 = vector.shape_cast %79 : vector<1x2560xi1> to vector<1x2560xi1>
    %81 = vector.broadcast %80 : vector<1x2560xi1> to vector<4x2560xi1>
    %82 = vector.broadcast %cst_54 : f32 to vector<4x2560xf32>
    %83 = arith.select %81, %75, %82 : vector<4x2560xi1>, vector<4x2560xf32>
    %c6_55 = arith.constant 6 : index
    %c0_56 = arith.constant 0 : index
    %c0_57 = arith.constant 0 : index
    %84 = vector.load %arg6[%c6_55, %c0_56, %c0_57] : memref<9x4x4xf32, #tpu.memory_space<vmem>>, vector<1x4x4xf32>
    %85 = vector.shape_cast %84 : vector<1x4x4xf32> to vector<4x4xf32>
    %cst_58 = arith.constant dense<0.000000e+00> : vector<4x2560xf32>
    %86 = tpu.matmul %85, %83, %cst_58 {dimension_numbers = #tpu.dot_dimension_numbers<[1], [0], [0], [1], [0, 0, 1, 1], [], []>} : vector<4x4xf32>, vector<4x2560xf32>, vector<4x2560xf32> -> vector<4x2560xf32>
    %87 = arith.addf %74, %86 : vector<4x2560xf32>
    %c2544_i32 = arith.constant 2544 : i32
    %88 = tpu.dynamic_rotate %6 by %c2544_i32 dim 1 : vector<4x2560xf32>, i32 -> vector<4x2560xf32>
    %c7 = arith.constant 7 : index
    %c0_59 = arith.constant 0 : index
    %c0_60 = arith.constant 0 : index
    %89 = vector.load %arg5[%c7, %c0_59, %c0_60] : memref<9x1x2560xf32, #tpu.memory_space<vmem>>, vector<1x1x2560xf32>
    %90 = vector.shape_cast %89 : vector<1x1x2560xf32> to vector<1x2560xf32>
    %cst_61 = arith.constant 5.000000e-01 : f32
    %91 = vector.broadcast %cst_61 : f32 to vector<1x2560xf32>
    %92 = arith.cmpf ogt, %90, %91 : vector<1x2560xf32>
    %cst_62 = arith.constant 0.000000e+00 : f32
    %93 = vector.shape_cast %92 : vector<1x2560xi1> to vector<1x2560xi1>
    %94 = vector.broadcast %93 : vector<1x2560xi1> to vector<4x2560xi1>
    %95 = vector.broadcast %cst_62 : f32 to vector<4x2560xf32>
    %96 = arith.select %94, %88, %95 : vector<4x2560xi1>, vector<4x2560xf32>
    %c7_63 = arith.constant 7 : index
    %c0_64 = arith.constant 0 : index
    %c0_65 = arith.constant 0 : index
    %97 = vector.load %arg6[%c7_63, %c0_64, %c0_65] : memref<9x4x4xf32, #tpu.memory_space<vmem>>, vector<1x4x4xf32>
    %98 = vector.shape_cast %97 : vector<1x4x4xf32> to vector<4x4xf32>
    %cst_66 = arith.constant dense<0.000000e+00> : vector<4x2560xf32>
    %99 = tpu.matmul %98, %96, %cst_66 {dimension_numbers = #tpu.dot_dimension_numbers<[1], [0], [0], [1], [0, 0, 1, 1], [], []>} : vector<4x4xf32>, vector<4x2560xf32>, vector<4x2560xf32> -> vector<4x2560xf32>
    %100 = arith.addf %87, %99 : vector<4x2560xf32>
    %c2543_i32 = arith.constant 2543 : i32
    %101 = tpu.dynamic_rotate %6 by %c2543_i32 dim 1 : vector<4x2560xf32>, i32 -> vector<4x2560xf32>
    %c8 = arith.constant 8 : index
    %c0_67 = arith.constant 0 : index
    %c0_68 = arith.constant 0 : index
    %102 = vector.load %arg5[%c8, %c0_67, %c0_68] : memref<9x1x2560xf32, #tpu.memory_space<vmem>>, vector<1x1x2560xf32>
    %103 = vector.shape_cast %102 : vector<1x1x2560xf32> to vector<1x2560xf32>
    %cst_69 = arith.constant 5.000000e-01 : f32
    %104 = vector.broadcast %cst_69 : f32 to vector<1x2560xf32>
    %105 = arith.cmpf ogt, %103, %104 : vector<1x2560xf32>
    %cst_70 = arith.constant 0.000000e+00 : f32
    %106 = vector.shape_cast %105 : vector<1x2560xi1> to vector<1x2560xi1>
    %107 = vector.broadcast %106 : vector<1x2560xi1> to vector<4x2560xi1>
    %108 = vector.broadcast %cst_70 : f32 to vector<4x2560xf32>
    %109 = arith.select %107, %101, %108 : vector<4x2560xi1>, vector<4x2560xf32>
    %c8_71 = arith.constant 8 : index
    %c0_72 = arith.constant 0 : index
    %c0_73 = arith.constant 0 : index
    %110 = vector.load %arg6[%c8_71, %c0_72, %c0_73] : memref<9x4x4xf32, #tpu.memory_space<vmem>>, vector<1x4x4xf32>
    %111 = vector.shape_cast %110 : vector<1x4x4xf32> to vector<4x4xf32>
    %cst_74 = arith.constant dense<0.000000e+00> : vector<4x2560xf32>
    %112 = tpu.matmul %111, %109, %cst_74 {dimension_numbers = #tpu.dot_dimension_numbers<[1], [0], [0], [1], [0, 0, 1, 1], [], []>} : vector<4x4xf32>, vector<4x2560xf32>, vector<4x2560xf32> -> vector<4x2560xf32>
    %113 = arith.addf %100, %112 : vector<4x2560xf32>
    %c0_75 = arith.constant 0 : index
    %c0_76 = arith.constant 0 : index
    %114 = vector.load %arg7[%c0_75, %c0_76] : memref<4x1xf32, #tpu.memory_space<vmem>>, vector<4x1xf32>
    %115 = vector.broadcast %114 : vector<4x1xf32> to vector<4x2560xf32>
    %116 = arith.addf %113, %115 : vector<4x2560xf32>
    %c0_77 = arith.constant 0 : index
    %c0_78 = arith.constant 0 : index
    %117 = vector.load %arg11[%c0_77, %c0_78] : memref<4x2560xf32, #tpu.memory_space<vmem>>, vector<4x2560xf32>
    tpu.vector_store %arg11[%c0_77, %c0_78], %116 {strides = array<i32>} : memref<4x2560xf32, #tpu.memory_space<vmem>>, vector<4x2560xf32>,
    %c0_i32 = arith.constant 0 : i32
    %118 = arith.cmpi eq, %arg1, %c0_i32 : i32
    %119 = arith.extui %118 : i1 to i32
    %c0_i32_79 = arith.constant 0 : i32
    %120 = arith.cmpi ne, %119, %c0_i32_79 : i32
    scf.if %120 {
      %cst_103 = arith.constant 0.000000e+00 : f32
      %144 = vector.broadcast %cst_103 : f32 to vector<4x256xf32>
      %c0_104 = arith.constant 0 : index
      %c0_105 = arith.constant 0 : index
      %145 = vector.load %arg11[%c0_104, %c0_105] : memref<4x2560xf32, #tpu.memory_space<vmem>>, vector<4x256xf32>
      tpu.vector_store %arg11[%c0_104, %c0_105], %144 {strides = array<i32>} : memref<4x2560xf32, #tpu.memory_space<vmem>>, vector<4x256xf32>,
    } else {
    }
    %c0_i32_80 = arith.constant 0 : i32
    %121 = arith.cmpi eq, %arg1, %c0_i32_80 : i32
    %122 = arith.extui %121 : i1 to i32
    %c0_i32_81 = arith.constant 0 : i32
    %123 = arith.cmpi ne, %122, %c0_i32_81 : i32
    scf.if %123 {
      %cst_103 = arith.constant 0.000000e+00 : f32
      %144 = vector.broadcast %cst_103 : f32 to vector<4x256xf32>
      %c0_104 = arith.constant 0 : index
      %c2304 = arith.constant 2304 : index
      %145 = vector.load %arg11[%c0_104, %c2304] : memref<4x2560xf32, #tpu.memory_space<vmem>>, vector<4x256xf32>
      tpu.vector_store %arg11[%c0_104, %c2304], %144 {strides = array<i32>} : memref<4x2560xf32, #tpu.memory_space<vmem>>, vector<4x256xf32>,
    } else {
    }
    %c0_82 = arith.constant 0 : index
    %c0_83 = arith.constant 0 : index
    %124 = vector.load %arg11[%c0_82, %c0_83] : memref<4x2560xf32, #tpu.memory_space<vmem>>, vector<4x2048xf32>
    %c0_84 = arith.constant 0 : index
    %c0_85 = arith.constant 0 : index
    %c0_86 = arith.constant 0 : index
    %125 = vector.load %arg8[%c0_84, %c0_85, %c0_86] : memref<3x4x4xf32, #tpu.memory_space<vmem>>, vector<1x4x4xf32>
    %126 = vector.shape_cast %125 : vector<1x4x4xf32> to vector<4x4xf32>
    %cst_87 = arith.constant dense<0.000000e+00> : vector<4x2048xf32>
    %127 = tpu.matmul %126, %124, %cst_87 {dimension_numbers = #tpu.dot_dimension_numbers<[1], [0], [0], [1], [0, 0, 1, 1], [], []>} : vector<4x4xf32>, vector<4x2048xf32>, vector<4x2048xf32> -> vector<4x2048xf32>
    %c0_88 = arith.constant 0 : index
    %c256 = arith.constant 256 : index
    %128 = vector.load %arg11[%c0_88, %c256] : memref<4x2560xf32, #tpu.memory_space<vmem>>, vector<4x2048xf32>
    %c1_89 = arith.constant 1 : index
    %c0_90 = arith.constant 0 : index
    %c0_91 = arith.constant 0 : index
    %129 = vector.load %arg8[%c1_89, %c0_90, %c0_91] : memref<3x4x4xf32, #tpu.memory_space<vmem>>, vector<1x4x4xf32>
    %130 = vector.shape_cast %129 : vector<1x4x4xf32> to vector<4x4xf32>
    %cst_92 = arith.constant dense<0.000000e+00> : vector<4x2048xf32>
    %131 = tpu.matmul %130, %128, %cst_92 {dimension_numbers = #tpu.dot_dimension_numbers<[1], [0], [0], [1], [0, 0, 1, 1], [], []>} : vector<4x4xf32>, vector<4x2048xf32>, vector<4x2048xf32> -> vector<4x2048xf32>
    %132 = arith.addf %127, %131 : vector<4x2048xf32>
    %c0_93 = arith.constant 0 : index
    %c512 = arith.constant 512 : index
    %133 = vector.load %arg11[%c0_93, %c512] : memref<4x2560xf32, #tpu.memory_space<vmem>>, vector<4x2048xf32>
    %c2_94 = arith.constant 2 : index
    %c0_95 = arith.constant 0 : index
    %c0_96 = arith.constant 0 : index
    %134 = vector.load %arg8[%c2_94, %c0_95, %c0_96] : memref<3x4x4xf32, #tpu.memory_space<vmem>>, vector<1x4x4xf32>
    %135 = vector.shape_cast %134 : vector<1x4x4xf32> to vector<4x4xf32>
    %cst_97 = arith.constant dense<0.000000e+00> : vector<4x2048xf32>
    %136 = tpu.matmul %135, %133, %cst_97 {dimension_numbers = #tpu.dot_dimension_numbers<[1], [0], [0], [1], [0, 0, 1, 1], [], []>} : vector<4x4xf32>, vector<4x2048xf32>, vector<4x2048xf32> -> vector<4x2048xf32>
    %137 = arith.addf %132, %136 : vector<4x2048xf32>
    %c0_98 = arith.constant 0 : index
    %c0_99 = arith.constant 0 : index
    %138 = vector.load %arg9[%c0_98, %c0_99] : memref<4x1xf32, #tpu.memory_space<vmem>>, vector<4x1xf32>
    %139 = vector.broadcast %138 : vector<4x1xf32> to vector<4x2048xf32>
    %140 = arith.addf %137, %139 : vector<4x2048xf32>
    %c0_100 = arith.constant 0 : index
    %c0_101 = arith.constant 0 : index
    %c0_102 = arith.constant 0 : index
    %141 = vector.load %arg10[%c0_100, %c0_101, %c0_102] : memref<1x4x2048xf32, #tpu.memory_space<vmem>>, vector<1x4x2048xf32>
    %142 = vector.shape_cast %141 : vector<1x4x2048xf32> to vector<4x2048xf32>
    %143 = vector.shape_cast %140 : vector<4x2048xf32> to vector<1x4x2048xf32>
    tpu.vector_store %arg10[%c0_100, %c0_101, %c0_102], %143 {strides = array<i32>} : memref<1x4x2048xf32, #tpu.memory_space<vmem>>, vector<1x4x2048xf32>,
    return
  }
  func.func @transform_0(%arg0: i32, %arg1: i32) -> (i32, i32, i32) {
    %c8_i32 = arith.constant 8 : i32
    %0 = arith.muli %arg1, %c8_i32 : i32
    %c1_i32 = arith.constant 1 : i32
    %1 = arith.subi %0, %c1_i32 : i32
    %c0_i32 = arith.constant 0 : i32
    %2 = arith.maxsi %1, %c0_i32 : i32
    %c0_i32_0 = arith.constant 0 : i32
    %c0_i32_1 = arith.constant 0 : i32
    return %arg0, %c0_i32_0, %2 : i32, i32, i32
  }
  func.func @transform_1(%arg0: i32, %arg1: i32) -> (i32, i32, i32) {
    %c0_i32 = arith.constant 0 : i32
    %c0_i32_0 = arith.constant 0 : i32
    return %arg0, %c0_i32, %arg1 : i32, i32, i32
  }
  func.func @transform_2(%arg0: i32, %arg1: i32) -> (i32, i32, i32) {
    %c1_i32 = arith.constant 1 : i32
    %0 = arith.addi %arg1, %c1_i32 : i32
    %c8_i32 = arith.constant 8 : i32
    %1 = arith.muli %0, %c8_i32 : i32
    %c7_i32 = arith.constant 7 : i32
    %2 = arith.minsi %1, %c7_i32 : i32
    %c0_i32 = arith.constant 0 : i32
    %c0_i32_0 = arith.constant 0 : i32
    return %arg0, %c0_i32, %2 : i32, i32, i32
  }
  func.func @transform_3(%arg0: i32, %arg1: i32) -> (i32, i32, i32) {
    %c0_i32 = arith.constant 0 : i32
    %c0_i32_0 = arith.constant 0 : i32
    %c0_i32_1 = arith.constant 0 : i32
    %c0_i32_2 = arith.constant 0 : i32
    return %c0_i32, %c0_i32_0, %c0_i32_1 : i32, i32, i32
  }
  func.func @transform_4(%arg0: i32, %arg1: i32) -> (i32, i32, i32) {
    %c0_i32 = arith.constant 0 : i32
    %c0_i32_0 = arith.constant 0 : i32
    %c0_i32_1 = arith.constant 0 : i32
    %c0_i32_2 = arith.constant 0 : i32
    return %c0_i32, %c0_i32_0, %c0_i32_1 : i32, i32, i32
  }
  func.func @transform_5(%arg0: i32, %arg1: i32) -> (i32, i32) {
    %c0_i32 = arith.constant 0 : i32
    %c0_i32_0 = arith.constant 0 : i32
    %c0_i32_1 = arith.constant 0 : i32
    return %c0_i32, %c0_i32_0 : i32, i32
  }
  func.func @transform_6(%arg0: i32, %arg1: i32) -> (i32, i32, i32) {
    %c0_i32 = arith.constant 0 : i32
    %c0_i32_0 = arith.constant 0 : i32
    %c0_i32_1 = arith.constant 0 : i32
    %c0_i32_2 = arith.constant 0 : i32
    return %c0_i32, %c0_i32_0, %c0_i32_1 : i32, i32, i32
  }
  func.func @transform_7(%arg0: i32, %arg1: i32) -> (i32, i32) {
    %c0_i32 = arith.constant 0 : i32
    %c0_i32_0 = arith.constant 0 : i32
    %c0_i32_1 = arith.constant 0 : i32
    return %c0_i32, %c0_i32_0 : i32, i32
  }
  func.func @transform_8(%arg0: i32, %arg1: i32) -> (i32, i32, i32) {
    %c0_i32 = arith.constant 0 : i32
    %c0_i32_0 = arith.constant 0 : i32
    return %arg0, %c0_i32, %arg1 : i32, i32, i32
  }
}

</mosaic_0001>

<bundles_post_ra>
// kernel: tpu_custom_call.1
= control target key start
LH: loop header
LB: loop body
LE: loop exit
PB: predicated region body
PF: predicated region fallthrough
CT: control target
= control target key end

     0   :  { %s15266_s0 = inlined_call_operand.hbm [shape: f32[2,4,2048], index: 0, kind: input, shape index: {}]   ;;  %s15267_s1 = inlined_call_operand.hbm [shape: f32[2,4,2048], index: 1, kind: input, shape index: {}]   ;;  %s15268_s2 = inlined_call_operand.hbm [shape: f32[2,4,2048], index: 2, kind: input, shape index: {}]   ;;  %s15269_s3 = inlined_call_operand.hbm [shape: f32[9,1,2560], index: 3, kind: input, shape index: {}]   ;;  %s15270_s4 = inlined_call_operand.vmem [shape: f32[9,4,4], index: 4, kind: input, shape index: {}]   ;;  %s15271_s5 = inlined_call_operand.vmem [shape: f32[4,1], index: 5, kind: input, shape index: {}]   ;;  %s15272_s6 = inlined_call_operand.vmem [shape: f32[3,4,4], index: 6, kind: input, shape index: {}]   ;;  %s15273_s7 = inlined_call_operand.vmem [shape: f32[4,1], index: 7, kind: input, shape index: {}]   ;;  %s15274_s8 = inlined_call_operand.hbm [shape: f32[2,4,2048], index: 8, kind: output, shape index: {}]  }
   0x1   :  { %15295 = sst [smem:[#allocation25_spill]] %s15267_s1 }
   0x2   :  { %15296 = sst [smem:[#allocation26_spill]] %s15274_s8 }
   0x3   :  { %13 = vsyncpa [#allocation4], 0 }
   0x4   :  { %15 = vsyncpa [#allocation4 + $0x1], 0 }
   0x5   :  { %16 = vsyncpa [#allocation7], 0 }
   0x6   :  { %18 = vsyncpa [#allocation7 + $0x1], 0 }
   0x7   :  { %19 = vsyncpa [#allocation10], 0 }
   0x8   :  { %20 = vsyncpa [#allocation5], 0 }
   0x9   :  { %22 = vsyncpa [#allocation5 + $0x1], 0  ;;  %s12234_s27 = smov 0   ;;  %s12236_s28 = smov 0  }
   0xa   :  { %s12238_s29 = smov 0   ;;  %s12240_s30 = smov 0  }
   0xb   :  { %s12242_s9 = smov 0   ;;  %s12244_s10 = smov 0  }
   0xc LB: > { %15297 = sst [smem:[#allocation16_spill]] %s12150_s27  ;;  %s40_s11 = sadd.s32 1, %s12166_s9  ;;  %s12170_s10 = sphi %s12244_s10, %s28_s10   ;;  %s12166_s9 = sphi %s12242_s9, %s15601_s9   ;;  %s12162_s30 = sphi %s12240_s30, %s15600_s30   ;;  %s12158_s29 = sphi %s12238_s29, %s15599_s29   ;;  %s12154_s28 = sphi %s12236_s28, %s15603_s28   ;;  %s12150_s27 = sphi %s12234_s27, %s15602_s27  }
   0xd   : > { %15298 = sst [smem:[#allocation17_spill]] %s12158_s29  ;;  %s57_s12 = sadd.s32 1, %s12158_s29 }
   0xe   : > { %15299 = sst [smem:[#allocation18_spill]] %s12162_s30  ;;  %p42_p0 = scmp.ge.s32.totalorder %s40_s11, 2 }
   0xf   : > { %15300 = sst [smem:[#allocation19_spill]] %s12166_s9  ;;  %p15275_p1 = scmp.ne.s32.totalorder %s12158_s29, %s12154_s28 }
  0x10   : > { %15301 = sst [smem:[#allocation20_spill]] %s12170_s10  ;;  %p65_p2 = scmp.eq.s32.totalorder %s12170_s10, 0 }
  0x11   : > { %s15605_s11 = smov (%p42_p0, %s40_s11), 0  ;;  %p11876_p5 = scmp.lt.s32.totalorder %s12170_s10, 2 }
  0x12   : > { %15302 = sst [smem:[#allocation21_spill]] %s15605_s11  ;;  %p66_p4 = por %p65_p2, %p15275_p1 }
  0x13   : > { %s52_s13 = ssub.s32 %s12166_s9, %s15605_s11  ;;  %s12279_s14 = sand.u32 1, %s12158_s29  }
  0x14   : > { %p55_p6 = scmp.eq.s32.totalorder %s52_s13, 0  ;;  %s12282_s15 = sshll.u32 %s12166_s9, 10 }
  0x15   : > { %p12284_p7 = pnand %p11876_p5, %p66_p4  ;;  %s341_s17 = sand.u32 1, %s12170_s10  }
  0x16   : > { %s12290_s18 = scalar_select %p55_p6, %s12158_s29, %s57_s12  }
  0x17   : > { %s15303_s16 = scalar_select %p12284_p7, 1, 0 }
  0x18   : > { %15304 = sst [smem:[#allocation22_spill]] %s12290_s18  ;;  %s11302_s19 = sshll.u32 %s12279_s14, 6 }
  0x19   : > { %s15305_s1 = sld [smem:[#allocation25_spill]]  ;;  %s345_s23 = scalar_lea.vmem [#allocation6], %s11302_s19 }
  0x1a   : > { %s355_s24 = sshll.u32 %s345_s23, 4  ;;  %s12301_s25 = scalar_lea.sflag [#allocation7], %s341_s17  ;;  %s12299_s24 = int_to_ptr.vmem [resolvable:$true] %s355_s24 }
  0x1b   : > { %p12307_p9 = pneg %p12284_p7 }
  0x1d   : > { %s15306_s12 = scalar_select %p12307_p9, 1, 0 }
  0x1f   : > { %s12297_s22 = scalar_lea.hbm %s15305_s1, %s12282_s15  ;;  %s11967_s19 = scalar_lea.hbm %s15305_s1, 2048 }
  0x20   : > { %s11962_s26 = scalar_lea.hbm %s12297_s22, 1024  ;;  %p11968_p12 = scmp.lt.u32.totalorder %s12297_s22, %s15305_s1 }
  0x21   : > { %p11963_p8 = scmp.ne.s32.totalorder %s12297_s22, %s11962_s26  ;;  %p11969_p13 = scmp.lt.u32.totalorder %s11967_s19, %s11962_s26 }
  0x22   : > { %p11971_p2 = scmp.lt.u32.totalorder %s11962_s26, %s12297_s22 }
  0x23   : > { %p11965_p10 = pnand %p12307_p9, %p11963_p8  ;;  %p11970_p0 = por %p11969_p13, %p11968_p12 }
  0x25   : > { %p11966_p11 = pneg %p11965_p10  ;;  %p11972_p4 = por %p11971_p2, %p11970_p0 }
  0x27   : > { %p11973_p5 = pnand %p11972_p4, %p11966_p11 }
  0x29   : > { %11976 = shalt.err (!%p11973_p5)
}
  0x2a   : > { %s11977_s17 = scalar_lea.vmem %s12299_s24, 1024  ;;  %s12172_s13 = smov [#allocation6]  }
  0x2b   : > { %p11978_p6 = scmp.ne.s32.totalorder %s12299_s24, %s11977_s17  ;;  %s11982_s20 = sshll.u32 %s12172_s13, 4  ;;  %s11983_s20 = int_to_ptr.vmem [resolvable:$false] %s11982_s20 }
  0x2c   : > { %s11984_s21 = scalar_lea.vmem %s11983_s20, 2048  ;;  %p11985_p3 = scmp.lt.s32.totalorder %s12299_s24, %s11983_s20 }
  0x2d   : > { %p11980_p8 = pnand %p11978_p6, %p12307_p9  ;;  %p11986_p1 = scmp.lt.s32.totalorder %s11984_s21, %s11977_s17 }
  0x2f   : > { %p11981_p10 = pneg %p11980_p8  ;;  %p11987_p12 = por %p11986_p1, %p11985_p3 }
  0x31   : > { %p11988_p13 = pnand %p11987_p12, %p11981_p10 }
  0x33   : > { %11991 = shalt.err (!%p11988_p13)
}
  0x34   : > { %11867 = dma.hbm_to_vmem [thread:$0]  (!%p12284_p7), %s12297_s22, 1024, %s12299_s24, %s12301_s25  }
  0x35   : > { %s12332_s26 = sadd.s32 4294967295, %s12170_s10   ;;  %s11295_s19 = sadd.s32 4294967294, %s12170_s10  }
  0x36   : > { %p70_p1 = scmp.ne.s32.totalorder %s12154_s28, %s12150_s27  ;;  %p15284_p3 = scmp.eq.s32.totalorder %s12332_s26, 0 }
  0x37   : > { %p265_p11 = scmp.eq.s32.totalorder %s12332_s26, 1  ;;  %p271_p0 = scmp.eq.s32.totalorder %s11295_s19, 1 }
  0x38   : > { %p11296_p2 = scmp.ge.s32.totalorder %s12170_s10, 1  ;;  %p12342_p4 = por %p15284_p3, %p70_p1 }
  0x39   : > { %p15308_p5 = scmp.ne.s32.totalorder %s12158_s29, %s12154_s28  ;;  %p12353_p8 = por %p271_p0, %p70_p1 }
  0x3a   : > { %s15307_s23 = scalar_select %p12342_p4, 1, 0 }
  0x3b   : > { %p12349_p6 = por %p265_p11, %p15308_p5  ;;  %p278_p10 = scmp.lt.s32.totalorder %s12170_s10, 3 }
  0x3c   : > { %s15311_s24 = scalar_select %p12353_p8, 1, 0 }
  0x3d   : > { %s15309_s22 = scalar_select %p12349_p6, 1, 0 }
  0x3e   : > { %15312 = sst [smem:[#allocation24_spill]] %s15311_s24  ;;  %p12358_p12 = pnand %p11296_p2, %p278_p10 }
  0x3f   : > { %15310 = sst [smem:[#allocation23_spill]] %s15309_s22  ;;  %s12173_s13 = smov [#allocation9]  }
  0x40   : > { %s15313_s17 = scalar_select %p12358_p12, 1, 0 }
  0x41   : > { %s290_s20 = sshll.u32 %s12173_s13, 4  ;;  %p11857_p13 = pneg %p12358_p12  ;;  %s12362_s20 = int_to_ptr.vmem [resolvable:$true] %s290_s20 }
  0x42   : > { %s15292_s21 = sshll.u32 %s12279_s14, 3  ;;  %s12377_s9 = scalar_lea.hbm %s15266_s0, %s12282_s15 }
  0x43   : > { %p12369_p11 = pnand %p11857_p13, %p15284_p3  ;;  %s320_s18 = scalar_lea.vmem [#allocation3], %s15292_s21 }
  0x44   : > { %s334_s29 = sshll.u32 %s320_s18, 4  ;;  %s11992_s24 = scalar_lea.hbm %s15269_s3, 2880  ;;  %s12381_s29 = int_to_ptr.vmem [resolvable:$true] %s334_s29 }
  0x45   : > { %p11993_p1 = scmp.ne.s32.totalorder %s15269_s3, %s11992_s24  ;;  %p11994_p0 = pneg %p12369_p11 }
  0x46   : > { %p11999_p10 = scmp.lt.u32.totalorder %s11992_s24, %s15269_s3 }
  0x47   : > { %p11995_p2 = pnand %p11994_p0, %p11993_p1 }
  0x49   : > { %p11996_p5 = pneg %p11995_p2 }
  0x4b   : > { %p12001_p13 = pnand %p11999_p10, %p11996_p5 }
  0x4d   : > { %12004 = shalt.err (!%p12001_p13)
}
  0x4e   : > { %s12005_s18 = scalar_lea.vmem %s12362_s20, 2880  ;;  %p12013_p4 = scmp.lt.s32.totalorder %s12362_s20, %s12362_s20 }
  0x4f   : > { %p12006_p3 = scmp.ne.s32.totalorder %s12362_s20, %s12005_s18  ;;  %p12014_p12 = scmp.lt.s32.totalorder %s12005_s18, %s12005_s18 }
  0x51   : > { %p12008_p8 = pnand %p12006_p3, %p11994_p0  ;;  %p12015_p7 = por %p12014_p12, %p12013_p4 }
  0x53   : > { %p12009_p6 = pneg %p12008_p8 }
  0x55   : > { %p12016_p9 = pnand %p12015_p7, %p12009_p6 }
  0x57   : > { %12019 = shalt.err (!%p12016_p9)
}
  0x58   : > { %s12174_s8 = smov 320   ;;  %s12175_s27 = smov 20  }
  0x59   : > { %11860 = dma.hbm_to_vmem [thread:$0]  (!%p12369_p11), %s15269_s3, 2880, %s12362_s20, [#allocation10], %s12174_s8, %s12174_s8, %s12175_s27  }
  0x5a   : > { %s317_s13 = scalar_lea.sflag [#allocation4], %s12279_s14  ;;  %s12020_s1 = scalar_lea.hbm %s12377_s9, 128 }
  0x5b   : > { %p12021_p3 = scmp.ne.s32.totalorder %s12377_s9, %s12020_s1  ;;  %p15315_p7 = scmp.ne.s32.totalorder %s15306_s12, 0 }
  0x5c   : > { %s12025_s21 = scalar_lea.hbm %s15266_s0, 2048  ;;  %p12026_p6 = scmp.lt.u32.totalorder %s12377_s9, %s15266_s0 }
  0x5d   : > { %p12023_p9 = pnand %p12021_p3, %p15315_p7  ;;  %p12027_p8 = scmp.lt.u32.totalorder %s12025_s21, %s12020_s1 }
  0x5e   : > { %p12029_p1 = scmp.lt.u32.totalorder %s12020_s1, %s12377_s9 }
  0x5f   : > { %p12024_p4 = pneg %p12023_p9  ;;  %p12028_p12 = por %p12027_p8, %p12026_p6 }
  0x61   : > { %p12030_p0 = por %p12029_p1, %p12028_p12 }
  0x63   : > { %p12031_p2 = pnand %p12030_p0, %p12024_p4 }
  0x65   : > { %12034 = shalt.err (!%p12031_p2)
}
  0x66   : > { %s12035_s20 = scalar_lea.vmem %s12381_s29, 128  ;;  %s12176_s19 = smov [#allocation3]  }
  0x67   : > { %p12036_p11 = scmp.ne.s32.totalorder %s12381_s29, %s12035_s20  ;;  %s12040_s8 = sshll.u32 %s12176_s19, 4  ;;  %s12041_s8 = int_to_ptr.vmem [resolvable:$false] %s12040_s8 }
  0x68   : > { %s12042_s30 = scalar_lea.vmem %s12041_s8, 256  ;;  %p12043_p13 = scmp.lt.s32.totalorder %s12381_s29, %s12041_s8 }
  0x69   : > { %p12038_p5 = pnand %p12036_p11, %p15315_p7  ;;  %p12044_p3 = scmp.lt.s32.totalorder %s12042_s30, %s12035_s20 }
  0x6b   : > { %p12039_p10 = pneg %p12038_p5  ;;  %p12045_p9 = por %p12044_p3, %p12043_p13 }
  0x6d   : > { %p12046_p6 = pnand %p12045_p9, %p12039_p10 }
  0x6f   : > { %12049 = shalt.err (!%p12046_p6)
}
  0x70   : > { %p15316_p4 = scmp.ne.s32.totalorder %s15303_s16, 0  ;;  %s11674_s22 = sadd.s32 896, %s12282_s15 }
  0x71   : > { %s12430_s10 = scalar_lea.hbm %s15268_s2, %s11674_s22  ;;  %s15317_s24 = sshll.u32 %s12279_s14, 3 }
  0x72   : > { %11864 = dma.hbm_to_vmem [thread:$0]  (!%p15316_p4), %s12377_s9, 128, %s12381_s29, %s317_s13  }
  0x73   : > { %s366_s1 = scalar_lea.vmem [#allocation8], %s15317_s24  ;;  %s12050_s18 = scalar_lea.hbm %s12430_s10, 128 }
  0x74   : > { %s380_s11 = sshll.u32 %s366_s1, 4  ;;  %p12051_p8 = scmp.ne.s32.totalorder %s12430_s10, %s12050_s18  ;;  %s381_s11 = int_to_ptr.vmem [resolvable:$true] %s380_s11 }
  0x75   : > { %s12055_s15 = scalar_lea.hbm %s15268_s2, 2048  ;;  %p12056_p0 = scmp.lt.u32.totalorder %s12430_s10, %s15268_s2 }
  0x76   : > { %p12053_p12 = pnand %p12051_p8, %p15315_p7  ;;  %p12057_p2 = scmp.lt.u32.totalorder %s12055_s15, %s12050_s18 }
  0x77   : > { %p12059_p5 = scmp.lt.u32.totalorder %s12050_s18, %s12430_s10 }
  0x78   : > { %p12054_p1 = pneg %p12053_p12  ;;  %p12058_p11 = por %p12057_p2, %p12056_p0 }
  0x7a   : > { %p12060_p10 = por %p12059_p5, %p12058_p11 }
  0x7c   : > { %p12061_p13 = pnand %p12060_p10, %p12054_p1 }
  0x7e   : > { %12064 = shalt.err (!%p12061_p13)
}
  0x7f   : > { %s12065_s14 = scalar_lea.vmem %s381_s11, 128  ;;  %s12177_s19 = smov [#allocation8]  }
  0x80   : > { %p12066_p3 = scmp.ne.s32.totalorder %s381_s11, %s12065_s14  ;;  %s12070_s8 = sshll.u32 %s12177_s19, 4  ;;  %s12071_s8 = int_to_ptr.vmem [resolvable:$false] %s12070_s8 }
  0x81   : > { %s12072_s30 = scalar_lea.vmem %s12071_s8, 256  ;;  %p12073_p8 = scmp.lt.s32.totalorder %s381_s11, %s12071_s8 }
  0x82   : > { %p12068_p9 = pnand %p12066_p3, %p15315_p7  ;;  %p12074_p12 = scmp.lt.s32.totalorder %s12072_s30, %s12065_s14 }
  0x84   : > { %p12069_p6 = pneg %p12068_p9  ;;  %p12075_p4 = por %p12074_p12, %p12073_p8 }
  0x86   : > { %p12076_p0 = pnand %p12075_p4, %p12069_p6 }
  0x88   : > { %12079 = shalt.err (!%p12076_p0)
}
  0x89   : > { %p15318_p2 = scmp.ne.s32.totalorder %s15303_s16, 0  ;;  %p15319_p1 = scmp.ne.s32.totalorder %s15313_s17, 0 }
  0x8a   : > { %s12455_s12 = sand.u32 (!%p15319_p1), 1, %s12154_s28   ;;  %p15320_p7 = scmp.ne.s32.totalorder (!%p15319_p1), %s15307_s23, 0 }
  0x8b   : > { %11870 = dma.hbm_to_vmem [thread:$0]  (!%p15318_p2), %s12430_s10, 128, %s381_s11, %s12301_s25  }
  0x8c   : > { %389 = sbr.rel (%p15319_p1) target bundleno = 1083 (0x43b), region = 52  ;;  %s11309_s22 = sshll.u32 (!%p15319_p1), %s12455_s12, 3 }
  0x8d   : > { %s392_s21 = scalar_lea.sflag (!%p15319_p1), [#allocation4], %s12455_s12  ;;  %s12459_s27 = scalar_lea.vmem (!%p15319_p1), [#allocation3], %s11309_s22 }
  0x93   : > { %12133 = dma.done.wait (%p15320_p7), %s392_s21, 128  }
  0x94   : > { %12135 = vsyncadd (%p15320_p7), %s392_s21, 4294967168  ;;  %s400_s16 = sand.u32 1, %s12332_s26   ;;  %s11310_s25 = sshll.u32 %s12455_s12, 6 }
  0x95   : > { %s401_s17 = scalar_lea.sflag [#allocation7], %s400_s16  ;;  %s12469_s10 = scalar_lea.vmem [#allocation6], %s11310_s25 }
  0x96   : > { %12137 = dma.done.wait (%p15320_p7), %s401_s17, 1152  }
  0x97   : > { %12139 = vsyncadd (%p15320_p7), %s401_s17, 4294966144  ;;  %s12475_s24 = scalar_lea.vmem [#allocation8], %s11309_s22  ;;  %p15321_p4 = scmp.eq.s32.totalorder %s12332_s26, 0 }
  0x99   : > { %12141 = dma.done.wait (%p15321_p4), [#allocation10], 2880   ;;  %p15322_p11 = pmov %p15321_p4 }
  0x9a   : > { %v12178_v0 = vmov 0   ;;  %v12484_v1 = vld [vmem:[%s12469_s10] sm:$0xff]  ;;  %v12487_v2 = vld [vmem:[%s12459_s27] sm:$0xff]  ;;  %s12179_s23 = smov 16   ;;  %v12498_v4 = vld [vmem:[%s12469_s10 + $0x8] sm:$0xff]  ;;  %v12180_v6 = vmov 0.0   ;;  %v552_v22 = vlaneseq }
  0x9b   : > { %12143 = vsyncadd (%p15322_p11), [#allocation10], 4294964416  ;;  %11940 = vset.pattern.permute.xlu1 %v12178_v0  ;;  %11941 = vset.pattern.permute.xlu0 %v12178_v0  ;;  %v12495_v3 = vcombine.high %v12487_v2, %v12487_v2  ;;  %v12501_v5 = vld [vmem:[%s12475_s24] sm:$0xff]  ;;  %v12515_v8 = vcombine.high %v12484_v1, %v12484_v1  ;;  %v12523_v9 = vcombine.high %v12498_v4, %v12498_v4  ;;  %v12526_v10 = vld [vmem:[%s12469_s10 + $0x10] sm:$0xff]  ;;  %s12181_s26 = smov 17   ;;  %s12182_s1 = smov 15  }
  0x9c   : > { %709 = vrot.lane.b32.xlu1 %v12484_v1, %s12179_s23  ;;  %705 = vrot.lane.b32.xlu0 %v12487_v2, %s12179_s23  ;;  %v12511_v7 = vcombine.high %v12501_v5, %v12501_v5  ;;  %v12534_v11 = vcombine.high %v12526_v10, %v12526_v10  ;;  %v12537_v12 = vld [vmem:[%s12469_s10 + $0x18] sm:$0xff]  ;;  %v12548_v14 = vld [vmem:[%s12469_s10 + $0x20] sm:$0xff]  ;;  %v585_v24 = vshrl.u32 %v552_v22, 7  ;;  %v12656_v27 = vand.u32 127, %v552_v22  ;;  %s12183_s11 = smov 1   ;;  %v768_v46 = vld [vmem:[#allocation9 + $0x1c] sm:$0xff] }
  0x9d   : > { %1027 = vmatprep.mubr.f32.mxu0 %v12180_v6  ;;  %1098 = vmatprep.mubr.f32.mxu1 %v12180_v6  ;;  %v12545_v13 = vcombine.high %v12537_v12, %v12537_v12  ;;  %v12556_v15 = vcombine.high %v12548_v14, %v12548_v14  ;;  %v12559_v16 = vld [vmem:[%s12469_s10 + $0x28] sm:$0xff]  ;;  %v12570_v18 = vld [vmem:[%s12469_s10 + $0x30] sm:$0xff]  ;;  %v12581_v20 = vld [vmem:[%s12469_s10 + $0x38] sm:$0xff]  ;;  %vm902_vm3 = vcmask 1043456   ;;  %vm898_vm7 = vcmask 31744   ;;  %s12184_s13 = smov 127  }
  0x9e   : > { %v12567_v17 = vcombine.high %v12559_v16, %v12559_v16  ;;  %v12578_v19 = vcombine.high %v12570_v18, %v12570_v18  ;;  %v12589_v21 = vcombine.high %v12581_v20, %v12581_v20  ;;  %v767_v23 = vld [vmem:[#allocation9 + $0x14] sm:$0xff]  ;;  %v12647_v25 = vsub.s32 1, %v585_v24  ;;  %v12720_v56 = vld [vmem:[%s15270_s4 + $0x4] sm:$0xf]  ;;  %s12185_s19 = smov 113   ;;  %s12186_s22 = smov 112  }
  0x9f   : > { %vm770_vm0 = vcmp.gt.f32.partialorder %v767_v23, 0.5  ;;  %v12658_v28 = vsub.s32 0, %v585_v24  ;;  %v12660_v29 = vsub.s32 3, %v585_v24  ;;  %v12664_v33 = vsub.s32 2, %v585_v24  ;;  %v769_v62 = vld [vmem:[#allocation9 + $0x24] sm:$0xf] }
  0xa0   : > { %713 = vrot.lane.b32.xlu1 %v12498_v4, %s12179_s23  ;;  %707 = vrot.lane.b32.xlu0 %v12495_v3, %s12179_s23  ;;  %v12650_v26 = vsel %vm770_vm0, 1, %v12178_v0  ;;  %vm745_vm1 = vcmp.lt.s32.totalorder %v12656_v27, 16  ;;  %v12675_v36 = vsub.s32 5, %v585_v24  ;;  %v12677_v39 = vsub.s32 4, %v585_v24  ;;  %s12187_s16 = smov 111   ;;  %s15202_s21 = scalar_lea.vmem [#allocation11], %s11310_s25 }
  0xa1   : > { %v783_v30 = vrot.slane %v12650_v26, %v12647_v25  ;;  %v779_v34 = vrot.slane %v12650_v26, %v12658_v28  ;;  %v791_v35 = vrot.slane %v12650_v26, %v12660_v29  ;;  %v787_v40 = vrot.slane %v12650_v26, %v12664_v33  ;;  %s15589_s25 = sld [smem:[#allocation18_spill]]  ;;  %s11151_s17 = sshll.u32 %s15202_s21, 4  ;;  %s15218_s17 = int_to_ptr.vmem [resolvable:$true] %s11151_s17 }
  0xa2   : > { %v799_v45 = vrot.slane %v12650_v26, %v12675_v36  ;;  %v12698_v47 = vsub.s32 7, %v585_v24  ;;  %v795_v49 = vrot.slane %v12650_v26, %v12677_v39  ;;  %v12710_v53 = vsub.s32 6, %v585_v24  ;;  %s12188_s18 = smov [#allocation11]  }
  0xa3   : > { %vm857_vm2 = vcmp.eq.s32.totalorder %v783_v30, 1  ;;  %vm12688_vm4 = vcmp.eq.s32.totalorder %v779_v34, 1  ;;  %vm12692_vm5 = vcmp.eq.s32.totalorder %v791_v35, 1  ;;  %vm12706_vm6 = vcmp.eq.s32.totalorder %v787_v40, 1  ;;  %v575_v34 = vld [vmem:[#allocation9] sm:$0xff]  ;;  %s12084_s29 = sshll.u32 %s12188_s18, 4  ;;  %s12085_s29 = int_to_ptr.vmem [resolvable:$false] %s12084_s29 }
  0xa4   : > { %743 = vrot.lane.b32.xlu1 %v12511_v7, %s12179_s23  ;;  %711 = vrot.lane.b32.xlu0 %v12515_v8, %s12179_s23  ;;  %vm771_vm8 = vcmp.gt.f32.partialorder %v768_v46, 0.5  ;;  %vm12734_vm9 = vcmp.eq.s32.totalorder %v799_v45, 1  ;;  %v807_v61 = vrot.slane %v12650_v26, %v12698_v47  ;;  %vm12740_vm10 = vcmp.eq.s32.totalorder %v795_v49, 1  ;;  %s12086_s9 = scalar_lea.vmem %s12085_s29, 2048  ;;  %p12087_p9 = scmp.lt.s32.totalorder %s15218_s17, %s12085_s29 }
  0xa5   : > { %v803_v23 = vrot.slane %v12650_v26, %v12710_v53 }
  0xa6   : > { %vm12768_vm11 = vcmp.eq.s32.totalorder %v807_v61, 1 }
  0xa7   : > { %vm12775_vm12 = vcmp.eq.s32.totalorder %v803_v23, 1 }
  0xa8   : > { %717 = vrot.lane.b32.xlu1 %v12526_v10, %s12179_s23  ;;  %715 = vrot.lane.b32.xlu0 %v12523_v9, %s12179_s23 }
  0xac   : > { %721 = vrot.lane.b32.xlu1 %v12537_v12, %s12179_s23  ;;  %719 = vrot.lane.b32.xlu0 %v12534_v11, %s12179_s23 }
  0xb0   : > { %725 = vrot.lane.b32.xlu1 %v12548_v14, %s12179_s23  ;;  %723 = vrot.lane.b32.xlu0 %v12545_v13, %s12179_s23 }
  0xb4   : > { %729 = vrot.lane.b32.xlu1 %v12559_v16, %s12179_s23  ;;  %727 = vrot.lane.b32.xlu0 %v12556_v15, %s12179_s23 }
  0xb8   : > { %733 = vrot.lane.b32.xlu1 %v12570_v18, %s12179_s23  ;;  %731 = vrot.lane.b32.xlu0 %v12567_v17, %s12179_s23 }
  0xbc   : > { %737 = vrot.lane.b32.xlu1 %v12581_v20, %s12179_s23  ;;  %735 = vrot.lane.b32.xlu0 %v12578_v19, %s12179_s23 }
  0xc0   : > { %512 = vrot.lane.b32.xlu1 %v12487_v2, %s12181_s26  ;;  %739 = vrot.lane.b32.xlu0 %v12589_v21, %s12179_s23 }
  0xc4   : > { %741 = vrot.lane.b32.xlu1 %v12501_v5, %s12179_s23  ;;  %514 = vrot.lane.b32.xlu0 %v12495_v3, %s12181_s26  ;;  %s15591_s23 = sld [smem:[#allocation26_spill]] }
  0xc8   : > { %516 = vrot.lane.b32.xlu1 %v12484_v1, %s12181_s26  ;;  %550 = vrot.lane.b32.xlu0 %v12511_v7, %s12181_s26 }
  0xcc   : > { %520 = vrot.lane.b32.xlu1 %v12498_v4, %s12181_s26  ;;  %518 = vrot.lane.b32.xlu0 %v12515_v8, %s12181_s26 }
  0xd0   : > { %524 = vrot.lane.b32.xlu1 %v12526_v10, %s12181_s26  ;;  %522 = vrot.lane.b32.xlu0 %v12523_v9, %s12181_s26 }
  0xd4   : > { %528 = vrot.lane.b32.xlu1 %v12537_v12, %s12181_s26  ;;  %526 = vrot.lane.b32.xlu0 %v12534_v11, %s12181_s26 }
  0xd8   : > { %532 = vrot.lane.b32.xlu1 %v12548_v14, %s12181_s26  ;;  %530 = vrot.lane.b32.xlu0 %v12545_v13, %s12181_s26 }
  0xdc   : > { %536 = vrot.lane.b32.xlu1 %v12559_v16, %s12181_s26  ;;  %534 = vrot.lane.b32.xlu0 %v12556_v15, %s12181_s26 }
  0xe0   : > { %540 = vrot.lane.b32.xlu1 %v12570_v18, %s12181_s26  ;;  %538 = vrot.lane.b32.xlu0 %v12567_v17, %s12181_s26 }
  0xe4   : > { %544 = vrot.lane.b32.xlu1 %v12581_v20, %s12181_s26  ;;  %542 = vrot.lane.b32.xlu0 %v12578_v19, %s12181_s26 }
  0xe8   : > { %548 = vrot.lane.b32.xlu1 %v12501_v5, %s12181_s26  ;;  %546 = vrot.lane.b32.xlu0 %v12589_v21, %s12181_s26 }
  0xec   : > { %2448 = vrot.lane.b32.xlu1 %v12495_v3, %s12182_s1  ;;  %2446 = vrot.lane.b32.xlu0 %v12487_v2, %s12182_s1 }
  0xf0   : > { %2450 = vrot.lane.b32.xlu1 %v12484_v1, %s12182_s1  ;;  %2484 = vrot.lane.b32.xlu0 %v12511_v7, %s12182_s1 }
  0xf4   : > { %2454 = vrot.lane.b32.xlu1 %v12498_v4, %s12182_s1  ;;  %2452 = vrot.lane.b32.xlu0 %v12515_v8, %s12182_s1 }
  0xf8   : > { %2458 = vrot.lane.b32.xlu1 %v12526_v10, %s12182_s1  ;;  %2456 = vrot.lane.b32.xlu0 %v12523_v9, %s12182_s1 }
  0xfc   : > { %2462 = vrot.lane.b32.xlu1 %v12537_v12, %s12182_s1  ;;  %2460 = vrot.lane.b32.xlu0 %v12534_v11, %s12182_s1 }
 0x100   : > { %2466 = vrot.lane.b32.xlu1 %v12548_v14, %s12182_s1  ;;  %2464 = vrot.lane.b32.xlu0 %v12545_v13, %s12182_s1 }
 0x104   : > { %2470 = vrot.lane.b32.xlu1 %v12559_v16, %s12182_s1  ;;  %2468 = vrot.lane.b32.xlu0 %v12556_v15, %s12182_s1 }
 0x108   : > { %2474 = vrot.lane.b32.xlu1 %v12570_v18, %s12182_s1  ;;  %2472 = vrot.lane.b32.xlu0 %v12567_v17, %s12182_s1 }
 0x10c   : > { %2478 = vrot.lane.b32.xlu1 %v12581_v20, %s12182_s1  ;;  %2476 = vrot.lane.b32.xlu0 %v12578_v19, %s12182_s1 }
 0x10e   : > { %v710_v31 = vpop.permute.xlu1 %709  ;;  %v706_v32 = vpop.permute.xlu0 %705 }
 0x110   : > { %2482 = vrot.lane.b32.xlu1 %v12501_v5, %s12182_s1  ;;  %2480 = vrot.lane.b32.xlu0 %v12589_v21, %s12182_s1  ;;  %s11135_s1 = scalar_lea.sflag [#allocation5], %s12455_s12 }
 0x112   : > { %v714_v37 = vpop.permute.xlu1 %713  ;;  %v708_v38 = vpop.permute.xlu0 %707 }
 0x113   : > { %v764_v41 = vsel %vm745_vm1, %v706_v32, %v708_v38  ;;  %v763_v51 = vsel %vm745_vm1, %v708_v38, %v710_v31 }
 0x114   : > { %3434 = vrot.lane.b32.xlu1 %v12495_v3, %s12183_s11  ;;  %3432 = vrot.lane.b32.xlu0 %v12487_v2, %s12183_s11  ;;  %v877_v42 = vsel %vm857_vm2, %v764_v41, 0.0  ;;  %v878_v59 = vsel %vm12706_vm6, %v763_v51, 0.0  ;;  %vm772_vm2 = vcmp.gt.f32.partialorder %v769_v62, 0.5  ;;  %vm578_vm6 = vcmp.gt.f32.partialorder %v575_v34, 0.5 }
 0x115   : > { %11315 = vmatprep.subr.msk.mxu0 %vm902_vm3, %v877_v42  ;;  %v775_v46 = vsel %vm772_vm2, 1, %v12178_v0 }
 0x116   : > { %v12700_v48 = vpop.permute.xlu1 %743  ;;  %v712_v50 = vpop.permute.xlu0 %711  ;;  %v851_v62 = vrot.slane %v775_v46, %v12664_v33 }
 0x117   : > { %v765_v54 = vsel %vm745_vm1, %v12700_v48, %v706_v32  ;;  %v762_v55 = vsel %vm745_vm1, %v710_v31, %v712_v50  ;;  %v761_v63 = vsel %vm745_vm1, %v712_v50, %v714_v37  ;;  %v12754_v31 = vsel %vm771_vm8, 1, %v12178_v0 }
 0x118   : > { %3436 = vrot.lane.b32.xlu1 %v12484_v1, %s12183_s11  ;;  %3470 = vrot.lane.b32.xlu0 %v12511_v7, %s12183_s11  ;;  %v876_v57 = vsel %vm12688_vm4, %v765_v54, 0.0  ;;  %v879_v58 = vsel %vm12692_vm5, %v762_v55, 0.0  ;;  %v880_v32 = vsel %vm12740_vm10, %v761_v63, 0.0  ;;  %v815_v35 = vrot.slane %v12754_v31, %v12647_v25 }
 0x119   : > { %11316 = vmatpush1.msk.msra.mxu0 %vm902_vm3, %v876_v57  ;;  %11318 = vmatprep.subr.msk.mxu1 %vm902_vm3, %v879_v58  ;;  %v811_v41 = vrot.slane %v12754_v31, %v12658_v28  ;;  %v823_v49 = vrot.slane %v12754_v31, %v12660_v29  ;;  %v819_v54 = vrot.slane %v12754_v31, %v12664_v33 }
 0x11a   : > { %v718_v22 = vpop.permute.xlu1 %717  ;;  %11319 = vmatpush1.msk.msra.mxu1 %vm902_vm3, %v878_v59  ;;  %v716_v24 = vpop.permute.xlu0 %715  ;;  %11317 = vmatmul.mubr.msk.f32.vlgmr.msra.gmra.mrb[0].mxu0 %vm898_vm7, %v12720_v56  ;;  %vm12797_vm13 = vcmp.eq.s32.totalorder %v815_v35, 1  ;;  %v831_v61 = vrot.slane %v12754_v31, %v12675_v36 }
 0x11b   : > { %v760_v30 = vsel %vm745_vm1, %v714_v37, %v716_v24  ;;  %11320 = vmatmul.mubr.msk.f32.vlgmr.msra.gmra.mrb[0].mxu1 %vm898_vm7, %v12720_v56  ;;  %1169 = vmatprep.mubr.f32.mxu0 %v12180_v6  ;;  %v759_v38 = vsel %vm745_vm1, %v716_v24, %v718_v22  ;;  %vm12804_vm14 = vcmp.eq.s32.totalorder %v811_v41, 1  ;;  %vm12826_vm15 = vcmp.eq.s32.totalorder %v823_v49, 1 }
 0x11c   : > { %3440 = vrot.lane.b32.xlu1 %v12498_v4, %s12183_s11  ;;  %3438 = vrot.lane.b32.xlu0 %v12515_v8, %s12183_s11  ;;  %v881_v26 = vsel %vm12734_vm9, %v760_v30, 0.0  ;;  %v882_v45 = vsel %vm12775_vm12, %v759_v38, 0.0  ;;  %vm12833_vm0 = vcmp.eq.s32.totalorder %v819_v54, 1  ;;  %v827_v24 = vrot.slane %v12754_v31, %v12677_v39 }
 0x11d   : > { %11321 = vmatprep.subr.msk.mxu0 %vm902_vm3, %v881_v26  ;;  %1240 = vmatprep.mubr.f32.mxu1 %v12180_v6  ;;  %vm12855_vm4 = vcmp.eq.s32.totalorder %v831_v61, 1  ;;  %v839_v38 = vrot.slane %v12754_v31, %v12698_v47  ;;  %vm12941_vm12 = vcmp.eq.s32.totalorder %v851_v62, 1 }
 0x11e   : > { %v722_v40 = vpop.permute.xlu1 %721  ;;  %11322 = vmatpush1.msk.msra.mxu0 %vm902_vm3, %v880_v32  ;;  %v720_v42 = vpop.permute.xlu0 %719  ;;  %vm12862_vm5 = vcmp.eq.s32.totalorder %v827_v24, 1 }
 0x11f   : > { %v758_v43 = vsel %vm745_vm1, %v718_v22, %v720_v42  ;;  %11323 = vmatmul.mubr.msk.f32.vlgmr.msra.gmra.mrb[2].mxu0 %vm898_vm7, %v12720_v56  ;;  %v757_v51 = vsel %vm745_vm1, %v720_v42, %v722_v40  ;;  %vm12885_vm8 = vcmp.eq.s32.totalorder %v839_v38, 1 }
 0x120   : > { %3444 = vrot.lane.b32.xlu1 %v12526_v10, %s12183_s11  ;;  %3442 = vrot.lane.b32.xlu0 %v12523_v9, %s12183_s11  ;;  %v883_v44 = vsel %vm12768_vm11, %v758_v43, 0.0  ;;  %v884_v59 = vsel %vm12804_vm14, %v757_v51, 0.0  ;;  %v835_v43 = vrot.slane %v12754_v31, %v12710_v53  ;;  %v847_v51 = vrot.slane %v775_v46, %v12647_v25 }
 0x121   : > { %11324 = vmatprep.subr.msk.mxu1 %vm902_vm3, %v883_v44  ;;  %1311 = vmatprep.mubr.f32.mxu0 %v12180_v6 }
 0x122   : > { %v726_v52 = vpop.permute.xlu1 %725  ;;  %11325 = vmatpush1.msk.msra.mxu1 %vm902_vm3, %v882_v45  ;;  %v724_v55 = vpop.permute.xlu0 %723  ;;  %vm12891_vm9 = vcmp.eq.s32.totalorder %v835_v43, 1  ;;  %vm12916_vm10 = vcmp.eq.s32.totalorder %v847_v51, 1 }
 0x123   : > { %v756_v57 = vsel %vm745_vm1, %v722_v40, %v724_v55  ;;  %11326 = vmatmul.mubr.msk.f32.vlgmr.msra.gmra.mrb[2].mxu1 %vm898_vm7, %v12720_v56  ;;  %v755_v22 = vsel %vm745_vm1, %v724_v55, %v726_v52 }
 0x124   : > { %3448 = vrot.lane.b32.xlu1 %v12537_v12, %s12183_s11  ;;  %3446 = vrot.lane.b32.xlu0 %v12534_v11, %s12183_s11  ;;  %v885_v58 = vsel %vm12797_vm13, %v756_v57, 0.0  ;;  %v886_v35 = vsel %vm12833_vm0, %v755_v22, 0.0  ;;  %v843_v57 = vrot.slane %v775_v46, %v12658_v28  ;;  %vm554_vm13 = vcmp.lt.s32.totalorder %v12656_v27, 17  ;;  %v13291_v22 = vld [vmem:[%s15270_s4 + $0x8] sm:$0xf] }
 0x125   : > { %11327 = vmatprep.subr.msk.mxu0 %vm902_vm3, %v885_v58  ;;  %1382 = vmatprep.mubr.f32.mxu1 %v12180_v6 }
 0x126   : > { %v730_v23 = vpop.permute.xlu1 %729  ;;  %11328 = vmatpush1.msk.msra.mxu0 %vm902_vm3, %v884_v59  ;;  %v728_v30 = vpop.permute.xlu0 %727  ;;  %v12900_v59 = vsel %vm578_vm6, 1, %v12178_v0  ;;  %vm12924_vm11 = vcmp.eq.s32.totalorder %v843_v57, 1 }
 0x127   : > { %v754_v26 = vsel %vm745_vm1, %v726_v52, %v728_v30  ;;  %11329 = vmatmul.mubr.msk.f32.vlgmr.msra.gmra.mrb[4].mxu0 %vm898_vm7, %v12720_v56  ;;  %v753_v41 = vsel %vm745_vm1, %v728_v30, %v730_v23  ;;  %v591_v24 = vrot.slane %v12900_v59, %v12647_v25  ;;  %v587_v43 = vrot.slane %v12900_v59, %v12658_v28 }
 0x128   : > { %3452 = vrot.lane.b32.xlu1 %v12548_v14, %s12183_s11  ;;  %3450 = vrot.lane.b32.xlu0 %v12545_v13, %s12183_s11  ;;  %v887_v32 = vsel %vm12826_vm15, %v754_v26, 0.0  ;;  %v888_v31 = vsel %vm12862_vm5, %v753_v41, 0.0  ;;  %v599_v52 = vrot.slane %v12900_v59, %v12660_v29  ;;  %v603_v30 = vrot.slane %v12900_v59, %v12677_v39 }
 0x129   : > { %11330 = vmatprep.subr.msk.mxu1 %vm902_vm3, %v887_v32  ;;  %1453 = vmatprep.mubr.f32.mxu0 %v12180_v6  ;;  %vm12953_vm15 = vcmp.eq.s32.totalorder %v591_v24, 1  ;;  %v615_v38 = vrot.slane %v12900_v59, %v12698_v47 }
 0x12a   : > { %v734_v42 = vpop.permute.xlu1 %733  ;;  %11331 = vmatpush1.msk.msra.mxu1 %vm902_vm3, %v886_v35  ;;  %v732_v44 = vpop.permute.xlu0 %731  ;;  %vm13005_vm0 = vcmp.eq.s32.totalorder %v599_v52, 1  ;;  %vm13040_vm6 = vcmp.eq.s32.totalorder %v603_v30, 1 }
 0x12b   : > { %v752_v45 = vsel %vm745_vm1, %v730_v23, %v732_v44  ;;  %11332 = vmatmul.mubr.msk.f32.vlgmr.msra.gmra.mrb[4].mxu1 %vm898_vm7, %v12720_v56  ;;  %v751_v54 = vsel %vm745_vm1, %v732_v44, %v734_v42  ;;  %v855_v23 = vrot.slane %v775_v46, %v12660_v29 }
 0x12c   : > { %3456 = vrot.lane.b32.xlu1 %v12559_v16, %s12183_s11  ;;  %3454 = vrot.lane.b32.xlu0 %v12556_v15, %s12183_s11  ;;  %v889_v49 = vsel %vm12855_vm4, %v752_v45, 0.0  ;;  %v890_v63 = vsel %vm12891_vm9, %v751_v54, 0.0  ;;  %v595_v54 = vrot.slane %v12900_v59, %v12664_v33 }
 0x12d   : > { %11333 = vmatprep.subr.msk.mxu0 %vm902_vm3, %v889_v49  ;;  %1524 = vmatprep.mubr.f32.mxu1 %v12180_v6  ;;  %vm12949_vm14 = vcmp.eq.s32.totalorder %v855_v23, 1 }
 0x12e   : > { %v738_v55 = vpop.permute.xlu1 %737  ;;  %11334 = vmatpush1.msk.msra.mxu0 %vm902_vm3, %v888_v31  ;;  %v736_v58 = vpop.permute.xlu0 %735  ;;  %vm13012_vm2 = vcmp.eq.s32.totalorder %v595_v54, 1 }
 0x12f   : > { %v750_v60 = vsel %vm745_vm1, %v734_v42, %v736_v58  ;;  %11335 = vmatmul.mubr.msk.f32.vlgmr.msra.gmra.mrb[6].mxu0 %vm898_vm7, %v12720_v56  ;;  %v749_v26 = vsel %vm745_vm1, %v736_v58, %v738_v55 }
 0x130   : > { %3460 = vrot.lane.b32.xlu1 %v12570_v18, %s12183_s11  ;;  %3458 = vrot.lane.b32.xlu0 %v12567_v17, %s12183_s11  ;;  %v891_v61 = vsel %vm12885_vm8, %v750_v60, 0.0  ;;  %v892_v40 = vsel %vm12924_vm11, %v749_v26, 0.0  ;;  %v12998_v60 = vld [vmem:[%s15270_s4] sm:$0xf]  ;;  %vm13065_vm8 = vcmp.eq.s32.totalorder %v615_v38, 1 }
 0x131   : > { %11336 = vmatprep.subr.msk.mxu1 %vm902_vm3, %v891_v61  ;;  %1595 = vmatprep.mubr.f32.mxu0 %v12180_v6 }
 0x132   : > { %v513_v32 = vpop.permute.xlu1 %512  ;;  %11337 = vmatpush1.msk.msra.mxu1 %vm902_vm3, %v890_v63  ;;  %v740_v34 = vpop.permute.xlu0 %739  ;;  %v576_v63 = vld [vmem:[#allocation9 + $0x8] sm:$0xff] }
 0x133   : > { %v748_v35 = vsel %vm745_vm1, %v738_v55, %v740_v34  ;;  %11338 = vmatmul.mubr.msk.f32.vlgmr.msra.gmra.mrb[6].mxu1 %vm898_vm7, %v12720_v56  ;;  %vm579_vm4 = vcmp.gt.f32.partialorder %v576_v63, 0.5 }
 0x134   : > { %3464 = vrot.lane.b32.xlu1 %v12581_v20, %s12183_s11  ;;  %3462 = vrot.lane.b32.xlu0 %v12578_v19, %s12183_s11  ;;  %v893_v37 = vsel %vm12916_vm10, %v748_v35, 0.0 }
 0x135   : > { %11339 = vmatprep.subr.msk.mxu0 %vm902_vm3, %v893_v37  ;;  %1666 = vmatprep.mubr.f32.mxu1 %v12180_v6 }
 0x136   : > { %v742_v44 = vpop.permute.xlu1 %741  ;;  %11340 = vmatpush1.msk.msra.mxu0 %vm902_vm3, %v892_v40  ;;  %v515_v45 = vpop.permute.xlu0 %514  ;;  %v577_v40 = vld [vmem:[#allocation9 + $0x10] sm:$0xf] }
 0x137   : > { %v746_v46 = vsel %vm745_vm1, %v742_v44, %v12700_v48  ;;  %v747_v49 = vsel %vm745_vm1, %v740_v34, %v742_v44  ;;  %v573_v31 = vsel %vm554_vm13, %v513_v32, %v515_v45  ;;  %11341 = vmatmul.mubr.msk.f32.vlgmr.msra.gmra.mrb[8].mxu0 %vm898_vm7, %v12720_v56  ;;  %vm664_vm1 = vcmp.eq.s32.totalorder %v587_v43, 1 }
 0x138   : > { %v894_v50 = vsel %vm12941_vm12, %v747_v49, 0.0  ;;  %3468 = vrot.lane.b32.xlu1 %v12501_v5, %s12183_s11  ;;  %3466 = vrot.lane.b32.xlu0 %v12589_v21, %s12183_s11  ;;  %v895_v48 = vsel %vm12949_vm14, %v746_v46, 0.0  ;;  %v685_v51 = vsel %vm12953_vm15, %v573_v31, 0.0  ;;  %v611_v43 = vrot.slane %v12900_v59, %v12710_v53  ;;  %v2508_v31 = vld [vmem:[#allocation9 + $0x28] sm:$0xff]  ;;  %s12080_s11 = scalar_lea.vmem %s15218_s17, 1024 }
 0x139   : > { %11342 = vmatprep.subr.msk.mxu1 %vm902_vm3, %v895_v48  ;;  %11345 = vmatprep.subr.msk.mxu0 %vm902_vm3, %v685_v51  ;;  %v13052_v46 = vsel %vm579_vm4, 1, %v12178_v0  ;;  %vm580_vm15 = vcmp.gt.f32.partialorder %v577_v40, 0.5  ;;  %p12081_p5 = scmp.ne.s32.totalorder %s15218_s17, %s12080_s11  ;;  %p12088_p6 = scmp.lt.s32.totalorder %s12086_s9, %s12080_s11 }
 0x13a   : > { %v517_v55 = vpop.permute.xlu1 %516  ;;  %11343 = vmatpush1.msk.msra.mxu1 %vm902_vm3, %v894_v50  ;;  %v12987_v57 = vpop.permute.xlu0 %550  ;;  %1800 = vmatprep.mubr.f32.mxu0 %v12180_v6  ;;  %v623_v50 = vrot.slane %v13052_v46, %v12647_v25  ;;  %vm13072_vm9 = vcmp.eq.s32.totalorder %v611_v43, 1  ;;  %v619_v54 = vrot.slane %v13052_v46, %v12658_v28  ;;  %v631_v63 = vrot.slane %v13052_v46, %v12660_v29 }
 0x13b   : > { %v574_v58 = vsel %vm554_vm13, %v12987_v57, %v513_v32  ;;  %11344 = vmatmul.mubr.msk.f32.vlgmr.msra.gmra.mrb[8].mxu1 %vm898_vm7, %v12720_v56  ;;  %v607_v56 = vrot.slane %v12900_v59, %v12675_v36  ;;  %v572_v23 = vsel %vm554_vm13, %v515_v45, %v517_v55  ;;  %v627_v30 = vrot.slane %v13052_v46, %v12664_v33  ;;  %p12089_p8 = por %p12088_p6, %p12087_p9 }
 0x13c   : > { %v684_v61 = vsel %vm664_vm1, %v574_v58, 0.0  ;;  %5197 = vrot.lane.b32.xlu1 %v12484_v1, %s12184_s13  ;;  %5195 = vrot.lane.b32.xlu0 %v12495_v3, %s12184_s13  ;;  %v686_v35 = vsel %vm13012_vm2, %v572_v23, 0.0  ;;  %vm13094_vm10 = vcmp.eq.s32.totalorder %v623_v50, 1  ;;  %vm13101_vm11 = vcmp.eq.s32.totalorder %v619_v54, 1 }
 0x13d   : > { %11346 = vmatpush1.msk.msra.mxu0 %vm902_vm3, %v684_v61  ;;  %1871 = vmatprep.mubr.f32.mxu1 %v12180_v6  ;;  %vm13034_vm5 = vcmp.eq.s32.totalorder %v607_v56, 1  ;;  %vm13123_vm12 = vcmp.eq.s32.totalorder %v631_v63, 1  ;;  %v639_v38 = vrot.slane %v13052_v46, %v12675_v36  ;;  %vm13130_vm14 = vcmp.eq.s32.totalorder %v627_v30, 1 }
 0x13e   : > { %v521_v24 = vpop.permute.xlu1 %520  ;;  %v519_v26 = vpop.permute.xlu0 %518  ;;  %11347 = vmatmul.mubr.msk.f32.vlgmr.msra.gmra.mrb[10].mxu0 %vm898_vm7, %v12998_v60  ;;  %vm2511_vm2 = vcmp.gt.f32.partialorder %v2508_v31, 0.5 }
 0x13f   : > { %v571_v32 = vsel %vm554_vm13, %v517_v55, %v519_v26  ;;  %1942 = vmatprep.mubr.f32.mxu0 %v12180_v6  ;;  %v570_v41 = vsel %vm554_vm13, %v519_v26, %v521_v24  ;;  %vm13152_vm1 = vcmp.eq.s32.totalorder %v639_v38, 1 }
 0x140   : > { %5199 = vrot.lane.b32.xlu1 %v12515_v8, %s12184_s13  ;;  %5193 = vrot.lane.b32.xlu0 %v12487_v2, %s12184_s13  ;;  %v687_v34 = vsel %vm13005_vm0, %v571_v32, 0.0  ;;  %v688_v59 = vsel %vm13040_vm6, %v570_v41, 0.0 }
 0x141   : > { %11348 = vmatprep.subr.msk.mxu1 %vm902_vm3, %v687_v34 }
 0x142   : > { %v525_v42 = vpop.permute.xlu1 %524  ;;  %11349 = vmatpush1.msk.msra.mxu1 %vm902_vm3, %v686_v35  ;;  %v523_v44 = vpop.permute.xlu0 %522 }
 0x143   : > { %v569_v45 = vsel %vm554_vm13, %v521_v24, %v523_v44  ;;  %11350 = vmatmul.mubr.msk.f32.vlgmr.msra.gmra.mrb[0].mxu1 %vm898_vm7, %v12998_v60  ;;  %v568_v51 = vsel %vm554_vm13, %v523_v44, %v525_v42  ;;  %v635_v44 = vrot.slane %v13052_v46, %v12677_v39 }
 0x144   : > { %5203 = vrot.lane.b32.xlu1 %v12523_v9, %s12184_s13  ;;  %5201 = vrot.lane.b32.xlu0 %v12498_v4, %s12184_s13  ;;  %v689_v49 = vsel %vm13034_vm5, %v569_v45, 0.0  ;;  %v690_v62 = vsel %vm13072_vm9, %v568_v51, 0.0  ;;  %v647_v51 = vrot.slane %v13052_v46, %v12698_v47 }
 0x145   : > { %11351 = vmatprep.subr.msk.mxu0 %vm902_vm3, %v689_v49  ;;  %2013 = vmatprep.mubr.f32.mxu1 %v12180_v6  ;;  %vm13159_vm0 = vcmp.eq.s32.totalorder %v635_v44, 1 }
 0x146   : > { %v529_v52 = vpop.permute.xlu1 %528  ;;  %11352 = vmatpush1.msk.msra.mxu0 %vm902_vm3, %v688_v59  ;;  %v527_v55 = vpop.permute.xlu0 %526  ;;  %vm13183_vm4 = vcmp.eq.s32.totalorder %v647_v51, 1 }
 0x147   : > { %v567_v58 = vsel %vm554_vm13, %v525_v42, %v527_v55  ;;  %11353 = vmatmul.mubr.msk.f32.vlgmr.msra.gmra.mrb[2].mxu0 %vm898_vm7, %v12998_v60  ;;  %v566_v23 = vsel %vm554_vm13, %v527_v55, %v529_v52  ;;  %v643_v55 = vrot.slane %v13052_v46, %v12710_v53 }
 0x148   : > { %5207 = vrot.lane.b32.xlu1 %v12534_v11, %s12184_s13  ;;  %5205 = vrot.lane.b32.xlu0 %v12526_v10, %s12184_s13  ;;  %v691_v61 = vsel %vm13065_vm8, %v567_v58, 0.0  ;;  %v692_v35 = vsel %vm13101_vm11, %v566_v23, 0.0 }
 0x149   : > { %11354 = vmatprep.subr.msk.mxu1 %vm902_vm3, %v691_v61  ;;  %2084 = vmatprep.mubr.f32.mxu0 %v12180_v6  ;;  %vm13190_vm5 = vcmp.eq.s32.totalorder %v643_v55, 1 }
 0x14a   : > { %v533_v24 = vpop.permute.xlu1 %532  ;;  %11355 = vmatpush1.msk.msra.mxu1 %vm902_vm3, %v690_v62  ;;  %v531_v26 = vpop.permute.xlu0 %530  ;;  %v583_v62 = vsel %vm580_vm15, 1, %v12178_v0 }
 0x14b   : > { %v565_v32 = vsel %vm554_vm13, %v529_v52, %v531_v26  ;;  %11356 = vmatmul.mubr.msk.f32.vlgmr.msra.gmra.mrb[2].mxu1 %vm898_vm7, %v12998_v60  ;;  %v564_v42 = vsel %vm554_vm13, %v531_v26, %v533_v24  ;;  %v659_v46 = vrot.slane %v583_v62, %v12664_v33  ;;  %v655_v23 = vrot.slane %v583_v62, %v12647_v25 }
 0x14c   : > { %5211 = vrot.lane.b32.xlu1 %v12545_v13, %s12184_s13  ;;  %5209 = vrot.lane.b32.xlu0 %v12537_v12, %s12184_s13  ;;  %v693_v34 = vsel %vm13094_vm10, %v565_v32, 0.0  ;;  %v694_v50 = vsel %vm13130_vm14, %v564_v42, 0.0  ;;  %v651_v32 = vrot.slane %v583_v62, %v12658_v28 }
 0x14d   : > { %11357 = vmatprep.subr.msk.mxu0 %vm902_vm3, %v693_v34  ;;  %2155 = vmatprep.mubr.f32.mxu1 %v12180_v6  ;;  %vm13212_vm6 = vcmp.eq.s32.totalorder %v659_v46, 1  ;;  %vm13219_vm8 = vcmp.eq.s32.totalorder %v655_v23, 1 }
 0x14e   : > { %v537_v43 = vpop.permute.xlu1 %536  ;;  %11358 = vmatpush1.msk.msra.mxu0 %vm902_vm3, %v692_v35  ;;  %v535_v45 = vpop.permute.xlu0 %534  ;;  %v13200_v35 = vsel %vm2511_vm2, 1, %v12178_v0  ;;  %vm13230_vm10 = vcmp.eq.s32.totalorder %v651_v32, 1 }
 0x14f   : > { %v563_v49 = vsel %vm554_vm13, %v533_v24, %v535_v45  ;;  %11359 = vmatmul.mubr.msk.f32.vlgmr.msra.gmra.mrb[4].mxu0 %vm898_vm7, %v12998_v60  ;;  %v562_v52 = vsel %vm554_vm13, %v535_v45, %v537_v43  ;;  %v2509_v24 = vld [vmem:[#allocation9 + $0x30] sm:$0xff]  ;;  %v2536_v32 = vrot.slane %v13200_v35, %v12677_v39  ;;  %v2548_v42 = vrot.slane %v13200_v35, %v12698_v47 }
 0x150   : > { %5215 = vrot.lane.b32.xlu1 %v12556_v15, %s12184_s13  ;;  %5213 = vrot.lane.b32.xlu0 %v12548_v14, %s12184_s13  ;;  %v695_v59 = vsel %vm13123_vm12, %v563_v49, 0.0  ;;  %v696_v63 = vsel %vm13159_vm0, %v562_v52, 0.0  ;;  %v2544_v44 = vrot.slane %v13200_v35, %v12710_v53 }
 0x151   : > { %11360 = vmatprep.subr.msk.mxu1 %vm902_vm3, %v695_v59  ;;  %2226 = vmatprep.mubr.f32.mxu0 %v12180_v6  ;;  %vm13332_vm2 = vcmp.eq.s32.totalorder %v2536_v32, 1 }
 0x152   : > { %v541_v54 = vpop.permute.xlu1 %540  ;;  %11361 = vmatpush1.msk.msra.mxu1 %vm902_vm3, %v694_v50  ;;  %v539_v58 = vpop.permute.xlu0 %538 }
 0x153   : > { %v561_v61 = vsel %vm554_vm13, %v537_v43, %v539_v58  ;;  %11362 = vmatmul.mubr.msk.f32.vlgmr.msra.gmra.mrb[4].mxu1 %vm898_vm7, %v12998_v60  ;;  %v560_v30 = vsel %vm554_vm13, %v539_v58, %v541_v54 }
 0x154   : > { %5219 = vrot.lane.b32.xlu1 %v12567_v17, %s12184_s13  ;;  %5217 = vrot.lane.b32.xlu0 %v12559_v16, %s12184_s13  ;;  %v697_v56 = vsel %vm13152_vm1, %v561_v61, 0.0  ;;  %v663_v16 = vrot.slane %v583_v62, %v12660_v29  ;;  %v698_v41 = vsel %vm13190_vm5, %v560_v30, 0.0  ;;  %v2532_v62 = vrot.slane %v13200_v35, %v12660_v29 }
 0x155   : > { %11363 = vmatprep.subr.msk.mxu0 %vm902_vm3, %v697_v56  ;;  %2297 = vmatprep.mubr.f32.mxu1 %v12180_v6  ;;  %v2528_v56 = vrot.slane %v13200_v35, %v12664_v33  ;;  %vm2512_vm1 = vcmp.gt.f32.partialorder %v2509_v24, 0.5  ;;  %vm13364_vm5 = vcmp.eq.s32.totalorder %v2544_v44, 1  ;;  %v13638_v24 = vld [vmem:[%s12459_s27] sm:$0xff]  ;;  %s15590_s27 = sld [smem:[#allocation23_spill]] }
 0x156   : > { %v545_v26 = vpop.permute.xlu1 %544  ;;  %11364 = vmatpush1.msk.msra.mxu0 %vm902_vm3, %v696_v63  ;;  %v543_v34 = vpop.permute.xlu0 %542  ;;  %vm13223_vm9 = vcmp.eq.s32.totalorder %v663_v16, 1  ;;  %vm13298_vm14 = vcmp.eq.s32.totalorder %v2532_v62, 1  ;;  %v2540_v16 = vrot.slane %v13200_v35, %v12675_v36 }
 0x157   : > { %v559_v37 = vsel %vm554_vm13, %v541_v54, %v543_v34  ;;  %11365 = vmatmul.mubr.msk.f32.vlgmr.msra.gmra.mrb[6].mxu0 %vm898_vm7, %v12998_v60  ;;  %v558_v45 = vsel %vm554_vm13, %v543_v34, %v545_v26  ;;  %v2520_v54 = vrot.slane %v13200_v35, %v12658_v28  ;;  %vm13304_vm15 = vcmp.eq.s32.totalorder %v2528_v56, 1 }
 0x158   : > { %5223 = vrot.lane.b32.xlu1 %v12578_v19, %s12184_s13  ;;  %5221 = vrot.lane.b32.xlu0 %v12570_v18, %s12184_s13  ;;  %v699_v38 = vsel %vm13183_vm4, %v559_v37, 0.0  ;;  %v2524_v18 = vrot.slane %v13200_v35, %v12647_v25  ;;  %v700_v52 = vsel %vm13230_vm10, %v558_v45, 0.0  ;;  %vm13326_vm0 = vcmp.eq.s32.totalorder %v2540_v16, 1 }
 0x159   : > { %11366 = vmatprep.subr.msk.mxu1 %vm902_vm3, %v699_v38  ;;  %2368 = vmatprep.mubr.f32.mxu0 %v12180_v6  ;;  %vm2597_vm12 = vcmp.eq.s32.totalorder %v2520_v54, 1  ;;  %vm13357_vm4 = vcmp.eq.s32.totalorder %v2548_v42, 1  ;;  %v3494_v42 = vld [vmem:[#allocation9 + $0x3c] sm:$0xff] }
 0x15a   : > { %v549_v49 = vpop.permute.xlu1 %548  ;;  %11367 = vmatpush1.msk.msra.mxu1 %vm902_vm3, %v698_v41  ;;  %v547_v59 = vpop.permute.xlu0 %546  ;;  %vm2598_vm11 = vcmp.eq.s32.totalorder %v2524_v18, 1 }
 0x15b   : > { %v555_v31 = vsel %vm554_vm13, %v549_v49, %v12987_v57  ;;  %v556_v50 = vsel %vm554_vm13, %v547_v59, %v549_v49  ;;  %v557_v48 = vsel %vm554_vm13, %v545_v26, %v547_v59  ;;  %11368 = vmatmul.mubr.msk.f32.vlgmr.msra.gmra.mrb[6].mxu1 %vm898_vm7, %v12998_v60  ;;  %vm2486_vm13 = vcmp.lt.s32.totalorder %v12656_v27, 15  ;;  %p15592_p10 = scmp.ne.s32.totalorder %s15590_s27, 0 }
 0x15c   : > { %v702_v51 = vsel %vm13212_vm6, %v556_v50, 0.0  ;;  %5227 = vrot.lane.b32.xlu1 %v12589_v21, %s12184_s13  ;;  %5225 = vrot.lane.b32.xlu0 %v12581_v20, %s12184_s13  ;;  %v701_v57 = vsel %vm13219_vm8, %v557_v48, 0.0  ;;  %v703_v14 = vsel %vm13223_vm9, %v555_v31, 0.0  ;;  %v13344_v59 = vsel %vm2512_vm1, 1, %v12178_v0 }
 0x15d   : > { %11369 = vmatprep.subr.msk.mxu0 %vm902_vm3, %v701_v57  ;;  %11372 = vmatprep.subr.msk.mxu1 %vm902_vm3, %v703_v14  ;;  %v2556_v48 = vrot.slane %v13344_v59, %v12647_v25  ;;  %v2552_v14 = vrot.slane %v13344_v59, %v12658_v28  ;;  %v2572_v30 = vrot.slane %v13344_v59, %v12675_v36  ;;  %p12082_p13 = pnand %p12081_p5, %p15592_p10 }
 0x15e   : > { %v2449_v20 = vpop.permute.xlu1 %2448  ;;  %11370 = vmatpush1.msk.msra.mxu0 %vm902_vm3, %v700_v52  ;;  %11373 = vmatpush1.msk.msra.mxu1 %vm902_vm3, %v702_v51  ;;  %v2447_v55 = vpop.permute.xlu0 %2446  ;;  %v13471_v51 = vld [vmem:[%s12469_s10 + $0x28] sm:$0xff] }
 0x15f   : > { %v2505_v58 = vsel %vm2486_vm13, %v2447_v55, %v2449_v20  ;;  %11371 = vmatmul.mubr.msk.f32.vlgmr.msra.gmra.mrb[8].mxu0 %vm898_vm7, %v12998_v60  ;;  %2439 = vmatprep.mubr.f32.mxu1 %v12180_v6  ;;  %vm13386_vm6 = vcmp.eq.s32.totalorder %v2556_v48, 1  ;;  %vm13393_vm8 = vcmp.eq.s32.totalorder %v2552_v14, 1  ;;  %p12083_p3 = pneg %p12082_p13 }
 0x160   : > { %5231 = vrot.lane.b32.xlu1 %v12511_v7, %s12184_s13  ;;  %5229 = vrot.lane.b32.xlu0 %v12501_v5, %s12184_s13  ;;  %v2618_v61 = vsel %vm2598_vm11, %v2505_v58, 0.0 }
 0x161   : > { %11376 = vmatprep.subr.msk.mxu0 %vm902_vm3, %v2618_v61  ;;  %11374 = vmatmul.mubr.msk.f32.vlgmr.msra.gmra.mrb[10].mxu1 %vm898_vm7, %v12998_v60  ;;  %v2564_v61 = vrot.slane %v13344_v59, %v12660_v29  ;;  %p12090_p12 = pnand %p12089_p8, %p12083_p3 }
 0x162   : > { %v2451_v46 = vpop.permute.xlu1 %2450  ;;  %v13281_v63 = vpop.permute.xlu0 %2484  ;;  %2766 = vmatprep.mubr.f32.mxu0 %v12180_v6  ;;  %2837 = vmatprep.mubr.f32.mxu1 %v12180_v6 }
 0x163   : > { %v2506_v5 = vsel %vm2486_vm13, %v13281_v63, %v2447_v55  ;;  %vm13415_vm9 = vcmp.eq.s32.totalorder %v2564_v61, 1 }
 0x164   : > { %v2617_v60 = vsel %vm2597_vm12, %v2506_v5, 0.0  ;;  %6183 = vrot.lane.b32.xlu1 %v12484_v1, %s12185_s19  ;;  %6181 = vrot.lane.b32.xlu0 %v12495_v3, %s12185_s19  ;;  %v2504_v1 = vsel %vm2486_vm13, %v2449_v20, %v2451_v46  ;;  %vm13447_vm12 = vcmp.eq.s32.totalorder %v2572_v30, 1 }
 0x165   : > { %11377 = vmatpush1.msk.msra.mxu0 %vm902_vm3, %v2617_v60  ;;  %v2619_v40 = vsel %vm13304_vm15, %v2504_v1, 0.0  ;;  %v2510_v1 = vld [vmem:[#allocation9 + $0x38] sm:$0xf]  ;;  %vm3497_vm15 = vcmp.gt.f32.partialorder %v3494_v42, 0.5  ;;  %v13552_v42 = vld [vmem:[%s12469_s10 + $0x38] sm:$0xff] }
 0x166   : > { %v2455_v26 = vpop.permute.xlu1 %2454  ;;  %v2453_v34 = vpop.permute.xlu0 %2452  ;;  %11378 = vmatmul.mubr.msk.f32.vlgmr.msra.gmra.mrb[12].mxu0 %vm898_vm7, %v13291_v22  ;;  %vm2513_vm11 = vcmp.gt.f32.partialorder %v2510_v1, 0.5 }
 0x167   : > { %v2503_v37 = vsel %vm2486_vm13, %v2451_v46, %v2453_v34  ;;  %2908 = vmatprep.mubr.f32.mxu0 %v12180_v6  ;;  %v2560_v46 = vrot.slane %v13344_v59, %v12664_v33  ;;  %v2516_v48 = vsel %vm2513_vm11, 1, %v12178_v0 }
 0x168   : > { %6185 = vrot.lane.b32.xlu1 %v12515_v8, %s12185_s19  ;;  %6179 = vrot.lane.b32.xlu0 %v12487_v2, %s12185_s19  ;;  %v2620_v38 = vsel %vm13298_vm14, %v2503_v37, 0.0  ;;  %v2502_v2 = vsel %vm2486_vm13, %v2453_v34, %v2455_v26  ;;  %v2568_v34 = vrot.slane %v13344_v59, %v12677_v39  ;;  %v2584_v61 = vrot.slane %v2516_v48, %v12658_v28 }
 0x169   : > { %11379 = vmatprep.subr.msk.mxu1 %vm902_vm3, %v2620_v38  ;;  %v2621_v35 = vsel %vm13332_vm2, %v2502_v2, 0.0  ;;  %vm13422_vm10 = vcmp.eq.s32.totalorder %v2560_v46, 1  ;;  %v13507_v46 = vld [vmem:[%s12469_s10 + $0x30] sm:$0xff] }
 0x16a   : > { %v2459_v18 = vpop.permute.xlu1 %2458  ;;  %11380 = vmatpush1.msk.msra.mxu1 %vm902_vm3, %v2619_v40  ;;  %v2457_v45 = vpop.permute.xlu0 %2456  ;;  %v13438_v40 = vld [vmem:[%s12469_s10 + $0x20] sm:$0xff]  ;;  %vm13454_vm14 = vcmp.eq.s32.totalorder %v2568_v34, 1 }
 0x16b   : > { %v2501_v49 = vsel %vm2486_vm13, %v2455_v26, %v2457_v45  ;;  %11381 = vmatmul.mubr.msk.f32.vlgmr.msra.gmra.mrb[0].mxu1 %vm898_vm7, %v13291_v22 }
 0x16c   : > { %6189 = vrot.lane.b32.xlu1 %v12523_v9, %s12185_s19  ;;  %6187 = vrot.lane.b32.xlu0 %v12498_v4, %s12185_s19  ;;  %v2622_v31 = vsel %vm13326_vm0, %v2501_v49, 0.0  ;;  %v2500_v4 = vsel %vm2486_vm13, %v2457_v45, %v2459_v18 }
 0x16d   : > { %11382 = vmatprep.subr.msk.mxu0 %vm902_vm3, %v2622_v31  ;;  %2979 = vmatprep.mubr.f32.mxu1 %v12180_v6  ;;  %v2623_v55 = vsel %vm13364_vm5, %v2500_v4, 0.0  ;;  %v2576_v31 = vrot.slane %v13344_v59, %v12710_v53  ;;  %v2592_v4 = vrot.slane %v2516_v48, %v12664_v33 }
 0x16e   : > { %v2463_v57 = vpop.permute.xlu1 %2462  ;;  %11383 = vmatpush1.msk.msra.mxu0 %vm902_vm3, %v2621_v35  ;;  %v2461_v52 = vpop.permute.xlu0 %2460 }
 0x16f   : > { %v2499_v54 = vsel %vm2486_vm13, %v2459_v18, %v2461_v52  ;;  %11384 = vmatmul.mubr.msk.f32.vlgmr.msra.gmra.mrb[2].mxu0 %vm898_vm7, %v13291_v22  ;;  %v2580_v18 = vrot.slane %v13344_v59, %v12698_v47  ;;  %vm13488_vm0 = vcmp.eq.s32.totalorder %v2576_v31, 1  ;;  %vm13513_vm2 = vcmp.eq.s32.totalorder %v2592_v4, 1  ;;  %v13577_v31 = vld [vmem:[%s12475_s24] sm:$0xff] }
 0x170   : > { %6193 = vrot.lane.b32.xlu1 %v12534_v11, %s12185_s19  ;;  %6191 = vrot.lane.b32.xlu0 %v12526_v10, %s12185_s19  ;;  %v2624_v20 = vsel %vm13357_vm4, %v2499_v54, 0.0  ;;  %v2498_v10 = vsel %vm2486_vm13, %v2461_v52, %v2463_v57  ;;  %v2588_v52 = vrot.slane %v2516_v48, %v12647_v25  ;;  %v2596_v54 = vrot.slane %v2516_v48, %v12660_v29 }
 0x171   : > { %11385 = vmatprep.subr.msk.mxu1 %vm902_vm3, %v2624_v20  ;;  %3050 = vmatprep.mubr.f32.mxu0 %v12180_v6  ;;  %v2625_v16 = vsel %vm13393_vm8, %v2498_v10, 0.0  ;;  %vm13481_vm1 = vcmp.eq.s32.totalorder %v2580_v18, 1  ;;  %v13498_v10 = vsel %vm3497_vm15, 1, %v12178_v0 }
 0x172   : > { %v2467_v56 = vpop.permute.xlu1 %2466  ;;  %11386 = vmatpush1.msk.msra.mxu1 %vm902_vm3, %v2623_v55  ;;  %v2465_v5 = vpop.permute.xlu0 %2464  ;;  %vm13520_vm4 = vcmp.eq.s32.totalorder %v2588_v52, 1  ;;  %vm13524_vm5 = vcmp.eq.s32.totalorder %v2596_v54, 1  ;;  %v3510_v30 = vrot.slane %v13498_v10, %v12647_v25  ;;  %v3506_v18 = vrot.slane %v13498_v10, %v12658_v28  ;;  %v13602_v52 = vld [vmem:[%s15270_s4 + $0xc] sm:$0xf]  ;;  %v13607_v54 = vld [vmem:[%s12469_s10] sm:$0xff] }
 0x173   : > { %v2497_v60 = vsel %vm2486_vm13, %v2463_v57, %v2465_v5  ;;  %11387 = vmatmul.mubr.msk.f32.vlgmr.msra.gmra.mrb[2].mxu1 %vm898_vm7, %v13291_v22  ;;  %v2496_v26 = vsel %vm2486_vm13, %v2465_v5, %v2467_v56  ;;  %v3518_v48 = vrot.slane %v13498_v10, %v12660_v29 }
 0x174   : > { %6197 = vrot.lane.b32.xlu1 %v12545_v13, %s12185_s19  ;;  %6195 = vrot.lane.b32.xlu0 %v12537_v12, %s12185_s19  ;;  %v2626_v23 = vsel %vm13386_vm6, %v2497_v60, 0.0  ;;  %v2627_v43 = vsel %vm13422_vm10, %v2496_v26, 0.0  ;;  %vm13531_vm6 = vcmp.eq.s32.totalorder %v2584_v61, 1  ;;  %vm3584_vm8 = vcmp.eq.s32.totalorder %v3510_v30, 1 }
 0x175   : > { %11388 = vmatprep.subr.msk.mxu0 %vm902_vm3, %v2626_v23  ;;  %3121 = vmatprep.mubr.f32.mxu1 %v12180_v6  ;;  %vm13614_vm10 = vcmp.eq.s32.totalorder %v3518_v48, 1 }
 0x176   : > { %v2471_v32 = vpop.permute.xlu1 %2470  ;;  %11389 = vmatpush1.msk.msra.mxu0 %vm902_vm3, %v2625_v16  ;;  %v2469_v37 = vpop.permute.xlu0 %2468 }
 0x177   : > { %v2495_v38 = vsel %vm2486_vm13, %v2467_v56, %v2469_v37  ;;  %11390 = vmatmul.mubr.msk.f32.vlgmr.msra.gmra.mrb[4].mxu0 %vm898_vm7, %v13291_v22  ;;  %v2494_v45 = vsel %vm2486_vm13, %v2469_v37, %v2471_v32 }
 0x178   : > { %6201 = vrot.lane.b32.xlu1 %v12556_v15, %s12185_s19  ;;  %6199 = vrot.lane.b32.xlu0 %v13438_v40, %s12185_s19  ;;  %v2628_v41 = vsel %vm13415_vm9, %v2495_v38, 0.0  ;;  %v2629_v57 = vsel %vm13454_vm14, %v2494_v45, 0.0  ;;  %vm13582_vm9 = vcmp.eq.s32.totalorder %v3506_v18, 1 }
 0x179   : > { %11391 = vmatprep.subr.msk.mxu1 %vm902_vm3, %v2628_v41  ;;  %3192 = vmatprep.mubr.f32.mxu0 %v12180_v6 }
 0x17a   : > { %v2475_v49 = vpop.permute.xlu1 %2474  ;;  %11392 = vmatpush1.msk.msra.mxu1 %vm902_vm3, %v2627_v43  ;;  %v2473_v35 = vpop.permute.xlu0 %2472 }
 0x17b   : > { %v2493_v50 = vsel %vm2486_vm13, %v2471_v32, %v2473_v35  ;;  %11393 = vmatmul.mubr.msk.f32.vlgmr.msra.gmra.mrb[4].mxu1 %vm898_vm7, %v13291_v22  ;;  %v2492_v55 = vsel %vm2486_vm13, %v2473_v35, %v2475_v49 }
 0x17c   : > { %6205 = vrot.lane.b32.xlu1 %v12567_v17, %s12185_s19  ;;  %6203 = vrot.lane.b32.xlu0 %v13471_v51, %s12185_s19  ;;  %v2630_v59 = vsel %vm13447_vm12, %v2493_v50, 0.0  ;;  %v2631_v23 = vsel %vm13488_vm0, %v2492_v55, 0.0  ;;  %v3526_v55 = vrot.slane %v13498_v10, %v12675_v36 }
 0x17d   : > { %11394 = vmatprep.subr.msk.mxu0 %vm902_vm3, %v2630_v59  ;;  %3263 = vmatprep.mubr.f32.mxu1 %v12180_v6  ;;  %v3514_v59 = vrot.slane %v13498_v10, %v12664_v33 }
 0x17e   : > { %v2479_v58 = vpop.permute.xlu1 %2478  ;;  %11395 = vmatpush1.msk.msra.mxu0 %vm902_vm3, %v2629_v57  ;;  %v2477_v62 = vpop.permute.xlu0 %2476  ;;  %vm13645_vm14 = vcmp.eq.s32.totalorder %v3526_v55, 1 }
 0x17f   : > { %v2491_v56 = vsel %vm2486_vm13, %v2475_v49, %v2477_v62  ;;  %11396 = vmatmul.mubr.msk.f32.vlgmr.msra.gmra.mrb[6].mxu0 %vm898_vm7, %v13291_v22  ;;  %v2490_v12 = vsel %vm2486_vm13, %v2477_v62, %v2479_v58  ;;  %vm13620_vm11 = vcmp.eq.s32.totalorder %v3514_v59, 1 }
 0x180   : > { %6209 = vrot.lane.b32.xlu1 %v12578_v19, %s12185_s19  ;;  %6207 = vrot.lane.b32.xlu0 %v13507_v46, %s12185_s19  ;;  %v2632_v5 = vsel %vm13481_vm1, %v2491_v56, 0.0  ;;  %v2633_v2 = vsel %vm13531_vm6, %v2490_v12, 0.0  ;;  %v3534_v12 = vrot.slane %v13498_v10, %v12698_v47 }
 0x181   : > { %11397 = vmatprep.subr.msk.mxu1 %vm902_vm3, %v2632_v5  ;;  %3334 = vmatprep.mubr.f32.mxu0 %v12180_v6  ;;  %v3522_v5 = vrot.slane %v13498_v10, %v12677_v39 }
 0x182   : > { %v2483_v26 = vpop.permute.xlu1 %2482  ;;  %11398 = vmatpush1.msk.msra.mxu1 %vm902_vm3, %v2631_v23  ;;  %v2481_v32 = vpop.permute.xlu0 %2480  ;;  %vm13679_vm1 = vcmp.eq.s32.totalorder %v3534_v12, 1 }
 0x183   : > { %v2487_v34 = vsel %vm2486_vm13, %v2483_v26, %v13281_v63  ;;  %v2488_v37 = vsel %vm2486_vm13, %v2481_v32, %v2483_v26  ;;  %v2489_v38 = vsel %vm2486_vm13, %v2479_v58, %v2481_v32  ;;  %11399 = vmatmul.mubr.msk.f32.vlgmr.msra.gmra.mrb[6].mxu1 %vm898_vm7, %v13291_v22  ;;  %vm3472_vm13 = vcmp.lt.s32.totalorder %v12656_v27, 1  ;;  %v3495_v58 = vld [vmem:[#allocation9 + $0x44] sm:$0xff]  ;;  %v3496_v26 = vld [vmem:[#allocation9 + $0x4c] sm:$0xf] }
 0x184   : > { %v2635_v41 = vsel %vm13513_vm2, %v2488_v37, 0.0  ;;  %6213 = vrot.lane.b32.xlu1 %v12589_v21, %s12185_s19  ;;  %6211 = vrot.lane.b32.xlu0 %v13552_v42, %s12185_s19  ;;  %v2634_v63 = vsel %vm13520_vm4, %v2489_v38, 0.0  ;;  %v2636_v43 = vsel %vm13524_vm5, %v2487_v34, 0.0  ;;  %vm3498_vm12 = vcmp.gt.f32.partialorder %v3495_v58, 0.5 }
 0x185   : > { %11400 = vmatprep.subr.msk.mxu0 %vm902_vm3, %v2634_v63  ;;  %11403 = vmatprep.subr.msk.mxu1 %vm902_vm3, %v2636_v43  ;;  %vm13651_vm15 = vcmp.eq.s32.totalorder %v3522_v5, 1  ;;  %v3530_v37 = vrot.slane %v13498_v10, %v12710_v53  ;;  %v13663_v63 = vsel %vm3498_vm12, 1, %v12178_v0 }
 0x186   : > { %v3435_v44 = vpop.permute.xlu1 %3434  ;;  %11401 = vmatpush1.msk.msra.mxu0 %vm902_vm3, %v2633_v2  ;;  %11404 = vmatpush1.msk.msra.mxu1 %vm902_vm3, %v2635_v41  ;;  %v3433_v45 = vpop.permute.xlu0 %3432  ;;  %v13672_v2 = vld [vmem:[%s12469_s10 + $0x8] sm:$0xff]  ;;  %v3538_v50 = vrot.slane %v13663_v63, %v12658_v28  ;;  %v3550_v55 = vrot.slane %v13663_v63, %v12660_v29  ;;  %v3558_v12 = vrot.slane %v13663_v63, %v12675_v36 }
 0x187   : > { %v3491_v49 = vsel %vm3472_vm13, %v3433_v45, %v3435_v44  ;;  %11402 = vmatmul.mubr.msk.f32.vlgmr.msra.gmra.mrb[8].mxu0 %vm898_vm7, %v13291_v22  ;;  %3405 = vmatprep.mubr.f32.mxu1 %v12180_v6  ;;  %vm13686_vm0 = vcmp.eq.s32.totalorder %v3530_v37, 1  ;;  %v3566_v18 = vrot.slane %v13663_v63, %v12698_v47 }
 0x188   : > { %6217 = vrot.lane.b32.xlu1 %v12511_v7, %s12185_s19  ;;  %6215 = vrot.lane.b32.xlu0 %v13577_v31, %s12185_s19  ;;  %v3604_v35 = vsel %vm3584_vm8, %v3491_v49, 0.0  ;;  %vm13718_vm4 = vcmp.eq.s32.totalorder %v3538_v50, 1  ;;  %vm13743_vm5 = vcmp.eq.s32.totalorder %v3550_v55, 1  ;;  %vm3499_vm8 = vcmp.gt.f32.partialorder %v3496_v26, 0.5 }
 0x189   : > { %11407 = vmatprep.subr.msk.mxu0 %vm902_vm3, %v3604_v35  ;;  %11405 = vmatmul.mubr.msk.f32.vlgmr.msra.gmra.mrb[12].mxu1 %vm898_vm7, %v13291_v22 }
 0x18a   : > { %v3437_v4 = vpop.permute.xlu1 %3436  ;;  %v13592_v57 = vpop.permute.xlu0 %3470  ;;  %3752 = vmatprep.mubr.f32.mxu0 %v12180_v6  ;;  %3823 = vmatprep.mubr.f32.mxu1 %v12180_v6 }
 0x18b   : > { %v3492_v14 = vsel %vm3472_vm13, %v13592_v57, %v3433_v45  ;;  %v3490_v62 = vsel %vm3472_vm13, %v3435_v44, %v3437_v4  ;;  %v3542_v44 = vrot.slane %v13663_v63, %v12647_v25 }
 0x18c   : > { %v3603_v22 = vsel %vm13582_vm9, %v3492_v14, 0.0  ;;  %7169 = vrot.lane.b32.xlu1 %v13607_v54, %s12186_s22  ;;  %7167 = vrot.lane.b32.xlu0 %v12495_v3, %s12186_s22  ;;  %v3605_v30 = vsel %vm13620_vm11, %v3490_v62, 0.0  ;;  %v13704_v14 = vld [vmem:[%s12469_s10 + $0x10] sm:$0xff]  ;;  %vm13774_vm9 = vcmp.eq.s32.totalorder %v3558_v12, 1  ;;  %vm13799_vm11 = vcmp.eq.s32.totalorder %v3566_v18, 1 }
 0x18d   : > { %11408 = vmatpush1.msk.msra.mxu0 %vm902_vm3, %v3603_v22  ;;  %vm13711_vm2 = vcmp.eq.s32.totalorder %v3542_v44, 1 }
 0x18e   : > { %v3441_v56 = vpop.permute.xlu1 %3440  ;;  %v3439_v60 = vpop.permute.xlu0 %3438  ;;  %11409 = vmatmul.mubr.msk.f32.vlgmr.msra.gmra.mrb[14].mxu0 %vm898_vm7, %v13602_v52 }
 0x18f   : > { %v3489_v23 = vsel %vm3472_vm13, %v3437_v4, %v3439_v60  ;;  %3894 = vmatprep.mubr.f32.mxu0 %v12180_v6  ;;  %v3488_v32 = vsel %vm3472_vm13, %v3439_v60, %v3441_v56 }
 0x190   : > { %v3606_v16 = vsel %vm13614_vm10, %v3489_v23, 0.0  ;;  %7171 = vrot.lane.b32.xlu1 %v12515_v8, %s12186_s22  ;;  %7165 = vrot.lane.b32.xlu0 %v13638_v24, %s12186_s22  ;;  %v3607_v10 = vsel %vm13651_vm15, %v3488_v32, 0.0 }
 0x191   : > { %11410 = vmatprep.subr.msk.mxu1 %vm902_vm3, %v3606_v16  ;;  %v13736_v16 = vld [vmem:[%s12469_s10 + $0x18] sm:$0xff] }
 0x192   : > { %v3445_v34 = vpop.permute.xlu1 %3444  ;;  %11411 = vmatpush1.msk.msra.mxu1 %vm902_vm3, %v3605_v30  ;;  %v3443_v38 = vpop.permute.xlu0 %3442 }
 0x193   : > { %v3487_v41 = vsel %vm3472_vm13, %v3441_v56, %v3443_v38  ;;  %11412 = vmatmul.mubr.msk.f32.vlgmr.msra.gmra.mrb[0].mxu1 %vm898_vm7, %v13602_v52  ;;  %v3486_v49 = vsel %vm3472_vm13, %v3443_v38, %v3445_v34  ;;  %v3546_v56 = vrot.slane %v13663_v63, %v12664_v33  ;;  %v3554_v38 = vrot.slane %v13663_v63, %v12677_v39 }
 0x194   : > { %v3608_v43 = vsel %vm13645_vm14, %v3487_v41, 0.0  ;;  %7175 = vrot.lane.b32.xlu1 %v12523_v9, %s12186_s22  ;;  %7173 = vrot.lane.b32.xlu0 %v13672_v2, %s12186_s22  ;;  %v3609_v22 = vsel %vm13686_vm0, %v3486_v49, 0.0 }
 0x195   : > { %11413 = vmatprep.subr.msk.mxu0 %vm902_vm3, %v3608_v43  ;;  %3965 = vmatprep.mubr.f32.mxu1 %v12180_v6  ;;  %vm13750_vm6 = vcmp.eq.s32.totalorder %v3546_v56, 1  ;;  %vm13779_vm10 = vcmp.eq.s32.totalorder %v3554_v38, 1  ;;  %v5256_v56 = vld [vmem:[#allocation9 + $0x6c] sm:$0xff] }
 0x196   : > { %v3449_v35 = vpop.permute.xlu1 %3448  ;;  %11414 = vmatpush1.msk.msra.mxu0 %vm902_vm3, %v3607_v10  ;;  %v3447_v48 = vpop.permute.xlu0 %3446 }
 0x197   : > { %v3485_v59 = vsel %vm3472_vm13, %v3445_v34, %v3447_v48  ;;  %11415 = vmatmul.mubr.msk.f32.vlgmr.msra.gmra.mrb[2].mxu0 %vm898_vm7, %v13602_v52  ;;  %v3484_v61 = vsel %vm3472_vm13, %v3447_v48, %v3449_v35  ;;  %v3562_v48 = vrot.slane %v13663_v63, %v12710_v53 }
 0x198   : > { %v3610_v4 = vsel %vm13679_vm1, %v3485_v59, 0.0  ;;  %7179 = vrot.lane.b32.xlu1 %v12534_v11, %s12186_s22  ;;  %7177 = vrot.lane.b32.xlu0 %v13704_v14, %s12186_s22  ;;  %v3611_v30 = vsel %vm13718_vm4, %v3484_v61, 0.0 }
 0x199   : > { %11416 = vmatprep.subr.msk.mxu1 %vm902_vm3, %v3610_v4  ;;  %4036 = vmatprep.mubr.f32.mxu0 %v12180_v6  ;;  %vm13810_vm12 = vcmp.eq.s32.totalorder %v3562_v48, 1 }
 0x19a   : > { %v3453_v62 = vpop.permute.xlu1 %3452  ;;  %11417 = vmatpush1.msk.msra.mxu1 %vm902_vm3, %v3609_v22  ;;  %v3451_v5 = vpop.permute.xlu0 %3450  ;;  %v3502_v22 = vsel %vm3499_vm8, 1, %v12178_v0 }
 0x19b   : > { %v3483_v60 = vsel %vm3472_vm13, %v3449_v35, %v3451_v5  ;;  %11418 = vmatmul.mubr.msk.f32.vlgmr.msra.gmra.mrb[2].mxu1 %vm898_vm7, %v13602_v52  ;;  %v3482_v34 = vsel %vm3472_vm13, %v3451_v5, %v3453_v62  ;;  %v3582_v58 = vrot.slane %v3502_v22, %v12660_v29  ;;  %v3574_v61 = vrot.slane %v3502_v22, %v12647_v25 }
 0x19c   : > { %v3612_v23 = vsel %vm13711_vm2, %v3483_v60, 0.0  ;;  %7183 = vrot.lane.b32.xlu1 %v12545_v13, %s12186_s22  ;;  %7181 = vrot.lane.b32.xlu0 %v13736_v16, %s12186_s22  ;;  %v3613_v44 = vsel %vm13750_vm6, %v3482_v34, 0.0  ;;  %vm5233_vm2 = vcmp.lt.s32.totalorder %v12656_v27, 127 }
 0x19d   : > { %11419 = vmatprep.subr.msk.mxu0 %vm902_vm3, %v3612_v23  ;;  %4107 = vmatprep.mubr.f32.mxu1 %v12180_v6  ;;  %v3570_v23 = vrot.slane %v3502_v22, %v12658_v28  ;;  %vm13831_vm14 = vcmp.eq.s32.totalorder %v3582_v58, 1  ;;  %vm13835_vm15 = vcmp.eq.s32.totalorder %v3574_v61, 1 }
 0x19e   : > { %v3457_v37 = vpop.permute.xlu1 %3456  ;;  %11420 = vmatpush1.msk.msra.mxu0 %vm902_vm3, %v3611_v30  ;;  %v3455_v41 = vpop.permute.xlu0 %3454 }
 0x19f   : > { %v3481_v43 = vsel %vm3472_vm13, %v3453_v62, %v3455_v41  ;;  %11421 = vmatmul.mubr.msk.f32.vlgmr.msra.gmra.mrb[4].mxu0 %vm898_vm7, %v13602_v52  ;;  %v3480_v35 = vsel %vm3472_vm13, %v3455_v41, %v3457_v37  ;;  %v3578_v62 = vrot.slane %v3502_v22, %v12664_v33  ;;  %vm13844_vm0 = vcmp.eq.s32.totalorder %v3570_v23, 1 }
 0x1a0   : > { %v3614_v10 = vsel %vm13743_vm5, %v3481_v43, 0.0  ;;  %7187 = vrot.lane.b32.xlu1 %v12556_v15, %s12186_s22  ;;  %7185 = vrot.lane.b32.xlu0 %v13438_v40, %s12186_s22  ;;  %v3615_v55 = vsel %vm13779_vm10, %v3480_v35, 0.0  ;;  %vm5259_vm5 = vcmp.gt.f32.partialorder %v5256_v56, 0.5 }
 0x1a1   : > { %11422 = vmatprep.subr.msk.mxu1 %vm902_vm3, %v3614_v10  ;;  %4178 = vmatprep.mubr.f32.mxu0 %v12180_v6  ;;  %vm13839_vm1 = vcmp.eq.s32.totalorder %v3578_v62, 1 }
 0x1a2   : > { %v3461_v50 = vpop.permute.xlu1 %3460  ;;  %11423 = vmatpush1.msk.msra.mxu1 %vm902_vm3, %v3613_v44  ;;  %v3459_v59 = vpop.permute.xlu0 %3458 }
 0x1a3   : > { %v3479_v4 = vsel %vm3472_vm13, %v3457_v37, %v3459_v59  ;;  %11424 = vmatmul.mubr.msk.f32.vlgmr.msra.gmra.mrb[4].mxu1 %vm898_vm7, %v13602_v52  ;;  %v3478_v5 = vsel %vm3472_vm13, %v3459_v59, %v3461_v50 }
 0x1a4   : > { %v3616_v20 = vsel %vm13774_vm9, %v3479_v4, 0.0  ;;  %7191 = vrot.lane.b32.xlu1 %v12567_v17, %s12186_s22  ;;  %7189 = vrot.lane.b32.xlu0 %v13471_v51, %s12186_s22  ;;  %v3617_v26 = vsel %vm13810_vm12, %v3478_v5, 0.0  ;;  %v13894_v4 = vld [vmem:[%s15270_s4 + $0x10] sm:$0xf] }
 0x1a5   : > { %11425 = vmatprep.subr.msk.mxu0 %vm902_vm3, %v3616_v20  ;;  %4249 = vmatprep.mubr.f32.mxu1 %v12180_v6  ;;  %v5255_v20 = vld [vmem:[#allocation9 + $0x64] sm:$0xff] }
 0x1a6   : > { %v3465_v60 = vpop.permute.xlu1 %3464  ;;  %11426 = vmatpush1.msk.msra.mxu0 %vm902_vm3, %v3615_v55  ;;  %v3463_v30 = vpop.permute.xlu0 %3462 }
 0x1a7   : > { %v3477_v1 = vsel %vm3472_vm13, %v3461_v50, %v3463_v30  ;;  %11427 = vmatmul.mubr.msk.f32.vlgmr.msra.gmra.mrb[6].mxu0 %vm898_vm7, %v13602_v52  ;;  %v3476_v41 = vsel %vm3472_vm13, %v3463_v30, %v3465_v60 }
 0x1a8   : > { %v3618_v12 = vsel %vm13799_vm11, %v3477_v1, 0.0  ;;  %7195 = vrot.lane.b32.xlu1 %v12578_v19, %s12186_s22  ;;  %7193 = vrot.lane.b32.xlu0 %v13507_v46, %s12186_s22  ;;  %v5257_v1 = vld [vmem:[#allocation9 + $0x74] sm:$0xf] }
 0x1a9   : > { %11428 = vmatprep.subr.msk.mxu1 %vm902_vm3, %v3618_v12  ;;  %4320 = vmatprep.mubr.f32.mxu0 %v12180_v6 }
 0x1aa   : > { %v3469_v43 = vpop.permute.xlu1 %3468  ;;  %11429 = vmatpush1.msk.msra.mxu1 %vm902_vm3, %v3617_v26  ;;  %v3467_v10 = vpop.permute.xlu0 %3466 }
 0x1ab   : > { %v3473_v18 = vsel %vm3472_vm13, %v3469_v43, %v13592_v57  ;;  %v3474_v44 = vsel %vm3472_vm13, %v3467_v10, %v3469_v43  ;;  %v3475_v45 = vsel %vm3472_vm13, %v3465_v60, %v3467_v10  ;;  %11430 = vmatmul.mubr.msk.f32.vlgmr.msra.gmra.mrb[6].mxu1 %vm898_vm7, %v13602_v52  ;;  %v3619_v57 = vsel %vm13844_vm0, %v3476_v41, 0.0 }
 0x1ac   : > { %v3622_v49 = vsel %vm13831_vm14, %v3473_v18, 0.0  ;;  %v3620_v35 = vsel %vm13835_vm15, %v3475_v45, 0.0  ;;  %v3621_v50 = vsel %vm13839_vm1, %v3474_v44, 0.0  ;;  %7199 = vrot.lane.b32.xlu1 %v12589_v21, %s12186_s22  ;;  %7197 = vrot.lane.b32.xlu0 %v13552_v42, %s12186_s22  ;;  %vm5258_vm13 = vcmp.gt.f32.partialorder %v5255_v20, 0.5 }
 0x1ad   : > { %11431 = vmatprep.subr.msk.mxu0 %vm902_vm3, %v3620_v35  ;;  %11434 = vmatprep.subr.msk.mxu1 %vm902_vm3, %v3622_v49  ;;  %v13945_v58 = vsel %vm5258_vm13, 1, %v12178_v0  ;;  %v14035_v10 = vsel %vm5259_vm5, 1, %v12178_v0  ;;  %vm5260_vm13 = vcmp.gt.f32.partialorder %v5257_v1, 0.5 }
 0x1ae   : > { %v13874_v48 = vpop.permute.xlu1 %5197  ;;  %11432 = vmatpush1.msk.msra.mxu0 %vm902_vm3, %v3619_v57  ;;  %11435 = vmatpush1.msk.msra.mxu1 %vm902_vm3, %v3621_v50  ;;  %v13878_v59 = vpop.permute.xlu0 %5195  ;;  %v5271_v61 = vrot.slane %v13945_v58, %v12647_v25  ;;  %v5279_v62 = vrot.slane %v13945_v58, %v12660_v29  ;;  %v5267_v5 = vrot.slane %v13945_v58, %v12658_v28 }
 0x1af   : > { %4391 = vmatprep.mubr.f32.mxu1 %v12180_v6  ;;  %11433 = vmatmul.mubr.msk.f32.vlgmr.msra.gmra.mrb[8].mxu0 %vm898_vm7, %v13602_v52  ;;  %v5251_v23 = vsel %vm5233_vm2, %v13878_v59, %v13874_v48  ;;  %v5275_v30 = vrot.slane %v13945_v58, %v12664_v33  ;;  %v5287_v26 = vrot.slane %v13945_v58, %v12675_v36 }
 0x1b0   : > { %11436 = vmatmul.mubr.msk.f32.vlgmr.msra.gmra.mrb[14].mxu1 %vm898_vm7, %v13602_v52  ;;  %7203 = vrot.lane.b32.xlu1 %v12511_v7, %s12186_s22  ;;  %vm13987_vm4 = vcmp.eq.s32.totalorder %v5271_v61, 1  ;;  %vm14000_vm6 = vcmp.eq.s32.totalorder %v5279_v62, 1  ;;  %vm14014_vm8 = vcmp.eq.s32.totalorder %v5267_v5, 1  ;;  %v5283_v34 = vrot.slane %v13945_v58, %v12677_v39 }
 0x1b1   : > { %7201 = vrot.lane.b32.xlu0 %v13577_v31, %s12186_s22  ;;  %11438 = vmatprep.subr.msk.mxu0 %vm902_vm3, %v12495_v3  ;;  %v5295_v37 = vrot.slane %v13945_v58, %v12698_v47  ;;  %v5365_v38 = vsel %vm13987_vm4, %v5251_v23, 0.0  ;;  %v5291_v43 = vrot.slane %v13945_v58, %v12710_v53  ;;  %vm14045_vm9 = vcmp.eq.s32.totalorder %v5275_v30, 1  ;;  %v14120_v30 = vld [vmem:[%s15270_s4 + $0x14] sm:$0xf] }
 0x1b2   : > { %11441 = vmatprep.subr.msk.mxu1 %vm902_vm3, %v12515_v8  ;;  %v13898_v22 = vpop.permute.xlu1 %5199  ;;  %11439 = vmatpush1.msk.msra.mxu0 %vm902_vm3, %v13638_v24  ;;  %v13902_v52 = vpop.permute.xlu0 %5193  ;;  %vm14060_vm10 = vcmp.eq.s32.totalorder %v5287_v26, 1  ;;  %vm14087_vm12 = vcmp.eq.s32.totalorder %v5283_v34, 1  ;;  %v5299_v62 = vrot.slane %v14035_v10, %v12658_v28  ;;  %v6241_v26 = vld [vmem:[#allocation9 + $0x78] sm:$0xff]  ;;  %v5315_v45 = vrot.slane %v14035_v10, %v12677_v39 }
 0x1b3   : > { %4527 = vmatprep.mubr.f32.mxu0 %v12180_v6  ;;  %11442 = vmatpush1.msk.msra.mxu1 %vm902_vm3, %v13607_v54  ;;  %v5252_v41 = vsel %vm5233_vm2, %v13902_v52, %v13878_v59  ;;  %v5250_v49 = vsel %vm5233_vm2, %v13874_v48, %v13898_v22  ;;  %vm14072_vm11 = vcmp.eq.s32.totalorder %v5295_v37, 1  ;;  %vm14091_vm14 = vcmp.eq.s32.totalorder %v5291_v43, 1 }
 0x1b4   : > { %4598 = vmatprep.mubr.f32.mxu1 %v12180_v6  ;;  %11440 = vmatmul.mubr.msk.f32.vlgmr.msra.gmra.mrb[16].mxu0 %vm898_vm7, %v13894_v4  ;;  %v5366_v20 = vsel %vm14045_vm9, %v5250_v49, 0.0  ;;  %vm14151_vm0 = vcmp.eq.s32.totalorder %v5299_v62, 1  ;;  %vm6244_vm4 = vcmp.gt.f32.partialorder %v6241_v26, 0.5  ;;  %vm14230_vm9 = vcmp.eq.s32.totalorder %v5315_v45, 1 }
 0x1b5   : > { %11443 = vmatmul.mubr.msk.f32.vlgmr.msra.gmra.mrb[0].mxu1 %vm898_vm7, %v13894_v4  ;;  %8155 = vrot.lane.b32.xlu1 %v13607_v54, %s12187_s16 }
 0x1b6   : > { %8153 = vrot.lane.b32.xlu0 %v12495_v3, %s12187_s16  ;;  %11444 = vmatprep.subr.msk.mxu0 %vm902_vm3, %v12523_v9  ;;  %v13918_v63 = vpop.permute.xlu1 %5203  ;;  %v13920_v55 = vpop.permute.xlu0 %5201 }
 0x1b7   : > { %11447 = vmatprep.subr.msk.mxu1 %vm902_vm3, %v12534_v11  ;;  %11445 = vmatpush1.msk.msra.mxu0 %vm902_vm3, %v13672_v2  ;;  %v5249_v12 = vsel %vm5233_vm2, %v13898_v22, %v13920_v55  ;;  %v5303_v22 = vrot.slane %v14035_v10, %v12647_v25  ;;  %v5248_v60 = vsel %vm5233_vm2, %v13920_v55, %v13918_v63 }
 0x1b8   : > { %4669 = vmatprep.mubr.f32.mxu0 %v12180_v6  ;;  %11448 = vmatpush1.msk.msra.mxu1 %vm902_vm3, %v13704_v14  ;;  %v5367_v35 = vsel %vm14000_vm6, %v5249_v12, 0.0  ;;  %v5319_v12 = vrot.slane %v14035_v10, %v12675_v36  ;;  %v5368_v32 = vsel %vm14087_vm12, %v5248_v60, 0.0 }
 0x1b9   : > { %4740 = vmatprep.mubr.f32.mxu1 %v12180_v6  ;;  %11446 = vmatmul.mubr.msk.f32.vlgmr.msra.gmra.mrb[2].mxu0 %vm898_vm7, %v13894_v4  ;;  %vm14139_vm1 = vcmp.eq.s32.totalorder %v5303_v22, 1 }
 0x1ba   : > { %11449 = vmatmul.mubr.msk.f32.vlgmr.msra.gmra.mrb[2].mxu1 %vm898_vm7, %v13894_v4  ;;  %8157 = vrot.lane.b32.xlu1 %v12515_v8, %s12187_s16  ;;  %v13936_v3 = vpop.permute.xlu1 %5207  ;;  %v13938_v54 = vpop.permute.xlu0 %5205  ;;  %vm14182_vm5 = vcmp.eq.s32.totalorder %v5319_v12, 1 }
 0x1bb   : > { %8151 = vrot.lane.b32.xlu0 %v13638_v24, %s12187_s16  ;;  %11450 = vmatprep.subr.msk.mxu0 %vm902_vm3, %v12545_v13  ;;  %v5247_v57 = vsel %vm5233_vm2, %v13918_v63, %v13938_v54  ;;  %v5246_v63 = vsel %vm5233_vm2, %v13938_v54, %v13936_v3 }
 0x1bc   : > { %11453 = vmatprep.subr.msk.mxu1 %vm902_vm3, %v12556_v15  ;;  %11451 = vmatpush1.msk.msra.mxu0 %vm902_vm3, %v13736_v16  ;;  %v5369_v23 = vsel %vm14060_vm10, %v5247_v57, 0.0  ;;  %v5370_v43 = vsel %vm14091_vm14, %v5246_v63, 0.0  ;;  %vm6219_vm14 = vcmp.lt.s32.totalorder %v12656_v27, 113 }
 0x1bd   : > { %4811 = vmatprep.mubr.f32.mxu0 %v12180_v6  ;;  %11454 = vmatpush1.msk.msra.mxu1 %vm902_vm3, %v13438_v40 }
 0x1be   : > { %4882 = vmatprep.mubr.f32.mxu1 %v12180_v6  ;;  %11452 = vmatmul.mubr.msk.f32.vlgmr.msra.gmra.mrb[4].mxu0 %vm898_vm7, %v13894_v4  ;;  %v13957_v8 = vpop.permute.xlu1 %5211  ;;  %v13959_v24 = vpop.permute.xlu0 %5209 }
 0x1bf   : > { %11455 = vmatmul.mubr.msk.f32.vlgmr.msra.gmra.mrb[4].mxu1 %vm898_vm7, %v13894_v4  ;;  %8161 = vrot.lane.b32.xlu1 %v12523_v9, %s12187_s16  ;;  %v5245_v59 = vsel %vm5233_vm2, %v13936_v3, %v13959_v24  ;;  %v5307_v3 = vrot.slane %v14035_v10, %v12664_v33 }
 0x1c0   : > { %8159 = vrot.lane.b32.xlu0 %v13672_v2, %s12187_s16  ;;  %11456 = vmatprep.subr.msk.mxu0 %vm902_vm3, %v12567_v17  ;;  %v5371_v55 = vsel %vm14072_vm11, %v5245_v59, 0.0  ;;  %v14218_v59 = vsel %vm6244_vm4, 1, %v12178_v0 }
 0x1c1   : > { %11459 = vmatprep.subr.msk.mxu1 %vm902_vm3, %v12578_v19  ;;  %11457 = vmatpush1.msk.msra.mxu0 %vm902_vm3, %v13471_v51  ;;  %vm14190_vm6 = vcmp.eq.s32.totalorder %v5307_v3, 1  ;;  %v6257_v1 = vrot.slane %v14218_v59, %v12647_v25  ;;  %v6273_v50 = vrot.slane %v14218_v59, %v12675_v36  ;;  %v6269_v48 = vrot.slane %v14218_v59, %v12677_v39 }
 0x1c2   : > { %11460 = vmatpush1.msk.msra.mxu1 %vm902_vm3, %v13507_v46  ;;  %4953 = vmatprep.mubr.f32.mxu0 %v12180_v6  ;;  %v13983_v9 = vpop.permute.xlu1 %5215  ;;  %v13985_v2 = vpop.permute.xlu0 %5213 }
 0x1c3   : > { %5024 = vmatprep.mubr.f32.mxu1 %v12180_v6  ;;  %11462 = vmatprep.subr.msk.mxu0 %vm902_vm3, %v12589_v21 }
 0x1c4   : > { %11465 = vmatprep.subr.msk.mxu1 %vm902_vm3, %v12511_v7  ;;  %11458 = vmatmul.mubr.msk.f32.vlgmr.msra.gmra.mrb[6].mxu0 %vm898_vm7, %v13894_v4 }
 0x1c5   : > { %11461 = vmatmul.mubr.msk.f32.vlgmr.msra.gmra.mrb[6].mxu1 %vm898_vm7, %v13894_v4  ;;  %11463 = vmatpush1.msk.msra.mxu0 %vm902_vm3, %v13552_v42 }
 0x1c6   : > { %11466 = vmatpush1.msk.msra.mxu1 %vm902_vm3, %v13577_v31  ;;  %8165 = vrot.lane.b32.xlu1 %v12534_v11, %s12187_s16  ;;  %v14041_v18 = vpop.permute.xlu1 %5219  ;;  %v14043_v44 = vpop.permute.xlu0 %5217  ;;  %v5311_v11 = vrot.slane %v14035_v10, %v12660_v29 }
 0x1c7   : > { %8163 = vrot.lane.b32.xlu0 %v13704_v14, %s12187_s16  ;;  %11469 = vmatprep.subr.msk.mxu0 %vm902_vm3, %v5365_v38  ;;  %v5364_v14 = vsel %vm14014_vm8, %v5252_v41, 0.0  ;;  %v5327_v38 = vrot.slane %v14035_v10, %v12698_v47  ;;  %v5240_v60 = vsel %vm5233_vm2, %v14043_v44, %v14041_v18 }
 0x1c8   : > { %11472 = vmatprep.subr.msk.mxu1 %vm902_vm3, %v5367_v35  ;;  %5095 = vmatprep.mubr.f32.mxu0 %v12180_v6  ;;  %vm14113_vm15 = vcmp.eq.s32.totalorder %v5311_v11, 1  ;;  %v5244_v35 = vsel %vm5233_vm2, %v13959_v24, %v13957_v8  ;;  %v5263_v24 = vsel %vm5260_vm13, 1, %v12178_v0  ;;  %v5376_v3 = vsel %vm14230_vm9, %v5240_v60, 0.0 }
 0x1c9   : > { %5166 = vmatprep.mubr.f32.mxu1 %v12180_v6  ;;  %11464 = vmatmul.mubr.msk.f32.vlgmr.msra.gmra.mrb[8].mxu0 %vm898_vm7, %v13894_v4  ;;  %vm14207_vm8 = vcmp.eq.s32.totalorder %v5327_v38, 1  ;;  %v5372_v22 = vsel %vm14151_vm0, %v5244_v35, 0.0  ;;  %v5343_v58 = vrot.slane %v5263_v24, %v12660_v29  ;;  %v6261_v35 = vrot.slane %v14218_v59, %v12664_v33 }
 0x1ca   : > { %11467 = vmatmul.mubr.msk.f32.vlgmr.msra.gmra.mrb[16].mxu1 %vm898_vm7, %v13894_v4  ;;  %11470 = vmatpush1.msk.msra.mxu0 %vm902_vm3, %v5364_v14  ;;  %v14100_v56 = vpop.permute.xlu1 %5223  ;;  %v14102_v5 = vpop.permute.xlu0 %5221  ;;  %v5339_v4 = vrot.slane %v5263_v24, %v12664_v33 }
 0x1cb   : > { %11473 = vmatpush1.msk.msra.mxu1 %vm902_vm3, %v5366_v20  ;;  %8169 = vrot.lane.b32.xlu1 %v12545_v13, %s12187_s16  ;;  %v5241_v13 = vsel %vm5233_vm2, %v13983_v9, %v14043_v44  ;;  %v5239_v57 = vsel %vm5233_vm2, %v14041_v18, %v14102_v5  ;;  %v5331_v18 = vrot.slane %v5263_v24, %v12658_v28  ;;  %vm14270_vm12 = vcmp.eq.s32.totalorder %v5343_v58, 1 }
 0x1cc   : > { %8167 = vrot.lane.b32.xlu0 %v13736_v16, %s12187_s16  ;;  %11475 = vmatprep.subr.msk.mxu0 %vm902_vm3, %v5369_v23  ;;  %v5243_v16 = vsel %vm5233_vm2, %v13957_v8, %v13985_v2  ;;  %v5375_v49 = vsel %vm14113_vm15, %v5241_v13, 0.0  ;;  %v5242_v8 = vsel %vm5233_vm2, %v13985_v2, %v13983_v9  ;;  %v5335_v2 = vrot.slane %v5263_v24, %v12647_v25 }
 0x1cd   : > { %11478 = vmatprep.subr.msk.mxu1 %vm902_vm3, %v5371_v55  ;;  %5513 = vmatprep.mubr.f32.mxu0 %v12180_v6  ;;  %v5373_v11 = vsel %vm14139_vm1, %v5243_v16, 0.0  ;;  %v5377_v20 = vsel %vm14182_vm5, %v5239_v57, 0.0  ;;  %v5374_v61 = vsel %vm14190_vm6, %v5242_v8, 0.0  ;;  %v5238_v12 = vsel %vm5233_vm2, %v14102_v5, %v14100_v56  ;;  %v6242_v8 = vld [vmem:[#allocation9 + $0x80] sm:$0xff] }
 0x1ce   : > { %5584 = vmatprep.mubr.f32.mxu1 %v12180_v6  ;;  %11471 = vmatmul.mubr.msk.f32.vlgmr.msra.gmra.mrb[18].mxu0 %vm898_vm7, %v14120_v30  ;;  %v14158_v37 = vpop.permute.xlu1 %5227  ;;  %v14162_v41 = vpop.permute.xlu0 %5225  ;;  %vm14257_vm11 = vcmp.eq.s32.totalorder %v5335_v2, 1  ;;  %vm14288_vm15 = vcmp.eq.s32.totalorder %v5339_v4, 1  ;;  %vm14294_vm1 = vcmp.eq.s32.totalorder %v6257_v1, 1  ;;  %v6265_v16 = vrot.slane %v14218_v59, %v12660_v29  ;;  %v14400_v4 = vld [vmem:[%s15270_s4 + $0x18] sm:$0xf] }
 0x1cf   : > { %11474 = vmatmul.mubr.msk.f32.vlgmr.msra.gmra.mrb[0].mxu1 %vm898_vm7, %v14120_v30  ;;  %11476 = vmatpush1.msk.msra.mxu0 %vm902_vm3, %v5368_v32  ;;  %vm14314_vm0 = vcmp.eq.s32.totalorder %v5331_v18, 1  ;;  %vm6245_vm4 = vcmp.gt.f32.partialorder %v6242_v8, 0.5  ;;  %vm14367_vm5 = vcmp.eq.s32.totalorder %v6261_v35, 1  ;;  %vm14375_vm6 = vcmp.eq.s32.totalorder %v6273_v50, 1  ;;  %v6243_v50 = vld [vmem:[#allocation9 + $0x88] sm:$0xf] }
 0x1d0   : > { %11479 = vmatpush1.msk.msra.mxu1 %vm902_vm3, %v5370_v43  ;;  %8173 = vrot.lane.b32.xlu1 %v12556_v15, %s12187_s16  ;;  %v5323_v15 = vrot.slane %v14035_v10, %v12710_v53 }
 0x1d1   : > { %8171 = vrot.lane.b32.xlu0 %v13438_v40, %s12187_s16  ;;  %11481 = vmatprep.subr.msk.mxu0 %vm902_vm3, %v5373_v11  ;;  %v5237_v40 = vsel %vm5233_vm2, %v14100_v56, %v14162_v41  ;;  %v6253_v56 = vrot.slane %v14218_v59, %v12658_v28 }
 0x1d2   : > { %11484 = vmatprep.subr.msk.mxu1 %vm902_vm3, %v5375_v49  ;;  %5655 = vmatprep.mubr.f32.mxu0 %v12180_v6  ;;  %v5232_v9 = vpop.permute.xlu1 %5231  ;;  %v5230_v10 = vpop.permute.xlu0 %5229  ;;  %v5379_v23 = vsel %vm14207_vm8, %v5237_v40, 0.0  ;;  %vm14249_vm10 = vcmp.eq.s32.totalorder %v5323_v15, 1  ;;  %vm14388_vm8 = vcmp.eq.s32.totalorder %v6269_v48, 1  ;;  %v11072_v49 = vld [vmem:[%s15273_s7] sm:$0xf] }
 0x1d3   : > { %5726 = vmatprep.mubr.f32.mxu1 %v12180_v6  ;;  %11477 = vmatmul.mubr.msk.f32.vlgmr.msra.gmra.mrb[2].mxu0 %vm898_vm7, %v14120_v30  ;;  %v5235_v44 = vsel %vm5233_vm2, %v14158_v37, %v5230_v10  ;;  %v5253_v26 = vsel %vm5233_vm2, %v5232_v9, %v13902_v52  ;;  %v5378_v32 = vsel %vm14249_vm10, %v5238_v12, 0.0  ;;  %v5234_v34 = vsel %vm5233_vm2, %v5230_v10, %v5232_v9 }
 0x1d4   : > { %11480 = vmatmul.mubr.msk.f32.vlgmr.msra.gmra.mrb[2].mxu1 %vm898_vm7, %v14120_v30  ;;  %11482 = vmatpush1.msk.msra.mxu0 %vm902_vm3, %v5372_v22  ;;  %v5381_v5 = vsel %vm14257_vm11, %v5235_v44, 0.0  ;;  %vm14328_vm13 = vcmp.eq.s32.totalorder %v6253_v56, 1 }
 0x1d5   : > { %11485 = vmatpush1.msk.msra.mxu1 %vm902_vm3, %v5374_v61  ;;  %8177 = vrot.lane.b32.xlu1 %v12567_v17, %s12187_s16  ;;  %v6277_v61 = vrot.slane %v14218_v59, %v12710_v53 }
 0x1d6   : > { %8175 = vrot.lane.b32.xlu0 %v13471_v51, %s12187_s16  ;;  %11487 = vmatprep.subr.msk.mxu0 %vm902_vm3, %v5377_v20  ;;  %v6184_v55 = vpop.permute.xlu1 %6183  ;;  %v6182_v13 = vpop.permute.xlu0 %6181  ;;  %v6281_v20 = vrot.slane %v14218_v59, %v12698_v47  ;;  %v14404_v59 = vsel %vm6245_vm4, 1, %v12178_v0 }
 0x1d7   : > { %5797 = vmatprep.mubr.f32.mxu0 %v12180_v6  ;;  %5868 = vmatprep.mubr.f32.mxu1 %v12180_v6  ;;  %v6237_v38 = vsel %vm6219_vm14, %v6182_v13, %v6184_v55  ;;  %v6289_v17 = vrot.slane %v14404_v59, %v12647_v25  ;;  %vm14425_vm10 = vcmp.eq.s32.totalorder %v6277_v61, 1  ;;  %v6285_v12 = vrot.slane %v14404_v59, %v12658_v28 }
 0x1d8   : > { %11483 = vmatmul.mubr.msk.f32.vlgmr.msra.gmra.mrb[4].mxu0 %vm898_vm7, %v14120_v30  ;;  %11490 = vmatprep.subr.msk.mxu1 %vm902_vm3, %v5379_v23  ;;  %vm14415_vm9 = vcmp.eq.s32.totalorder %v6281_v20, 1  ;;  %v6305_v11 = vrot.slane %v14404_v59, %v12675_v36  ;;  %v6301_v8 = vrot.slane %v14404_v59, %v12677_v39  ;;  %v6313_v2 = vrot.slane %v14404_v59, %v12698_v47 }
 0x1d9   : > { %11488 = vmatpush1.msk.msra.mxu0 %vm902_vm3, %v5376_v3  ;;  %8181 = vrot.lane.b32.xlu1 %v12578_v19, %s12187_s16  ;;  %v5383_v19 = vsel %vm14270_vm12, %v5253_v26, 0.0  ;;  %v9137_v3 = vld [vmem:[%s15271_s5] sm:$0xf]  ;;  %vm14450_vm11 = vcmp.eq.s32.totalorder %v6289_v17, 1  ;;  %vm14457_vm12 = vcmp.eq.s32.totalorder %v6285_v12, 1 }
 0x1da   : > { %8179 = vrot.lane.b32.xlu0 %v13507_v46, %s12187_s16  ;;  %11486 = vmatmul.mubr.msk.f32.vlgmr.msra.gmra.mrb[4].mxu1 %vm898_vm7, %v14120_v30  ;;  %v6186_v43 = vpop.permute.xlu1 %6185  ;;  %v14312_v45 = vpop.permute.xlu0 %6179  ;;  %v5236_v46 = vsel %vm5233_vm2, %v14162_v41, %v14158_v37  ;;  %v5382_v37 = vsel %vm14288_vm15, %v5234_v34, 0.0  ;;  %v6351_v41 = vsel %vm14294_vm1, %v6237_v38, 0.0  ;;  %vm14344_vm2 = vcmp.eq.s32.totalorder %v6265_v16, 1 }
 0x1db   : > { %11491 = vmatpush1.msk.msra.mxu1 %vm902_vm3, %v5378_v32  ;;  %5939 = vmatprep.mubr.f32.mxu0 %v12180_v6  ;;  %v6238_v57 = vsel %vm6219_vm14, %v14312_v45, %v6182_v13  ;;  %v5380_v15 = vsel %vm14314_vm0, %v5236_v46, 0.0  ;;  %v6236_v10 = vsel %vm6219_vm14, %v6184_v55, %v6186_v43  ;;  %vm6246_vm0 = vcmp.gt.f32.partialorder %v6243_v50, 0.5 }
 0x1dc   : > { %6010 = vmatprep.mubr.f32.mxu1 %v12180_v6  ;;  %11493 = vmatprep.subr.msk.mxu0 %vm902_vm3, %v5381_v5  ;;  %v6352_v1 = vsel %vm14367_vm5, %v6236_v10, 0.0  ;;  %v6297_v5 = vrot.slane %v14404_v59, %v12660_v29  ;;  %v6249_v60 = vsel %vm6246_vm0, 1, %v12178_v0  ;;  %vm14534_vm5 = vcmp.eq.s32.totalorder %v6313_v2, 1 }
 0x1dd   : > { %8185 = vrot.lane.b32.xlu1 %v12589_v21, %s12187_s16  ;;  %11496 = vmatprep.subr.msk.mxu1 %vm902_vm3, %v5383_v19  ;;  %v6293_v19 = vrot.slane %v14404_v59, %v12664_v33  ;;  %v6325_v18 = vrot.slane %v6249_v60, %v12664_v33 }
 0x1de   : > { %8183 = vrot.lane.b32.xlu0 %v13552_v42, %s12187_s16  ;;  %11489 = vmatmul.mubr.msk.f32.vlgmr.msra.gmra.mrb[6].mxu0 %vm898_vm7, %v14120_v30  ;;  %v6190_v21 = vpop.permute.xlu1 %6189  ;;  %v6188_v24 = vpop.permute.xlu0 %6187  ;;  %v6350_v42 = vsel %vm14328_vm13, %v6238_v57, 0.0  ;;  %vm14481_vm15 = vcmp.eq.s32.totalorder %v6297_v5, 1  ;;  %vm14507_vm13 = vcmp.eq.s32.totalorder %v6305_v11, 1 }
 0x1df   : > { %11492 = vmatmul.mubr.msk.f32.vlgmr.msra.gmra.mrb[6].mxu1 %vm898_vm7, %v14120_v30  ;;  %11494 = vmatpush1.msk.msra.mxu0 %vm902_vm3, %v5380_v15  ;;  %v6235_v40 = vsel %vm6219_vm14, %v6186_v43, %v6188_v24  ;;  %v6234_v23 = vsel %vm6219_vm14, %v6188_v24, %v6190_v21  ;;  %vm14488_vm1 = vcmp.eq.s32.totalorder %v6293_v19, 1 }
 0x1e0   : > { %11497 = vmatpush1.msk.msra.mxu1 %vm902_vm3, %v5382_v37  ;;  %11500 = vmatprep.subr.msk.mxu0 %vm902_vm3, %v6351_v41  ;;  %v6353_v9 = vsel %vm14344_vm2, %v6235_v40, 0.0  ;;  %v7227_v40 = vld [vmem:[#allocation9 + $0x8c] sm:$0xff]  ;;  %vm14513_vm2 = vcmp.eq.s32.totalorder %v6301_v8, 1 }
 0x1e1   : > { %6081 = vmatprep.mubr.f32.mxu0 %v12180_v6  ;;  %6152 = vmatprep.mubr.f32.mxu1 %v12180_v6  ;;  %vm7230_vm4 = vcmp.gt.f32.partialorder %v7227_v40, 0.5 }
 0x1e2   : > { %8187 = vrot.lane.b32.xlu0 %v13577_v31, %s12187_s16  ;;  %11495 = vmatmul.mubr.msk.f32.vlgmr.msra.gmra.mrb[8].mxu0 %vm898_vm7, %v14120_v30  ;;  %v6194_v58 = vpop.permute.xlu1 %6193  ;;  %v6192_v62 = vpop.permute.xlu0 %6191  ;;  %v14549_v12 = vsel %vm7230_vm4, 1, %v12178_v0 }
 0x1e3   : > { %11501 = vmatpush1.msk.msra.mxu0 %vm902_vm3, %v6350_v42  ;;  %11503 = vmatprep.subr.msk.mxu1 %vm902_vm3, %v6353_v9  ;;  %v6233_v31 = vsel %vm6219_vm14, %v6190_v21, %v6192_v62  ;;  %v6232_v55 = vsel %vm6219_vm14, %v6192_v62, %v6194_v58  ;;  %v7243_v5 = vrot.slane %v14549_v12, %v12647_v25 }
 0x1e4   : > { %11498 = vmatmul.mubr.msk.f32.vlgmr.msra.gmra.mrb[18].mxu1 %vm898_vm7, %v14120_v30  ;;  %v6355_v63 = vsel %vm14375_vm6, %v6233_v31, 0.0  ;;  %6499 = vmatprep.mubr.f32.mxu0 %v12180_v6  ;;  %v6354_v30 = vsel %vm14388_vm8, %v6234_v23, 0.0  ;;  %v6356_v56 = vsel %vm14425_vm10, %v6232_v55, 0.0  ;;  %v6329_v31 = vrot.slane %v6249_v60, %v12660_v29 }
 0x1e5   : > { %11504 = vmatpush1.msk.msra.mxu1 %vm902_vm3, %v6352_v1  ;;  %11506 = vmatprep.subr.msk.mxu0 %vm902_vm3, %v6355_v63  ;;  %v6321_v63 = vrot.slane %v6249_v60, %v12647_v25  ;;  %v6317_v55 = vrot.slane %v6249_v60, %v12658_v28  ;;  %vm14569_vm10 = vcmp.eq.s32.totalorder %v6325_v18, 1  ;;  %v7239_v11 = vrot.slane %v14549_v12, %v12658_v28 }
 0x1e6   : > { %8189 = vrot.lane.b32.xlu0 %v12511_v7, %s12187_s16  ;;  %v6198_v13 = vpop.permute.xlu1 %6197  ;;  %11502 = vmatmul.mubr.msk.f32.vlgmr.msra.gmra.mrb[20].mxu0 %vm898_vm7, %v14400_v4  ;;  %v6196_v51 = vpop.permute.xlu0 %6195  ;;  %vm14557_vm8 = vcmp.eq.s32.totalorder %v6329_v31, 1  ;;  %v7247_v8 = vrot.slane %v14549_v12, %v12664_v33  ;;  %v7259_v40 = vrot.slane %v14549_v12, %v12675_v36  ;;  %v7267_v60 = vrot.slane %v14549_v12, %v12698_v47  ;;  %s11675_s16 = sshll.u32 %s15589_s25, 10 }
 0x1e7   : > { %11507 = vmatpush1.msk.msra.mxu0 %vm902_vm3, %v6354_v30  ;;  %v6231_v7 = vsel %vm6219_vm14, %v6194_v58, %v6196_v51  ;;  %6570 = vmatprep.mubr.f32.mxu1 %v12180_v6  ;;  %v6230_v16 = vsel %vm6219_vm14, %v6196_v51, %v6198_v13  ;;  %v6309_v58 = vrot.slane %v14404_v59, %v12710_v53  ;;  %s15216_s26 = scalar_lea.hbm %s15591_s23, %s11675_s16 }
 0x1e8   : > { %v6357_v26 = vsel %vm14415_vm9, %v6231_v7, 0.0  ;;  %11505 = vmatmul.mubr.msk.f32.vlgmr.msra.gmra.mrb[0].mxu1 %vm898_vm7, %v14400_v4  ;;  %6641 = vmatprep.mubr.f32.mxu0 %v12180_v6  ;;  %v6358_v46 = vsel %vm14457_vm12, %v6230_v16, 0.0  ;;  %vm14565_vm9 = vcmp.eq.s32.totalorder %v6321_v63, 1  ;;  %vm7205_vm12 = vcmp.lt.s32.totalorder %v12656_v27, 112 }
 0x1e9   : > { %11509 = vmatprep.subr.msk.mxu1 %vm902_vm3, %v6357_v26  ;;  %6712 = vmatprep.mubr.f32.mxu1 %v12180_v6  ;;  %vm14540_vm6 = vcmp.eq.s32.totalorder %v6309_v58, 1  ;;  %vm14633_vm0 = vcmp.eq.s32.totalorder %v7247_v8, 1  ;;  %v7263_v1 = vrot.slane %v14549_v12, %v12710_v53 }
 0x1ea   : > { %v6202_v32 = vpop.permute.xlu1 %6201  ;;  %11510 = vmatpush1.msk.msra.mxu1 %vm902_vm3, %v6356_v56  ;;  %v6200_v34 = vpop.permute.xlu0 %6199  ;;  %11508 = vmatmul.mubr.msk.f32.vlgmr.msra.gmra.mrb[2].mxu0 %vm898_vm7, %v14400_v4 }
 0x1eb   : > { %v6229_v38 = vsel %vm6219_vm14, %v6198_v13, %v6200_v34  ;;  %6783 = vmatprep.mubr.f32.mxu0 %v12180_v6  ;;  %9140 = vperm.xlu1 %11940, %v9137_v3   ;;  %v6228_v57 = vsel %vm6219_vm14, %v6200_v34, %v6202_v32 }
 0x1ec   : > { %v6359_v43 = vsel %vm14450_vm11, %v6229_v38, 0.0  ;;  %11511 = vmatmul.mubr.msk.f32.vlgmr.msra.gmra.mrb[2].mxu1 %vm898_vm7, %v14400_v4  ;;  %v6360_v42 = vsel %vm14488_vm1, %v6228_v57, 0.0  ;;  %vm14575_vm11 = vcmp.eq.s32.totalorder %v6317_v55, 1 }
 0x1ed   : > { %11512 = vmatprep.subr.msk.mxu0 %vm902_vm3, %v6359_v43  ;;  %6854 = vmatprep.mubr.f32.mxu1 %v12180_v6  ;;  %v1029_v37 = vpop.f32.mrb[0].mxu0 }
 0x1ee   : > { %v6206_v14 = vpop.permute.xlu1 %6205  ;;  %11513 = vmatpush1.msk.msra.mxu0 %vm902_vm3, %v6358_v46  ;;  %v6204_v15 = vpop.permute.xlu0 %6203 }
 0x1ef   : > { %v6227_v21 = vsel %vm6219_vm14, %v6202_v32, %v6204_v15  ;;  %11514 = vmatmul.mubr.msk.f32.vlgmr.msra.gmra.mrb[4].mxu0 %vm898_vm7, %v14400_v4  ;;  %v1031_v24 = vpop.f32.mrb[1].mxu0  ;;  %11075 = vperm.xlu1 %11940, %v11072_v49   ;;  %v6226_v22 = vsel %vm6219_vm14, %v6204_v15, %v6206_v14 }
 0x1f0   : > { %v6361_v48 = vsel %vm14481_vm15, %v6227_v21, 0.0  ;;  %6925 = vmatprep.mubr.f32.mxu0 %v12180_v6  ;;  %v6362_v59 = vsel %vm14513_vm2, %v6226_v22, 0.0  ;;  %vm7316_vm15 = vcmp.eq.s32.totalorder %v7239_v11, 1  ;;  %v14628_v24 = vld [vmem:[%s15270_s4 + $0x1c] sm:$0xf]  ;;  %v7255_v22 = vrot.slane %v14549_v12, %v12677_v39 }
 0x1f1   : > { %11515 = vmatprep.subr.msk.mxu1 %vm902_vm3, %v6361_v48  ;;  %vm7321_vm2 = vcmp.eq.s32.totalorder %v7259_v40, 1 }
 0x1f2   : > { %v6210_v20 = vpop.permute.xlu1 %6209  ;;  %11516 = vmatpush1.msk.msra.mxu1 %vm902_vm3, %v6360_v42  ;;  %v6208_v61 = vpop.permute.xlu0 %6207  ;;  %v7228_v42 = vld [vmem:[#allocation9 + $0x94] sm:$0xff]  ;;  %vm14651_vm4 = vcmp.eq.s32.totalorder %v7255_v22, 1 }
 0x1f3   : > { %v6225_v62 = vsel %vm6219_vm14, %v6206_v14, %v6208_v61  ;;  %11517 = vmatmul.mubr.msk.f32.vlgmr.msra.gmra.mrb[4].mxu1 %vm898_vm7, %v14400_v4  ;;  %v6224_v30 = vsel %vm6219_vm14, %v6208_v61, %v6210_v20  ;;  %v7251_v14 = vrot.slane %v14549_v12, %v12660_v29 }
 0x1f4   : > { %v6363_v23 = vsel %vm14507_vm13, %v6225_v62, 0.0  ;;  %6996 = vmatprep.mubr.f32.mxu1 %v12180_v6  ;;  %v6364_v3 = vsel %vm14540_vm6, %v6224_v30, 0.0  ;;  %vm7231_vm13 = vcmp.gt.f32.partialorder %v7228_v42, 0.5  ;;  %vm14677_vm6 = vcmp.eq.s32.totalorder %v7263_v1, 1 }
 0x1f5   : > { %11518 = vmatprep.subr.msk.mxu0 %vm902_vm3, %v6363_v23  ;;  %vm7319_vm1 = vcmp.eq.s32.totalorder %v7251_v14, 1  ;;  %v14663_v17 = vsel %vm7231_vm13, 1, %v12178_v0 }
 0x1f6   : > { %v6214_v44 = vpop.permute.xlu1 %6213  ;;  %11519 = vmatpush1.msk.msra.mxu0 %vm902_vm3, %v6362_v59  ;;  %v6212_v13 = vpop.permute.xlu0 %6211  ;;  %v7271_v26 = vrot.slane %v14663_v17, %v12658_v28 }
 0x1f7   : > { %v6223_v51 = vsel %vm6219_vm14, %v6210_v20, %v6212_v13  ;;  %11520 = vmatmul.mubr.msk.f32.vlgmr.msra.gmra.mrb[6].mxu0 %vm898_vm7, %v14400_v4  ;;  %v6222_v16 = vsel %vm6219_vm14, %v6212_v13, %v6214_v44  ;;  %v7275_v13 = vrot.slane %v14663_v17, %v12647_v25 }
 0x1f8   : > { %v6365_v7 = vsel %vm14534_vm5, %v6223_v51, 0.0  ;;  %7067 = vmatprep.mubr.f32.mxu0 %v12180_v6  ;;  %vm14671_vm5 = vcmp.eq.s32.totalorder %v7267_v60, 1  ;;  %v8213_v60 = vld [vmem:[#allocation9 + $0xa0] sm:$0xff] }
 0x1f9   : > { %11521 = vmatprep.subr.msk.mxu1 %vm902_vm3, %v6365_v7  ;;  %vm8216_vm13 = vcmp.gt.f32.partialorder %v8213_v60, 0.5 }
 0x1fa   : > { %v6218_v32 = vpop.permute.xlu1 %6217  ;;  %11522 = vmatpush1.msk.msra.mxu1 %vm902_vm3, %v6364_v3  ;;  %v6216_v19 = vpop.permute.xlu0 %6215 }
 0x1fb   : > { %v6239_v34 = vsel %vm6219_vm14, %v6218_v32, %v14312_v45  ;;  %v6220_v38 = vsel %vm6219_vm14, %v6216_v19, %v6218_v32  ;;  %v6221_v43 = vsel %vm6219_vm14, %v6214_v44, %v6216_v19  ;;  %11523 = vmatmul.mubr.msk.f32.vlgmr.msra.gmra.mrb[6].mxu1 %vm898_vm7, %v14400_v4  ;;  %v6366_v45 = vsel %vm14575_vm11, %v6222_v16, 0.0 }
 0x1fc   : > { %v6369_v49 = vsel %vm14557_vm8, %v6239_v34, 0.0  ;;  %v6367_v46 = vsel %vm14565_vm9, %v6221_v43, 0.0  ;;  %v6368_v35 = vsel %vm14569_vm10, %v6220_v38, 0.0  ;;  %7138 = vmatprep.mubr.f32.mxu1 %v12180_v6  ;;  %vm7317_vm14 = vcmp.eq.s32.totalorder %v7243_v5, 1 }
 0x1fd   : > { %11524 = vmatprep.subr.msk.mxu0 %vm902_vm3, %v6367_v46  ;;  %11527 = vmatprep.subr.msk.mxu1 %vm902_vm3, %v6369_v49  ;;  %vm14696_vm8 = vcmp.eq.s32.totalorder %v7275_v13, 1  ;;  %v7283_v19 = vrot.slane %v14663_v17, %v12660_v29  ;;  %vm14702_vm9 = vcmp.eq.s32.totalorder %v7271_v26, 1  ;;  %v7279_v46 = vrot.slane %v14663_v17, %v12664_v33 }
 0x1fe   : > { %v7170_v50 = vpop.permute.xlu1 %7169  ;;  %11525 = vmatpush1.msk.msra.mxu0 %vm902_vm3, %v6366_v45  ;;  %11528 = vmatpush1.msk.msra.mxu1 %vm902_vm3, %v6368_v35  ;;  %v7168_v37 = vpop.permute.xlu0 %7167 }
 0x1ff   : > { %v7223_v41 = vsel %vm7205_vm12, %v7168_v37, %v7170_v50  ;;  %11526 = vmatmul.mubr.msk.f32.vlgmr.msra.gmra.mrb[8].mxu0 %vm898_vm7, %v14400_v4  ;;  %11529 = vmatmul.mubr.msk.f32.vlgmr.msra.gmra.mrb[20].mxu1 %vm898_vm7, %v14400_v4  ;;  %vm7327_vm10 = vcmp.eq.s32.totalorder %v7283_v19, 1  ;;  %vm14723_vm11 = vcmp.eq.s32.totalorder %v7279_v46, 1 }
 0x200   : > { %v7337_v57 = vsel %vm7317_vm14, %v7223_v41, 0.0  ;;  %7485 = vmatprep.mubr.f32.mxu0 %v12180_v6  ;;  %7556 = vmatprep.mubr.f32.mxu1 %v12180_v6  ;;  %v7291_v41 = vrot.slane %v14663_v17, %v12675_v36 }
 0x201   : > { %11531 = vmatprep.subr.msk.mxu0 %vm902_vm3, %v7337_v57 }
 0x202   : > { %v7172_v15 = vpop.permute.xlu1 %7171  ;;  %v14620_v21 = vpop.permute.xlu0 %7165  ;;  %vm14740_vm14 = vcmp.eq.s32.totalorder %v7291_v41, 1 }
 0x203   : > { %v7224_v4 = vsel %vm7205_vm12, %v14620_v21, %v7168_v37  ;;  %v7222_v2 = vsel %vm7205_vm12, %v7170_v50, %v7172_v15 }
 0x204   : > { %v7336_v48 = vsel %vm7316_vm15, %v7224_v4, 0.0  ;;  %v7338_v62 = vsel %vm14633_vm0, %v7222_v2, 0.0 }
 0x205   : > { %11532 = vmatpush1.msk.msra.mxu0 %vm902_vm3, %v7336_v48  ;;  %v7229_v48 = vld [vmem:[#allocation9 + $0x9c] sm:$0xf] }
 0x206   : > { %v7176_v10 = vpop.permute.xlu1 %7175  ;;  %v7174_v20 = vpop.permute.xlu0 %7173  ;;  %11533 = vmatmul.mubr.msk.f32.vlgmr.msra.gmra.mrb[22].mxu0 %vm898_vm7, %v14628_v24  ;;  %vm7232_vm15 = vcmp.gt.f32.partialorder %v7229_v48, 0.5 }
 0x207   : > { %v7221_v58 = vsel %vm7205_vm12, %v7172_v15, %v7174_v20  ;;  %7627 = vmatprep.mubr.f32.mxu0 %v12180_v6  ;;  %v7220_v31 = vsel %vm7205_vm12, %v7174_v20, %v7176_v10  ;;  %v7287_v15 = vrot.slane %v14663_v17, %v12677_v39 }
 0x208   : > { %v7339_v61 = vsel %vm7319_vm1, %v7221_v58, 0.0  ;;  %v7340_v44 = vsel %vm14651_vm4, %v7220_v31, 0.0 }
 0x209   : > { %11534 = vmatprep.subr.msk.mxu1 %vm902_vm3, %v7339_v61  ;;  %vm14746_vm1 = vcmp.eq.s32.totalorder %v7287_v15, 1  ;;  %v7295_v61 = vrot.slane %v14663_v17, %v12710_v53 }
 0x20a   : > { %v7180_v59 = vpop.permute.xlu1 %7179  ;;  %11535 = vmatpush1.msk.msra.mxu1 %vm902_vm3, %v7338_v62  ;;  %v7178_v63 = vpop.permute.xlu0 %7177 }
 0x20b   : > { %v7219_v18 = vsel %vm7205_vm12, %v7176_v10, %v7178_v63  ;;  %11536 = vmatmul.mubr.msk.f32.vlgmr.msra.gmra.mrb[0].mxu1 %vm898_vm7, %v14628_v24  ;;  %v7218_v51 = vsel %vm7205_vm12, %v7178_v63, %v7180_v59  ;;  %v7299_v10 = vrot.slane %v14663_v17, %v12698_v47 }
 0x20c   : > { %v7341_v30 = vsel %vm7321_vm2, %v7219_v18, 0.0  ;;  %7698 = vmatprep.mubr.f32.mxu1 %v12180_v6  ;;  %v7342_v16 = vsel %vm14677_vm6, %v7218_v51, 0.0  ;;  %vm14771_vm2 = vcmp.eq.s32.totalorder %v7295_v61, 1 }
 0x20d   : > { %11537 = vmatprep.subr.msk.mxu0 %vm902_vm3, %v7341_v30  ;;  %vm14766_vm0 = vcmp.eq.s32.totalorder %v7299_v10, 1 }
 0x20e   : > { %v7184_v7 = vpop.permute.xlu1 %7183  ;;  %11538 = vmatpush1.msk.msra.mxu0 %vm902_vm3, %v7340_v44  ;;  %v7182_v3 = vpop.permute.xlu0 %7181 }
 0x20f   : > { %v7217_v56 = vsel %vm7205_vm12, %v7180_v59, %v7182_v3  ;;  %11539 = vmatmul.mubr.msk.f32.vlgmr.msra.gmra.mrb[2].mxu0 %vm898_vm7, %v14628_v24  ;;  %v1668_v52 = vpop.f32.mrb[8].mxu1  ;;  %v7216_v43 = vsel %vm7205_vm12, %v7182_v3, %v7184_v7  ;;  %v7235_v59 = vsel %vm7232_vm15, 1, %v12178_v0  ;;  %v14788_v3 = vsel %vm8216_vm13, 1, %v12178_v0 }
 0x210   : > { %v7343_v5 = vsel %vm14671_vm5, %v7217_v56, 0.0  ;;  %7769 = vmatprep.mubr.f32.mxu0 %v12180_v6  ;;  %v1670_v54 = vpop.f32.mrb[9].mxu1  ;;  %v7344_v37 = vsel %vm14702_vm9, %v7216_v43, 0.0  ;;  %v7315_v18 = vrot.slane %v7235_v59, %v12660_v29  ;;  %v7307_v13 = vrot.slane %v7235_v59, %v12647_v25 }
 0x211   : > { %11540 = vmatprep.subr.msk.mxu1 %vm902_vm3, %v7343_v5  ;;  %v1802_v34 = vpop.f32.mrb[10].mxu0  ;;  %v7311_v12 = vrot.slane %v7235_v59, %v12664_v33  ;;  %v7303_v51 = vrot.slane %v7235_v59, %v12658_v28  ;;  %v8229_v43 = vrot.slane %v14788_v3, %v12647_v25  ;;  %vm8191_vm9 = vcmp.lt.s32.totalorder %v12656_v27, 111 }
 0x212   : > { %v7188_v49 = vpop.permute.xlu1 %7187  ;;  %11541 = vmatpush1.msk.msra.mxu1 %vm902_vm3, %v7342_v16  ;;  %v7186_v35 = vpop.permute.xlu0 %7185  ;;  %vm14794_vm4 = vcmp.eq.s32.totalorder %v7315_v18, 1  ;;  %vm14799_vm5 = vcmp.eq.s32.totalorder %v7307_v13, 1  ;;  %v8225_v41 = vrot.slane %v14788_v3, %v12658_v28  ;;  %v8241_v60 = vrot.slane %v14788_v3, %v12677_v39 }
 0x213   : > { %v7215_v45 = vsel %vm7205_vm12, %v7184_v7, %v7186_v35  ;;  %11542 = vmatmul.mubr.msk.f32.vlgmr.msra.gmra.mrb[2].mxu1 %vm898_vm7, %v14628_v24  ;;  %v1804_v11 = vpop.f32.mrb[11].mxu0  ;;  %v7214_v14 = vsel %vm7205_vm12, %v7186_v35, %v7188_v49  ;;  %vm14803_vm6 = vcmp.eq.s32.totalorder %v7311_v12, 1  ;;  %v8253_v18 = vrot.slane %v14788_v3, %v12698_v47 }
 0x214   : > { %v7345_v50 = vsel %vm14696_vm8, %v7215_v45, 0.0  ;;  %7840 = vmatprep.mubr.f32.mxu1 %v12180_v6  ;;  %v7346_v9 = vsel %vm14723_vm11, %v7214_v14, 0.0  ;;  %vm14807_vm8 = vcmp.eq.s32.totalorder %v7303_v51, 1 }
 0x215   : > { %11543 = vmatprep.subr.msk.mxu0 %vm902_vm3, %v7345_v50  ;;  %vm8309_vm13 = vcmp.eq.s32.totalorder %v8253_v18, 1 }
 0x216   : > { %v7192_v8 = vpop.permute.xlu1 %7191  ;;  %11544 = vmatpush1.msk.msra.mxu0 %vm902_vm3, %v7344_v37  ;;  %v7190_v4 = vpop.permute.xlu0 %7189 }
 0x217   : > { %v7213_v40 = vsel %vm7205_vm12, %v7188_v49, %v7190_v4  ;;  %11545 = vmatmul.mubr.msk.f32.vlgmr.msra.gmra.mrb[4].mxu0 %vm898_vm7, %v14628_v24  ;;  %v7212_v20 = vsel %vm7205_vm12, %v7190_v4, %v7192_v8  ;;  %v8237_v4 = vrot.slane %v14788_v3, %v12660_v29 }
 0x218   : > { %v7347_v42 = vsel %vm7327_vm10, %v7213_v40, 0.0  ;;  %7911 = vmatprep.mubr.f32.mxu0 %v12180_v6  ;;  %v7348_v1 = vsel %vm14746_vm1, %v7212_v20, 0.0  ;;  %vm8302_vm10 = vcmp.eq.s32.totalorder %v8225_v41, 1  ;;  %v14861_v40 = vld [vmem:[%s15270_s4 + $0x20] sm:$0xf]  ;;  %vm8306_vm1 = vcmp.eq.s32.totalorder %v8241_v60, 1 }
 0x219   : > { %11546 = vmatprep.subr.msk.mxu1 %vm902_vm3, %v7347_v42  ;;  %vm8305_vm11 = vcmp.eq.s32.totalorder %v8237_v4, 1 }
 0x21a   : > { %v7196_v58 = vpop.permute.xlu1 %7195  ;;  %11547 = vmatpush1.msk.msra.mxu1 %vm902_vm3, %v7346_v9  ;;  %v7194_v62 = vpop.permute.xlu0 %7193 }
 0x21b   : > { %v7211_v23 = vsel %vm7205_vm12, %v7192_v8, %v7194_v62  ;;  %11548 = vmatmul.mubr.msk.f32.vlgmr.msra.gmra.mrb[4].mxu1 %vm898_vm7, %v14628_v24  ;;  %v7210_v30 = vsel %vm7205_vm12, %v7194_v62, %v7196_v58 }
 0x21c   : > { %v7349_v31 = vsel %vm14740_vm14, %v7211_v23, 0.0  ;;  %7982 = vmatprep.mubr.f32.mxu1 %v12180_v6  ;;  %v7350_v56 = vsel %vm14771_vm2, %v7210_v30, 0.0  ;;  %v8249_v30 = vrot.slane %v14788_v3, %v12710_v53 }
 0x21d   : > { %11549 = vmatprep.subr.msk.mxu0 %vm902_vm3, %v7349_v31  ;;  %v8214_v31 = vld [vmem:[#allocation9 + $0xa8] sm:$0xff] }
 0x21e   : > { %v7200_v44 = vpop.permute.xlu1 %7199  ;;  %11550 = vmatpush1.msk.msra.mxu0 %vm902_vm3, %v7348_v1  ;;  %v7198_v55 = vpop.permute.xlu0 %7197  ;;  %vm8308_vm2 = vcmp.eq.s32.totalorder %v8249_v30, 1 }
 0x21f   : > { %v7209_v7 = vsel %vm7205_vm12, %v7196_v58, %v7198_v55  ;;  %11551 = vmatmul.mubr.msk.f32.vlgmr.msra.gmra.mrb[6].mxu0 %vm898_vm7, %v14628_v24  ;;  %v7208_v19 = vsel %vm7205_vm12, %v7198_v55, %v7200_v44  ;;  %v8245_v58 = vrot.slane %v14788_v3, %v12675_v36 }
 0x220   : > { %v7351_v26 = vsel %vm14766_vm0, %v7209_v7, 0.0  ;;  %8053 = vmatprep.mubr.f32.mxu0 %v12180_v6  ;;  %v7352_v11 = vsel %vm14807_vm8, %v7208_v19, 0.0  ;;  %vm8217_vm0 = vcmp.gt.f32.partialorder %v8214_v31, 0.5 }
 0x221   : > { %11552 = vmatprep.subr.msk.mxu1 %vm902_vm3, %v7351_v26  ;;  %vm8307_vm15 = vcmp.eq.s32.totalorder %v8245_v58, 1  ;;  %v8220_v51 = vsel %vm8217_vm0, 1, %v12178_v0 }
 0x222   : > { %v7204_v5 = vpop.permute.xlu1 %7203  ;;  %11553 = vmatpush1.msk.msra.mxu1 %vm902_vm3, %v7350_v56  ;;  %v8257_v52 = vrot.slane %v8220_v51, %v12658_v28  ;;  %v8273_v41 = vrot.slane %v8220_v51, %v12677_v39  ;;  %v8285_v39 = vrot.slane %v8220_v51, %v12698_v47 }
 0x223   : > { %v7225_v34 = vsel %vm7205_vm12, %v7204_v5, %v14620_v21  ;;  %v7202_v38 = vpop.permute.xlu0 %7201  ;;  %11554 = vmatmul.mubr.msk.f32.vlgmr.msra.gmra.mrb[6].mxu1 %vm898_vm7, %v14628_v24 }
 0x224   : > { %v7355_v49 = vsel %vm14794_vm4, %v7225_v34, 0.0  ;;  %v7206_v46 = vsel %vm7205_vm12, %v7202_v38, %v7204_v5  ;;  %v7207_v35 = vsel %vm7205_vm12, %v7200_v44, %v7202_v38  ;;  %8124 = vmatprep.mubr.f32.mxu1 %v12180_v6  ;;  %vm8303_vm12 = vcmp.eq.s32.totalorder %v8229_v43, 1 }
 0x225   : > { %v7353_v21 = vsel %vm14799_vm5, %v7207_v35, 0.0  ;;  %v7354_v45 = vsel %vm14803_vm6, %v7206_v46, 0.0  ;;  %11558 = vmatprep.subr.msk.mxu1 %vm902_vm3, %v7355_v49  ;;  %vm8310_vm5 = vcmp.eq.s32.totalorder %v8257_v52, 1  ;;  %v8269_v38 = vrot.slane %v8220_v51, %v12660_v29 }
 0x226   : > { %11555 = vmatprep.subr.msk.mxu0 %vm902_vm3, %v7353_v21  ;;  %11559 = vmatpush1.msk.msra.mxu1 %vm902_vm3, %v7354_v45  ;;  %v8265_v43 = vrot.slane %v8220_v51, %v12664_v33  ;;  %v8277_v45 = vrot.slane %v8220_v51, %v12675_v36 }
 0x227   : > { %v8156_v50 = vpop.permute.xlu1 %8155  ;;  %11556 = vmatpush1.msk.msra.mxu0 %vm902_vm3, %v7352_v11  ;;  %11560 = vmatmul.mubr.msk.f32.vlgmr.msra.gmra.mrb[22].mxu1 %vm898_vm7, %v14628_v24  ;;  %vm8313_vm6 = vcmp.eq.s32.totalorder %v8269_v38, 1  ;;  %v8215_v11 = vld [vmem:[#allocation9 + $0xb0] sm:$0xf] }
 0x228   : > { %v8154_v37 = vpop.permute.xlu0 %8153  ;;  %11557 = vmatmul.mubr.msk.f32.vlgmr.msra.gmra.mrb[8].mxu0 %vm898_vm7, %v14628_v24  ;;  %8542 = vmatprep.mubr.f32.mxu1 %v12180_v6  ;;  %v8233_v24 = vrot.slane %v14788_v3, %v12664_v33  ;;  %v8261_v3 = vrot.slane %v8220_v51, %v12647_v25  ;;  %vm14914_vm8 = vcmp.eq.s32.totalorder %v8265_v43, 1 }
 0x229   : > { %v8209_v57 = vsel %vm8191_vm9, %v8154_v37, %v8156_v50  ;;  %8471 = vmatprep.mubr.f32.mxu0 %v12180_v6 }
 0x22a   : > { %v8323_v14 = vsel %vm8303_vm12, %v8209_v57, 0.0  ;;  %vm8304_vm14 = vcmp.eq.s32.totalorder %v8233_v24, 1  ;;  %vm8311_vm4 = vcmp.eq.s32.totalorder %v8261_v3, 1  ;;  %vm8218_vm12 = vcmp.gt.f32.partialorder %v8215_v11, 0.5 }
 0x22b   : > { %11562 = vmatprep.subr.msk.mxu0 %vm902_vm3, %v8323_v14  ;;  %v8221_v47 = vsel %vm8218_vm12, 1, %v12178_v0 }
 0x22c   : > { %v8158_v8 = vpop.permute.xlu1 %8157  ;;  %v8289_v0 = vrot.slane %v8221_v47, %v12658_v28  ;;  %v8297_v31 = vrot.slane %v8221_v47, %v12664_v33  ;;  %v8301_v28 = vrot.slane %v8221_v47, %v12660_v29 }
 0x22d   : > { %v14849_v15 = vpop.permute.xlu0 %8151  ;;  %v8208_v9 = vsel %vm8191_vm9, %v8156_v50, %v8158_v8 }
 0x22e   : > { %v8210_v48 = vsel %vm8191_vm9, %v14849_v15, %v8154_v37  ;;  %v8324_v62 = vsel %vm8304_vm14, %v8208_v9, 0.0  ;;  %vm8317_vm14 = vcmp.eq.s32.totalorder %v8285_v39, 1  ;;  %vm8318_vm0 = vcmp.eq.s32.totalorder %v8289_v0, 1 }
 0x22f   : > { %v8322_v42 = vsel %vm8302_vm10, %v8210_v48, 0.0  ;;  %vm8315_vm10 = vcmp.eq.s32.totalorder %v8277_v45, 1 }
 0x230   : > { %11563 = vmatpush1.msk.msra.mxu0 %vm902_vm3, %v8322_v42  ;;  %v8281_v42 = vrot.slane %v8220_v51, %v12710_v53  ;;  %v8293_v53 = vrot.slane %v8221_v47, %v12647_v25 }
 0x231   : > { %11564 = vmatmul.mubr.msk.f32.vlgmr.msra.gmra.mrb[24].mxu0 %vm898_vm7, %v14861_v40  ;;  %v8162_v2 = vpop.permute.xlu1 %8161 }
 0x232   : > { %v8160_v10 = vpop.permute.xlu0 %8159  ;;  %8613 = vmatprep.mubr.f32.mxu0 %v12180_v6 }
 0x233   : > { %v8207_v22 = vsel %vm8191_vm9, %v8158_v8, %v8160_v10  ;;  %v8206_v1 = vsel %vm8191_vm9, %v8160_v10, %v8162_v2 }
 0x234   : > { %v8325_v20 = vsel %vm8305_vm11, %v8207_v22, 0.0  ;;  %v2441_v61 = vpop.f32.mrb[10].mxu1  ;;  %v8326_v12 = vsel %vm8306_vm1, %v8206_v1, 0.0  ;;  %vm14930_vm11 = vcmp.eq.s32.totalorder %v8273_v41, 1  ;;  %vm8319_vm1 = vcmp.eq.s32.totalorder %v8293_v53, 1 }
 0x235   : > { %11565 = vmatprep.subr.msk.mxu1 %vm902_vm3, %v8325_v20  ;;  %v2443_v23 = vpop.f32.mrb[11].mxu1 }
 0x236   : > { %11566 = vmatpush1.msk.msra.mxu1 %vm902_vm3, %v8324_v62 }
 0x237   : > { %11567 = vmatmul.mubr.msk.f32.vlgmr.msra.gmra.mrb[0].mxu1 %vm898_vm7, %v14861_v40 }
 0x238   : > { %v8166_v59 = vpop.permute.xlu1 %8165  ;;  %8684 = vmatprep.mubr.f32.mxu1 %v12180_v6 }
 0x239   : > { %v8164_v63 = vpop.permute.xlu0 %8163  ;;  %v2768_v17 = vpop.f32.mrb[12].mxu0 }
 0x23a   : > { %v8205_v44 = vsel %vm8191_vm9, %v8162_v2, %v8164_v63  ;;  %v2770_v55 = vpop.f32.mrb[13].mxu0  ;;  %v8204_v26 = vsel %vm8191_vm9, %v8164_v63, %v8166_v59 }
 0x23b   : > { %v8327_v13 = vsel %vm8307_vm15, %v8205_v44, 0.0  ;;  %v8328_v16 = vsel %vm8308_vm2, %v8204_v26, 0.0  ;;  %vm14948_vm15 = vcmp.eq.s32.totalorder %v8281_v42, 1  ;;  %vm8321_vm2 = vcmp.eq.s32.totalorder %v8301_v28, 1 }
 0x23c   : > { %11568 = vmatprep.subr.msk.mxu0 %vm902_vm3, %v8327_v13 }
 0x23d   : > { %v8170_v7 = vpop.permute.xlu1 %8169  ;;  %11569 = vmatpush1.msk.msra.mxu0 %vm902_vm3, %v8326_v12 }
 0x23e   : > { %v8168_v56 = vpop.permute.xlu0 %8167  ;;  %11570 = vmatmul.mubr.msk.f32.vlgmr.msra.gmra.mrb[2].mxu0 %vm898_vm7, %v14861_v40 }
 0x23f   : > { %v8203_v5 = vsel %vm8191_vm9, %v8166_v59, %v8168_v56  ;;  %8755 = vmatprep.mubr.f32.mxu0 %v12180_v6  ;;  %v8202_v19 = vsel %vm8191_vm9, %v8168_v56, %v8170_v7 }
 0x240   : > { %v8329_v54 = vsel %vm8309_vm13, %v8203_v5, 0.0  ;;  %v8330_v35 = vsel %vm8310_vm5, %v8202_v19, 0.0  ;;  %vm8320_vm13 = vcmp.eq.s32.totalorder %v8297_v31, 1 }
 0x241   : > { %11571 = vmatprep.subr.msk.mxu1 %vm902_vm3, %v8329_v54 }
 0x242   : > { %v8174_v32 = vpop.permute.xlu1 %8173  ;;  %11572 = vmatpush1.msk.msra.mxu1 %vm902_vm3, %v8328_v16 }
 0x243   : > { %v8172_v34 = vpop.permute.xlu0 %8171  ;;  %11573 = vmatmul.mubr.msk.f32.vlgmr.msra.gmra.mrb[2].mxu1 %vm898_vm7, %v14861_v40 }
 0x244   : > { %v8201_v49 = vsel %vm8191_vm9, %v8170_v7, %v8172_v34  ;;  %8826 = vmatprep.mubr.f32.mxu1 %v12180_v6  ;;  %v8200_v37 = vsel %vm8191_vm9, %v8172_v34, %v8174_v32 }
 0x245   : > { %v8331_v46 = vsel %vm8311_vm4, %v8201_v49, 0.0  ;;  %v8332_v8 = vsel %vm14914_vm8, %v8200_v37, 0.0 }
 0x246   : > { %11574 = vmatprep.subr.msk.mxu0 %vm902_vm3, %v8331_v46 }
 0x247   : > { %v8178_v21 = vpop.permute.xlu1 %8177  ;;  %11575 = vmatpush1.msk.msra.mxu0 %vm902_vm3, %v8330_v35 }
 0x248   : > { %v8176_v57 = vpop.permute.xlu0 %8175  ;;  %11576 = vmatmul.mubr.msk.f32.vlgmr.msra.gmra.mrb[4].mxu0 %vm898_vm7, %v14861_v40 }
 0x249   : > { %v8199_v14 = vsel %vm8191_vm9, %v8174_v32, %v8176_v57  ;;  %8897 = vmatprep.mubr.f32.mxu0 %v12180_v6  ;;  %v8198_v48 = vsel %vm8191_vm9, %v8176_v57, %v8178_v21 }
 0x24a   : > { %v8333_v36 = vsel %vm8313_vm6, %v8199_v14, 0.0  ;;  %v8334_v22 = vsel %vm14930_vm11, %v8198_v48, 0.0 }
 0x24b   : > { %11577 = vmatprep.subr.msk.mxu1 %vm902_vm3, %v8333_v36  ;;  %v8182_v4 = vpop.permute.xlu1 %8181 }
 0x24c   : > { %11578 = vmatpush1.msk.msra.mxu1 %vm902_vm3, %v8332_v8  ;;  %v8180_v9 = vpop.permute.xlu0 %8179  ;;  %v15000_v8 = vld [vmem:[%s15272_s6 + $0x4] sm:$0xf] }
 0x24d   : > { %v8197_v2 = vsel %vm8191_vm9, %v8178_v21, %v8180_v9  ;;  %11579 = vmatmul.mubr.msk.f32.vlgmr.msra.gmra.mrb[4].mxu1 %vm898_vm7, %v14861_v40  ;;  %v8196_v58 = vsel %vm8191_vm9, %v8180_v9, %v8182_v4 }
 0x24e   : > { %v8335_v10 = vsel %vm8315_vm10, %v8197_v2, 0.0  ;;  %8968 = vmatprep.mubr.f32.mxu1 %v12180_v6  ;;  %v8336_v23 = vsel %vm14948_vm15, %v8196_v58, 0.0 }
 0x24f   : > { %11580 = vmatprep.subr.msk.mxu0 %vm902_vm3, %v8335_v10  ;;  %v8186_v62 = vpop.permute.xlu1 %8185 }
 0x250   : > { %11581 = vmatpush1.msk.msra.mxu0 %vm902_vm3, %v8334_v22  ;;  %v8184_v61 = vpop.permute.xlu0 %8183 }
 0x251   : > { %v8195_v60 = vsel %vm8191_vm9, %v8182_v4, %v8184_v61  ;;  %11582 = vmatmul.mubr.msk.f32.vlgmr.msra.gmra.mrb[6].mxu0 %vm898_vm7, %v14861_v40  ;;  %v8194_v59 = vsel %vm8191_vm9, %v8184_v61, %v8186_v62 }
 0x252   : > { %v8337_v25 = vsel %vm8317_vm14, %v8195_v60, 0.0  ;;  %9039 = vmatprep.mubr.f32.mxu0 %v12180_v6  ;;  %v8338_v17 = vsel %vm8318_vm0, %v8194_v59, 0.0 }
 0x253   : > { %11583 = vmatprep.subr.msk.mxu1 %vm902_vm3, %v8337_v25 }
 0x254   : > { %11584 = vmatpush1.msk.msra.mxu1 %vm902_vm3, %v8336_v23  ;;  %v8188_v1 = vpop.permute.xlu0 %8187 }
 0x255   : > { %v8193_v63 = vsel %vm8191_vm9, %v8186_v62, %v8188_v1  ;;  %11585 = vmatmul.mubr.msk.f32.vlgmr.msra.gmra.mrb[6].mxu1 %vm898_vm7, %v14861_v40 }
 0x256   : > { %v8339_v18 = vsel %vm8319_vm1, %v8193_v63, 0.0  ;;  %9110 = vmatprep.mubr.f32.mxu1 %v12180_v6 }
 0x257   : > { %11586 = vmatprep.subr.msk.mxu0 %vm902_vm3, %v8339_v18 }
 0x258   : > { %11587 = vmatpush1.msk.msra.mxu0 %vm902_vm3, %v8338_v17  ;;  %v8190_v29 = vpop.permute.xlu0 %8189 }
 0x259   : > { %v8192_v33 = vsel %vm8191_vm9, %v8188_v1, %v8190_v29  ;;  %v8211_v30 = vsel %vm8191_vm9, %v8190_v29, %v14849_v15  ;;  %11588 = vmatmul.mubr.msk.f32.vlgmr.msra.gmra.mrb[8].mxu0 %vm898_vm7, %v14861_v40 }
 0x25a   : > { %v8340_v44 = vsel %vm8320_vm13, %v8192_v33, 0.0  ;;  %v8341_v55 = vsel %vm8321_vm2, %v8211_v30, 0.0  ;;  %9346 = vmatprep.mubr.f32.mxu0 %v12180_v6 }
 0x25b   : > { %11589 = vmatprep.subr.msk.mxu1 %vm902_vm3, %v8341_v55 }
 0x25c   : > { %11590 = vmatpush1.msk.msra.mxu1 %vm902_vm3, %v8340_v44  ;;  %v3407_v13 = vpop.f32.mrb[12].mxu1 }
 0x25d   : > { %v3409_v12 = vpop.f32.mrb[13].mxu1  ;;  %11591 = vmatmul.mubr.msk.f32.vlgmr.msra.gmra.mrb[24].mxu1 %vm898_vm7, %v14861_v40 }
 0x25e   : > { %9417 = vmatprep.mubr.f32.mxu1 %v12180_v6 }
 0x261   : > { %v3754_v27 = vpop.f32.mrb[14].mxu0 }
 0x262   : > { %v3756_v15 = vpop.f32.mrb[15].mxu0 }
 0x26a   : > { %v14989_v11 = vpop.permute.xlu1 %9140 }
 0x283   : > { %v4393_v51 = vpop.f32.mrb[14].mxu1 }
 0x284   : > { %v4395_v7 = vpop.f32.mrb[15].mxu1 }
 0x287   : > { %v4529_v26 = vpop.f32.mrb[16].mxu0 }
 0x288   : > { %v4531_v56 = vpop.f32.mrb[17].mxu0  ;;  %v15081_v26 = vcombine.high %v12180_v6, %v12180_v6 }
 0x29d   : > { %v5168_v3 = vpop.f32.mrb[16].mxu1 }
 0x29e   : > { %v5170_v52 = vpop.f32.mrb[17].mxu1 }
 0x2a1   : > { %v5515_v5 = vpop.f32.mrb[18].mxu0 }
 0x2a2   : > { %v5517_v54 = vpop.f32.mrb[19].mxu0 }
 0x2b7   : > { %v6154_v16 = vpop.f32.mrb[18].mxu1 }
 0x2b8   : > { %v6156_v32 = vpop.f32.mrb[19].mxu1 }
 0x2b9   : > { %v6501_v19 = vpop.f32.mrb[20].mxu0  ;;  %v9227_v32 = vld [vmem:[%s15272_s6] sm:$0xf] }
 0x2ba   : > { %v6503_v34 = vpop.f32.mrb[21].mxu0 }
 0x2bb   : > { %v11641_v34 = vld [vmem:[%s15272_s6 + $0x8] sm:$0xf] }
 0x2d2   : > { %v7140_v38 = vpop.f32.mrb[20].mxu1 }
 0x2d3   : > { %v7142_v43 = vpop.f32.mrb[21].mxu1  ;;  %v11076_v38 = vpop.permute.xlu1 %11075 }
 0x2d9   : > { %v7487_v49 = vpop.f32.mrb[22].mxu0 }
 0x2da   : > { %v7489_v40 = vpop.f32.mrb[23].mxu0 }
 0x2fa   : > { %v8126_v46 = vpop.f32.mrb[22].mxu1 }
 0x2fb   : > { %v8128_v35 = vpop.f32.mrb[23].mxu1 }
 0x304   : > { %v8473_v21 = vpop.f32.mrb[24].mxu0 }
 0x305   : > { %v8475_v45 = vpop.f32.mrb[25].mxu0 }
 0x30a   : > { %v8544_v50 = vpop.f32.mrb[0].mxu1 }
 0x30b   : > { %v9145_v37 = vadd.f32 %v14989_v11, %v8544_v50  ;;  %v8546_v41 = vpop.f32.mrb[1].mxu1 }
 0x30c   : > { %v9146_v57 = vadd.f32 %v14989_v11, %v8546_v41 }
 0x30e   : > { %v14993_v14 = vcombine.low %v9145_v37, %v9146_v57  ;;  %v14995_v36 = vcombine.low %v9146_v57, %v9146_v57 }
 0x310   : > { %11593 = vmatprep.subr.msk.mxu0 %vm902_vm3, %v14995_v36 }
 0x311   : > { %v8615_v4 = vpop.f32.mrb[2].mxu0  ;;  %11594 = vmatpush1.msk.msra.mxu0 %vm902_vm3, %v14993_v14 }
 0x312   : > { %v9147_v39 = vadd.f32 %v14989_v11, %v8615_v4  ;;  %v8617_v24 = vpop.f32.mrb[3].mxu0  ;;  %11595 = vmatmul.mubr.msk.f32.vlgmr.msra.gmra.mrb[26].mxu0 %vm898_vm7, %v15000_v8 }
 0x313   : > { %v9148_v48 = vadd.f32 %v14989_v11, %v8617_v24  ;;  %9488 = vmatprep.mubr.f32.mxu0 %v12180_v6 }
 0x315   : > { %v15011_v42 = vcombine.low %v9147_v39, %v9148_v48  ;;  %v15013_v9 = vcombine.low %v9148_v48, %v9148_v48 }
 0x316   : > { %v8686_v2 = vpop.f32.mrb[2].mxu1 }
 0x317   : > { %v9149_v47 = vadd.f32 %v14989_v11, %v8686_v2  ;;  %v8688_v10 = vpop.f32.mrb[3].mxu1  ;;  %11596 = vmatprep.subr.msk.mxu1 %vm902_vm3, %v15013_v9 }
 0x318   : > { %v9150_v22 = vadd.f32 %v14989_v11, %v8688_v10  ;;  %11597 = vmatpush1.msk.msra.mxu1 %vm902_vm3, %v15011_v42 }
 0x319   : > { %11598 = vmatmul.mubr.msk.f32.vlgmr.msra.gmra.mrb[26].mxu1 %vm898_vm7, %v15000_v8 }
 0x31a   : > { %v15023_v53 = vcombine.low %v9149_v47, %v9150_v22  ;;  %v15025_v20 = vcombine.low %v9150_v22, %v9150_v22  ;;  %9559 = vmatprep.mubr.f32.mxu1 %v12180_v6 }
 0x31b   : > { %v8757_v58 = vpop.f32.mrb[4].mxu0 }
 0x31c   : > { %v9151_v0 = vadd.f32 %v14989_v11, %v8757_v58  ;;  %v8759_v61 = vpop.f32.mrb[5].mxu0  ;;  %11599 = vmatprep.subr.msk.mxu0 %vm902_vm3, %v15025_v20 }
 0x31d   : > { %v9152_v62 = vadd.f32 %v14989_v11, %v8759_v61  ;;  %11600 = vmatpush1.msk.msra.mxu0 %vm902_vm3, %v15023_v53 }
 0x31e   : > { %11601 = vmatmul.mubr.msk.f32.vlgmr.msra.gmra.mrb[28].mxu0 %vm898_vm7, %v15000_v8 }
 0x31f   : > { %v15036_v60 = vcombine.low %v9151_v0, %v9152_v62  ;;  %v15038_v25 = vcombine.low %v9152_v62, %v9152_v62  ;;  %9630 = vmatprep.mubr.f32.mxu0 %v12180_v6 }
 0x320   : > { %v8828_v23 = vpop.f32.mrb[4].mxu1 }
 0x321   : > { %v9153_v31 = vadd.f32 %v14989_v11, %v8828_v23  ;;  %v8830_v28 = vpop.f32.mrb[5].mxu1  ;;  %11602 = vmatprep.subr.msk.mxu1 %vm902_vm3, %v15038_v25 }
 0x322   : > { %v9154_v59 = vadd.f32 %v14989_v11, %v8830_v28  ;;  %11603 = vmatpush1.msk.msra.mxu1 %vm902_vm3, %v15036_v60 }
 0x323   : > { %11604 = vmatmul.mubr.msk.f32.vlgmr.msra.gmra.mrb[28].mxu1 %vm898_vm7, %v15000_v8 }
 0x324   : > { %v15049_v1 = vcombine.low %v9153_v31, %v9154_v59  ;;  %v15051_v63 = vcombine.low %v9154_v59, %v9154_v59  ;;  %v8899_v18 = vpop.f32.mrb[6].mxu0  ;;  %9701 = vmatprep.mubr.f32.mxu1 %v12180_v6 }
 0x325   : > { %v9155_v17 = vadd.f32 %v14989_v11, %v8899_v18  ;;  %v8901_v29 = vpop.f32.mrb[7].mxu0 }
 0x326   : > { %v9156_v33 = vadd.f32 %v14989_v11, %v8901_v29  ;;  %11605 = vmatprep.subr.msk.mxu0 %vm902_vm3, %v15051_v63 }
 0x327   : > { %11606 = vmatpush1.msk.msra.mxu0 %vm902_vm3, %v15049_v1 }
 0x328   : > { %v15060_v30 = vcombine.low %v9155_v17, %v9156_v33  ;;  %v15062_v44 = vcombine.low %v9156_v33, %v9156_v33  ;;  %v8970_v55 = vpop.f32.mrb[6].mxu1  ;;  %11607 = vmatmul.mubr.msk.f32.vlgmr.msra.gmra.mrb[30].mxu0 %vm898_vm7, %v15000_v8 }
 0x329   : > { %v9157_v13 = vadd.f32 %v14989_v11, %v8970_v55  ;;  %v8972_v12 = vpop.f32.mrb[7].mxu1  ;;  %9772 = vmatprep.mubr.f32.mxu0 %v12180_v6 }
 0x32a   : > { %v9158_v27 = vadd.f32 %v14989_v11, %v8972_v12  ;;  %11608 = vmatprep.subr.msk.mxu1 %vm902_vm3, %v15062_v44 }
 0x32b   : > { %11609 = vmatpush1.msk.msra.mxu1 %vm902_vm3, %v15060_v30 }
 0x32c   : > { %v15073_v15 = vcombine.low %v9157_v13, %v9158_v27  ;;  %v15075_v51 = vcombine.low %v9158_v27, %v9158_v27  ;;  %v9041_v7 = vpop.f32.mrb[8].mxu0  ;;  %11610 = vmatmul.mubr.msk.f32.vlgmr.msra.gmra.mrb[30].mxu1 %vm898_vm7, %v15000_v8 }
 0x32d   : > { %v9159_v56 = vadd.f32 %v14989_v11, %v9041_v7  ;;  %v9043_v3 = vpop.f32.mrb[9].mxu0  ;;  %9843 = vmatprep.mubr.f32.mxu1 %v12180_v6 }
 0x32e   : > { %v9160_v52 = vadd.f32 %v14989_v11, %v9043_v3  ;;  %11611 = vmatprep.subr.msk.mxu0 %vm902_vm3, %v15075_v51 }
 0x32f   : > { %11612 = vmatpush1.msk.msra.mxu0 %vm902_vm3, %v15073_v15 }
 0x330   : > { %v15090_v5 = vcombine.low %v9159_v56, %v9160_v52  ;;  %v11684_v54 = vcombine.low %v9160_v52, %v9160_v52  ;;  %11613 = vmatmul.mubr.msk.f32.vlgmr.msra.gmra.mrb[32].mxu0 %vm898_vm7, %v15000_v8  ;;  %11617 = vmatprep.subr.msk.mxu0 %vm902_vm3, %v15081_v26  ;;  %v9112_v16 = vpop.f32.mrb[24].mxu1 }
 0x331   : > { %11618 = vmatpush1.msk.msra.mxu0 %vm902_vm3, %v12180_v6  ;;  %9923 = vmatprep.mubr.f32.mxu0 %v12180_v6  ;;  %v9114_v19 = vpop.f32.mrb[25].mxu1 }
 0x332   : > { %11614 = vmatprep.subr.msk.mxu1 %vm902_vm3, %v11684_v54  ;;  %11623 = vmatprep.subr.msk.mxu0 %vm902_vm3, %v15013_v9 }
 0x333   : > { %11615 = vmatpush1.msk.msra.mxu1 %vm902_vm3, %v15090_v5 }
 0x334   : > { %11616 = vmatmul.mubr.msk.f32.vlgmr.msra.gmra.mrb[32].mxu1 %vm898_vm7, %v15000_v8  ;;  %11619 = vmatmul.mubr.msk.f32.vlgmr.msra.gmra.mrb[26].mxu0 %vm898_vm7, %v9227_v32 }
 0x335   : > { %11620 = vmatprep.subr.msk.mxu1 %vm902_vm3, %v14995_v36  ;;  %11624 = vmatpush1.msk.msra.mxu0 %vm902_vm3, %v15011_v42 }
 0x336   : > { %11621 = vmatpush1.msk.msra.mxu1 %vm902_vm3, %v14993_v14  ;;  %11629 = vmatprep.subr.msk.mxu0 %vm902_vm3, %v15038_v25 }
 0x337   : > { %11626 = vmatprep.subr.msk.mxu1 %vm902_vm3, %v15025_v20  ;;  %9994 = vmatprep.mubr.f32.mxu1 %v12180_v6 }
 0x338   : > { %10065 = vmatprep.mubr.f32.mxu0 %v12180_v6  ;;  %11622 = vmatmul.mubr.msk.f32.vlgmr.msra.gmra.mrb[26].mxu1 %vm898_vm7, %v9227_v32 }
 0x339   : > { %11625 = vmatmul.mubr.msk.f32.vlgmr.msra.gmra.mrb[28].mxu0 %vm898_vm7, %v9227_v32  ;;  %11627 = vmatpush1.msk.msra.mxu1 %vm902_vm3, %v15023_v53 }
 0x33a   : > { %11630 = vmatpush1.msk.msra.mxu0 %vm902_vm3, %v15036_v60  ;;  %11632 = vmatprep.subr.msk.mxu1 %vm902_vm3, %v15051_v63 }
 0x33b   : > { %11635 = vmatprep.subr.msk.mxu0 %vm902_vm3, %v15062_v44  ;;  %10136 = vmatprep.mubr.f32.mxu1 %v12180_v6 }
 0x33c   : > { %10207 = vmatprep.mubr.f32.mxu0 %v12180_v6  ;;  %11628 = vmatmul.mubr.msk.f32.vlgmr.msra.gmra.mrb[28].mxu1 %vm898_vm7, %v9227_v32 }
 0x33d   : > { %11631 = vmatmul.mubr.msk.f32.vlgmr.msra.gmra.mrb[30].mxu0 %vm898_vm7, %v9227_v32  ;;  %11633 = vmatpush1.msk.msra.mxu1 %vm902_vm3, %v15049_v1 }
 0x33e   : > { %11636 = vmatpush1.msk.msra.mxu0 %vm902_vm3, %v15060_v30  ;;  %11638 = vmatprep.subr.msk.mxu1 %vm902_vm3, %v15075_v51 }
 0x33f   : > { %11642 = vmatprep.subr.msk.mxu0 %vm902_vm3, %v15013_v9  ;;  %10278 = vmatprep.mubr.f32.mxu1 %v12180_v6 }
 0x340   : > { %10349 = vmatprep.mubr.f32.mxu0 %v12180_v6  ;;  %11634 = vmatmul.mubr.msk.f32.vlgmr.msra.gmra.mrb[30].mxu1 %vm898_vm7, %v9227_v32 }
 0x341   : > { %11637 = vmatmul.mubr.msk.f32.vlgmr.msra.gmra.mrb[32].mxu0 %vm898_vm7, %v9227_v32  ;;  %11639 = vmatpush1.msk.msra.mxu1 %vm902_vm3, %v15073_v15 }
 0x342   : > { %11643 = vmatpush1.msk.msra.mxu0 %vm902_vm3, %v15011_v42  ;;  %11645 = vmatprep.subr.msk.mxu1 %vm902_vm3, %v15025_v20 }
 0x343   : > { %11648 = vmatprep.subr.msk.mxu0 %vm902_vm3, %v15038_v25  ;;  %10420 = vmatprep.mubr.f32.mxu1 %v12180_v6 }
 0x344   : > { %10552 = vmatprep.mubr.f32.mxu0 %v12180_v6  ;;  %11640 = vmatmul.mubr.msk.f32.vlgmr.msra.gmra.mrb[32].mxu1 %vm898_vm7, %v9227_v32 }
 0x345   : > { %11644 = vmatmul.mubr.msk.f32.vlgmr.msra.gmra.mrb[26].mxu0 %vm898_vm7, %v11641_v34  ;;  %11646 = vmatpush1.msk.msra.mxu1 %vm902_vm3, %v15023_v53 }
 0x346   : > { %11649 = vmatpush1.msk.msra.mxu0 %vm902_vm3, %v15036_v60  ;;  %11651 = vmatprep.subr.msk.mxu1 %vm902_vm3, %v15051_v63 }
 0x347   : > { %11654 = vmatprep.subr.msk.mxu0 %vm902_vm3, %v15062_v44  ;;  %10623 = vmatprep.mubr.f32.mxu1 %v12180_v6 }
 0x348   : > { %10694 = vmatprep.mubr.f32.mxu0 %v12180_v6  ;;  %11647 = vmatmul.mubr.msk.f32.vlgmr.msra.gmra.mrb[26].mxu1 %vm898_vm7, %v11641_v34 }
 0x349   : > { %11650 = vmatmul.mubr.msk.f32.vlgmr.msra.gmra.mrb[28].mxu0 %vm898_vm7, %v11641_v34  ;;  %11652 = vmatpush1.msk.msra.mxu1 %vm902_vm3, %v15049_v1 }
 0x34a   : > { %11655 = vmatpush1.msk.msra.mxu0 %vm902_vm3, %v15060_v30  ;;  %11657 = vmatprep.subr.msk.mxu1 %vm902_vm3, %v15075_v51 }
 0x34b   : > { %11660 = vmatprep.subr.msk.mxu0 %vm902_vm3, %v11684_v54  ;;  %10765 = vmatprep.mubr.f32.mxu1 %v12180_v6 }
 0x34c   : > { %10836 = vmatprep.mubr.f32.mxu0 %v12180_v6  ;;  %11653 = vmatmul.mubr.msk.f32.vlgmr.msra.gmra.mrb[28].mxu1 %vm898_vm7, %v11641_v34 }
 0x34d   : > { %11656 = vmatmul.mubr.msk.f32.vlgmr.msra.gmra.mrb[30].mxu0 %vm898_vm7, %v11641_v34  ;;  %11658 = vmatpush1.msk.msra.mxu1 %vm902_vm3, %v15073_v15 }
 0x34e   : > { %11661 = vmatpush1.msk.msra.mxu0 %vm902_vm3, %v15090_v5  ;;  %10907 = vmatprep.mubr.f32.mxu1 %v12180_v6 }
 0x34f   : > { %10978 = vmatprep.mubr.f32.mxu0 %v12180_v6  ;;  %11663 = vmatprep.subr.msk.mxu1 %vm902_vm3, %v15081_v26 }
 0x350   : > { %11659 = vmatmul.mubr.msk.f32.vlgmr.msra.gmra.mrb[30].mxu1 %vm898_vm7, %v11641_v34 }
 0x351   : > { %11662 = vmatmul.mubr.msk.f32.vlgmr.msra.gmra.mrb[32].mxu0 %vm898_vm7, %v11641_v34  ;;  %11664 = vmatpush1.msk.msra.mxu1 %vm902_vm3, %v12180_v6 }
 0x352   : > { %11049 = vmatprep.mubr.f32.mxu1 %v12180_v6 }
 0x354   : > { %11665 = vmatmul.mubr.msk.f32.vlgmr.msra.gmra.mrb[32].mxu1 %vm898_vm7, %v11641_v34 }
 0x418   : > { %v10554_v43 = vpop.f32.mrb[26].mxu0 }
 0x419   : > { %v11078_v49 = vadd.f32 %v11076_v38, %v10554_v43  ;;  %v10556_v40 = vpop.f32.mrb[27].mxu0 }
 0x41a   : > { %v11079_v46 = vadd.f32 %v11076_v38, %v10556_v40 }
 0x41b   : > { %v10625_v35 = vpop.f32.mrb[26].mxu1 }
 0x41c   : > { %v11110_v21 = vcombine.low %v11078_v49, %v11079_v46  ;;  %v11080_v45 = vadd.f32 %v11076_v38, %v10625_v35  ;;  %v10696_v11 = vpop.f32.mrb[28].mxu0  ;;  %v10627_v50 = vpop.f32.mrb[27].mxu1 }
 0x41d   : > { %v11082_v37 = vadd.f32 %v11076_v38, %v10696_v11  ;;  %v11081_v41 = vadd.f32 %v11076_v38, %v10627_v50  ;;  %v10698_v57 = vpop.f32.mrb[29].mxu0 }
 0x41e   : > { %11126 = vst [vmem:[%s15202_s21] sm:$0xff] %v11110_v21  ;;  %v11083_v6 = vadd.f32 %v11076_v38, %v10698_v57 }
 0x41f   : > { %v11111_v14 = vcombine.low %v11080_v45, %v11081_v41  ;;  %v10767_v36 = vpop.f32.mrb[28].mxu1 }
 0x420   : > { %v11112_v8 = vcombine.low %v11082_v37, %v11083_v6  ;;  %v11084_v4 = vadd.f32 %v11076_v38, %v10767_v36  ;;  %v10838_v39 = vpop.f32.mrb[30].mxu0  ;;  %v10769_v24 = vpop.f32.mrb[29].mxu1 }
 0x421   : > { %11127 = vst [vmem:[%s15202_s21 + $0x8] sm:$0xff] %v11111_v14  ;;  %v11086_v48 = vadd.f32 %v11076_v38, %v10838_v39  ;;  %v11085_v42 = vadd.f32 %v11076_v38, %v10769_v24  ;;  %v10840_v9 = vpop.f32.mrb[31].mxu0 }
 0x422   : > { %11128 = vst [vmem:[%s15202_s21 + $0x10] sm:$0xff] %v11112_v8  ;;  %v11087_v2 = vadd.f32 %v11076_v38, %v10840_v9 }
 0x423   : > { %v11113_v47 = vcombine.low %v11084_v4, %v11085_v42  ;;  %v10909_v10 = vpop.f32.mrb[30].mxu1 }
 0x424   : > { %v11114_v22 = vcombine.low %v11086_v48, %v11087_v2  ;;  %v11088_v53 = vadd.f32 %v11076_v38, %v10909_v10  ;;  %v10980_v20 = vpop.f32.mrb[32].mxu0  ;;  %v10911_v58 = vpop.f32.mrb[31].mxu1 }
 0x425   : > { %11129 = vst [vmem:[%s15202_s21 + $0x18] sm:$0xff] %v11113_v47  ;;  %v11090_v0 = vadd.f32 %v11076_v38, %v10980_v20  ;;  %v11089_v61 = vadd.f32 %v11076_v38, %v10911_v58  ;;  %v10982_v62 = vpop.f32.mrb[33].mxu0 }
 0x426   : > { %11130 = vst [vmem:[%s15202_s21 + $0x20] sm:$0xff] %v11114_v22  ;;  %v11091_v60 = vadd.f32 %v11076_v38, %v10982_v62 }
 0x427   : > { %v11115_v25 = vcombine.low %v11088_v53, %v11089_v61  ;;  %v11051_v23 = vpop.f32.mrb[32].mxu1 }
 0x428   : > { %v11116_v31 = vcombine.low %v11090_v0, %v11091_v60  ;;  %v11092_v28 = vadd.f32 %v11076_v38, %v11051_v23  ;;  %v11053_v59 = vpop.f32.mrb[33].mxu1 }
 0x429   : > { %11131 = vst [vmem:[%s15202_s21 + $0x28] sm:$0xff] %v11115_v25  ;;  %v11093_v1 = vadd.f32 %v11076_v38, %v11053_v59 }
 0x42a   : > { %11132 = vst [vmem:[%s15202_s21 + $0x30] sm:$0xff] %v11116_v31 }
 0x42b   : > { %v11117_v63 = vcombine.low %v11092_v28, %v11093_v1 }
 0x42d   : > { %11133 = vst [vmem:[%s15202_s21 + $0x38] sm:$0xff] %v11117_v63 }
 0x42e   : > { %12093 = shalt.err (!%p12090_p12)
}
 0x42f   : > { %s12094_s12 = scalar_lea.hbm %s15216_s26, 1024  ;;  %s12098_s20 = scalar_lea.hbm %s15591_s23, 2048 }
 0x430   : > { %p12095_p0 = scmp.ne.s32.totalorder %s15216_s26, %s12094_s12  ;;  %p12099_p7 = scmp.lt.u32.totalorder %s15216_s26, %s15591_s23 }
 0x431   : > { %p12100_p4 = scmp.lt.u32.totalorder %s12098_s20, %s12094_s12  ;;  %p12102_p5 = scmp.lt.u32.totalorder %s12094_s12, %s15216_s26 }
 0x432   : > { %p12096_p2 = pnand %p12095_p0, %p15592_p10 }
 0x433   : > { %p12101_p11 = por %p12100_p4, %p12099_p7 }
 0x434   : > { %p12097_p1 = pneg %p12096_p2 }
 0x435   : > { %p12103_p13 = por %p12102_p5, %p12101_p11 }
 0x437   : > { %p12104_p3 = pnand %p12103_p13, %p12097_p1 }
 0x439   : > { %12107 = shalt.err (!%p12104_p3)
}
 0x43a   : > { %11855 = dma.vmem_to_hbm [thread:$0]  (%p15592_p10), %s15218_s17, 1024, %s15216_s26, %s11135_s1  }
 0x43b PF: > { %s15593_s8 = sld [smem:[#allocation16_spill]]  ;;  %s15594_s30 = sld [smem:[#allocation24_spill]] }
 0x43c   : > { %s15595_s22 = sld [smem:[#allocation20_spill]] }
 0x441   : > { %s11163_s21 = sand.u32 1, %s15593_s8   ;;  %p15596_p9 = scmp.ne.s32.totalorder %s15594_s30, 0 }
 0x442   : > { %p15597_p6 = scmp.ge.s32.totalorder %s15595_s22, 2  ;;  %s11164_s25 = scalar_lea.sflag [#allocation5], %s11163_s21 }
 0x444   : > { %p11872_p8 = pnand %p15597_p6, %p15596_p9 }
 0x446   : > { %12145 = dma.done.wait (!%p11872_p8), %s11164_s25, 1024  }
 0x447   : > { %12147 = vsyncadd (!%p11872_p8), %s11164_s25, 4294966272  ;;  %s28_s10 = sadd.s32 1, %s15595_s22   ;;  %s15598_s16 = sld [smem:[#allocation17_spill]] }
 0x448   : > { %p25_p12 = scmp.ge.s32.totalorder %s28_s10, 4   ;;  %s15599_s29 = sld [smem:[#allocation22_spill]] }
 0x449   : > { %s15600_s30 = sld [smem:[#allocation19_spill]]  ;;  %s15601_s9 = sld [smem:[#allocation21_spill]] }
 0x44a   : > { %s15602_s27 = smov %s12154_s28  ;;  %27 = sbr.rel (!%p25_p12) target bundleno = 12 (0xc), region = 146 }
 0x44d   : > { %s15603_s28 = smov %s15598_s16 }
 0x451   :  { %11169 = vsyncpa [#allocation4], 1 }
 0x452   :  { %11171 = vsyncpa [#allocation4 + $0x1], 1 }
 0x453   :  { %11172 = vsyncpa [#allocation7], 1 }
 0x454   :  { %11174 = vsyncpa [#allocation7 + $0x1], 1 }
 0x455   :  { %11175 = vsyncpa [#allocation10], 1 }
 0x456   :  { %11176 = vsyncpa [#allocation5], 1 }
 0x457   :  { %11178 = vsyncpa [#allocation5 + $0x1], 1 }

</bundles_post_ra>
